<compile_context>
chip_gen: v5e
topology: v5e:2x2
jax: 0.10.0
libtpu: 0.0.40
codegen_flags: <defaults>
</compile_context>

<pallas_src>
import functools

import jax
import jax.numpy as jnp
from jax.experimental import pallas as pl
from jax.experimental.pallas import tpu as pltpu

TM_MAX = 2048                      # max row tile over the flattened N*H*W axis
_VMEM_SLACK = 4 * 1024 * 1024      # headroom for compiler-internal scratch


def _round_up(v, m):
    return (v + m - 1) // m * m


def _cdiv(a, b):
    return (a + b - 1) // b


# ---------------------------------------------------------------------------
# Hardware-derived per-call VMEM budget (v5e/v6e: 128 MiB, v7x: 64 MiB).
# ---------------------------------------------------------------------------
_VMEM_BUDGET_CACHE = [None]


def _vmem_budget():
    if _VMEM_BUDGET_CACHE[0] is None:
        try:
            cap = int(pltpu.get_tpu_info().vmem_capacity_bytes)
        except Exception:
            cap = 64 * 1024 * 1024          # conservative (v7x per-core)
        _VMEM_BUDGET_CACHE[0] = max(cap * 3 // 4, 24 * 1024 * 1024)
    return _VMEM_BUDGET_CACHE[0]


# ---------------------------------------------------------------------------
# Feature probe: single-buffered weight/bias operands (constant index_map).
# Double-buffering them only burns VMEM; older Pallas builds may not accept
# pipeline_mode on pallas_call BlockSpecs, so probe once and degrade.
# ---------------------------------------------------------------------------
_SINGLE_BUFFER_CACHE = [None]


def _probe_single_buffer():
    try:
        def k(x_ref, o_ref):
            o_ref[...] = x_ref[...]
        x = jnp.zeros((8, 128), jnp.float32)
        y = pl.pallas_call(
            k,
            out_shape=jax.ShapeDtypeStruct((8, 128), jnp.float32),
            grid=(1,),
            in_specs=[pl.BlockSpec((8, 128), lambda i: (0, 0),
                                   pipeline_mode=pl.Buffered(1))],
            out_specs=pl.BlockSpec((8, 128), lambda i: (0, 0)),
        )(x)
        jax.block_until_ready(y)
        return True
    except Exception:
        return False


def _const_spec_kwargs():
    if _SINGLE_BUFFER_CACHE[0] is None:
        _SINGLE_BUFFER_CACHE[0] = _probe_single_buffer()
    return {"pipeline_mode": pl.Buffered(1)} if _SINGLE_BUFFER_CACHE[0] else {}


# ---------------------------------------------------------------------------
# In-kernel math: cheap Mish (1 EUP exp + 1 approx reciprocal)
# ---------------------------------------------------------------------------
def _mish_f32(y):
    # mish(y) = y * tanh(softplus(y)) = y * e(e+2) / (e(e+2) + 2), e = exp(y).
    # Clamp keeps e*e finite in f32; for y > 30 the ratio is 1.0 to machine
    # precision so mish(y) == y exactly.
    e = jnp.exp(jnp.minimum(y, 30.0))
    t = e * (e + 2.0)
    return y * t * pl.reciprocal(t + 2.0, approx=True)


# ---------------------------------------------------------------------------
# Kernels
# ---------------------------------------------------------------------------
def _mm_bias_mish_kernel(x_ref, w_ref, b_ref, o_ref):
    y = jnp.dot(x_ref[...], w_ref[...], preferred_element_type=jnp.float32)
    o_ref[...] = _mish_f32(y + b_ref[...]).astype(o_ref.dtype)


def _mm_bias_mish_res_kernel(x_ref, w_ref, b_ref, r_ref, o_ref):
    y = jnp.dot(x_ref[...], w_ref[...], preferred_element_type=jnp.float32)
    y = _mish_f32(y + b_ref[...]) + r_ref[...].astype(jnp.float32)
    o_ref[...] = y.astype(o_ref.dtype)


def _dual_1x1_kernel(x_ref, w1_ref, b1_ref, w2_ref, b2_ref, o1_ref, o2_ref):
    # part1 | part2: the shared input tile is read once; two lane-separate
    # outputs avoid any post-hoc channel-slice copies.
    x = x_ref[...]
    y1 = jnp.dot(x, w1_ref[...], preferred_element_type=jnp.float32) + b1_ref[...]
    o1_ref[...] = _mish_f32(y1).astype(o1_ref.dtype)
    y2 = jnp.dot(x, w2_ref[...], preferred_element_type=jnp.float32) + b2_ref[...]
    o2_ref[...] = _mish_f32(y2).astype(o2_ref.dtype)


def _tail_mix_kernel(x1_ref, x2_ref, wt_ref, bt_ref, w1_ref, w2_ref, b_ref, o_ref):
    # t = block_tail(x2); y = conv_mix(concat(x1, t)).  Neither t nor the
    # channel concat ever leaves VMEM.
    t = jnp.dot(x2_ref[...], wt_ref[...], preferred_element_type=jnp.float32)
    t = _mish_f32(t + bt_ref[...]).astype(jnp.bfloat16)
    y = jnp.dot(x1_ref[...], w1_ref[...], preferred_element_type=jnp.float32)
    y = y + jnp.dot(t, w2_ref[...], preferred_element_type=jnp.float32)
    o_ref[...] = _mish_f32(y + b_ref[...]).astype(o_ref.dtype)


def _conv3x3_body(x_ref, w_ref, b_ref, o_ref, r_ref):
    # x_ref: (1, H+2, W+2, Cin) padded slab for one image (in-kernel im2col).
    _, H, W, Cout = o_ref.shape
    Cin = x_ref.shape[3]
    acc = jnp.zeros((H * W, Cout), jnp.float32)
    for kh in range(3):
        for kw in range(3):
            # Static shifted window of the padded slab; go through f32 for the
            # leading-dim-collapse reshape (layout-trivial when W % 8 == 0),
            # then back to bf16 for the MXU.
            xs = x_ref[0, kh:kh + H, kw:kw + W, :].astype(jnp.float32)
            xs = xs.reshape(H * W, Cin).astype(jnp.bfloat16)
            acc = acc + jnp.dot(xs, w_ref[kh * 3 + kw],
                                preferred_element_type=jnp.float32)
    y = _mish_f32(acc + b_ref[...])
    if r_ref is not None:
        y = y + r_ref[...].astype(jnp.float32).reshape(H * W, Cout)
    o_ref[...] = y.reshape(1, H, W, Cout).astype(o_ref.dtype)


def _conv3x3_kernel(x_ref, w_ref, b_ref, o_ref):
    _conv3x3_body(x_ref, w_ref, b_ref, o_ref, None)


def _conv3x3_res_kernel(x_ref, w_ref, b_ref, r_ref, o_ref):
    _conv3x3_body(x_ref, w_ref, b_ref, o_ref, r_ref)


# ---------------------------------------------------------------------------
# Row tiling (multiple of 8, minimal padding, >=2 grid steps for megacore,
# sized to the per-call VMEM budget).
# ---------------------------------------------------------------------------
def _row_tiling(M, per_row_bytes, fixed_bytes):
    budget = _vmem_budget()
    Mp8 = _round_up(max(M, 1), 8)
    avail = max(budget - fixed_bytes - _VMEM_SLACK, 8 * per_row_bytes)
    tm_cap = max(8, min(TM_MAX, (avail // per_row_bytes) // 8 * 8))
    if Mp8 <= tm_cap:
        if Mp8 >= 16:
            tm = _round_up(_cdiv(Mp8, 2), 8)      # 2 tiles: feed both v7x TCs
            return tm, tm * 2
        return Mp8, Mp8
    nt = _cdiv(Mp8, tm_cap)
    tm = _round_up(_cdiv(Mp8, nt), 8)
    return tm, tm * nt


# ---------------------------------------------------------------------------
# pallas_call wrappers
# ---------------------------------------------------------------------------
def _rowtiled_conv1x1(x2d, w2d, bias, residual2d=None, out_dtype=jnp.bfloat16):
    """mish(x @ w + b) [+ residual], row-tiled over M (also used post-im2col)."""
    M, K = x2d.shape
    C = w2d.shape[1]
    out_bytes = jnp.dtype(out_dtype).itemsize
    per_row = 2 * 2 * K + 2 * out_bytes * C
    if residual2d is not None:
        per_row += 2 * 2 * C
    ck = _const_spec_kwargs()
    nbuf_w = 1 if ck else 2
    fixed = nbuf_w * (2 * K * C + 4 * C)
    TM, Mp = _row_tiling(M, per_row, fixed)
    pad = Mp - M

    def _rows(a):
        a = a.astype(jnp.bfloat16)
        return jnp.pad(a, ((0, pad), (0, 0))) if pad else a

    args = [_rows(x2d), w2d.astype(jnp.bfloat16),
            bias.reshape(1, C).astype(jnp.float32)]
    in_specs = [pl.BlockSpec((TM, K), lambda i: (i, 0)),
                pl.BlockSpec((K, C), lambda i: (0, 0), **ck),
                pl.BlockSpec((1, C), lambda i: (0, 0), **ck)]
    if residual2d is not None:
        args.append(_rows(residual2d))
        in_specs.append(pl.BlockSpec((TM, C), lambda i: (i, 0)))
        kernel = _mm_bias_mish_res_kernel
    else:
        kernel = _mm_bias_mish_kernel

    out = pl.pallas_call(
        kernel,
        out_shape=jax.ShapeDtypeStruct((Mp, C), out_dtype),
        grid=(Mp // TM,),
        in_specs=in_specs,
        out_specs=pl.BlockSpec((TM, C), lambda i: (i, 0)),
        compiler_params=pltpu.CompilerParams(
            dimension_semantics=("parallel",),
            vmem_limit_bytes=_vmem_budget()),
        cost_estimate=pl.CostEstimate(
            flops=int(2 * Mp * K * C),
            transcendentals=int(Mp * C),
            bytes_accessed=int(2 * Mp * (K + C) + 2 * K * C + 4 * C)),
    )(*args)
    return out[:M] if pad else out


def _dual_conv1x1(x2d, p1, p2, out_dtype=jnp.bfloat16):
    """Fused part1 | part2: one kernel, one read of x, two outputs."""
    M, K = x2d.shape
    C1 = p1["w2d"].shape[1]
    C2 = p2["w2d"].shape[1]
    out_bytes = jnp.dtype(out_dtype).itemsize
    per_row = 2 * 2 * K + 2 * out_bytes * (C1 + C2)
    ck = _const_spec_kwargs()
    nbuf_w = 1 if ck else 2
    fixed = nbuf_w * (2 * K * (C1 + C2) + 4 * (C1 + C2))
    TM, Mp = _row_tiling(M, per_row, fixed)
    pad = Mp - M
    x = x2d.astype(jnp.bfloat16)
    if pad:
        x = jnp.pad(x, ((0, pad), (0, 0)))

    o1, o2 = pl.pallas_call(
        _dual_1x1_kernel,
        out_shape=(jax.ShapeDtypeStruct((Mp, C1), out_dtype),
                   jax.ShapeDtypeStruct((Mp, C2), out_dtype)),
        grid=(Mp // TM,),
        in_specs=[pl.BlockSpec((TM, K), lambda i: (i, 0)),
                  pl.BlockSpec((K, C1), lambda i: (0, 0), **ck),
                  pl.BlockSpec((1, C1), lambda i: (0, 0), **ck),
                  pl.BlockSpec((K, C2), lambda i: (0, 0), **ck),
                  pl.BlockSpec((1, C2), lambda i: (0, 0), **ck)],
        out_specs=(pl.BlockSpec((TM, C1), lambda i: (i, 0)),
                   pl.BlockSpec((TM, C2), lambda i: (i, 0))),
        compiler_params=pltpu.CompilerParams(
            dimension_semantics=("parallel",),
            vmem_limit_bytes=_vmem_budget()),
        cost_estimate=pl.CostEstimate(
            flops=int(2 * Mp * K * (C1 + C2)),
            transcendentals=int(Mp * (C1 + C2)),
            bytes_accessed=int(2 * Mp * (K + C1 + C2) + 2 * K * (C1 + C2))),
    )(x,
      p1["w2d"].astype(jnp.bfloat16), p1["bias"].reshape(1, C1).astype(jnp.float32),
      p2["w2d"].astype(jnp.bfloat16), p2["bias"].reshape(1, C2).astype(jnp.float32))
    if pad:
        o1, o2 = o1[:M], o2[:M]
    return o1, o2


def _tail_mix(x1_2d, x2_2d, p_tail, p_mix, c1, out_dtype=jnp.float32):
    """Fused block_tail (1x1) + conv_mix on concat([x1, tail(x2)])."""
    M, C1 = x1_2d.shape
    C2 = x2_2d.shape[1]
    Cout = p_mix["w2d"].shape[1]
    out_bytes = jnp.dtype(out_dtype).itemsize
    per_row = 2 * 2 * (C1 + C2) + 2 * out_bytes * Cout
    ck = _const_spec_kwargs()
    nbuf_w = 1 if ck else 2
    fixed = nbuf_w * 2 * (C2 * C2 + C1 * Cout + C2 * Cout)
    TM, Mp = _row_tiling(M, per_row, fixed)
    pad = Mp - M

    def _rows(a):
        a = a.astype(jnp.bfloat16)
        return jnp.pad(a, ((0, pad), (0, 0))) if pad else a

    wm = p_mix["w2d"]
    out = pl.pallas_call(
        _tail_mix_kernel,
        out_shape=jax.ShapeDtypeStruct((Mp, Cout), out_dtype),
        grid=(Mp // TM,),
        in_specs=[pl.BlockSpec((TM, C1), lambda i: (i, 0)),
                  pl.BlockSpec((TM, C2), lambda i: (i, 0)),
                  pl.BlockSpec((C2, C2), lambda i: (0, 0), **ck),
                  pl.BlockSpec((1, C2), lambda i: (0, 0), **ck),
                  pl.BlockSpec((C1, Cout), lambda i: (0, 0), **ck),
                  pl.BlockSpec((C2, Cout), lambda i: (0, 0), **ck),
                  pl.BlockSpec((1, Cout), lambda i: (0, 0), **ck)],
        out_specs=pl.BlockSpec((TM, Cout), lambda i: (i, 0)),
        compiler_params=pltpu.CompilerParams(
            dimension_semantics=("parallel",),
            vmem_limit_bytes=_vmem_budget()),
        cost_estimate=pl.CostEstimate(
            flops=int(2 * Mp * (C2 * C2 + C1 * Cout + C2 * Cout)),
            transcendentals=int(Mp * (C2 + Cout)),
            bytes_accessed=int(2 * Mp * (C1 + C2) + out_bytes * Mp * Cout
                               + 2 * (C2 * C2 + (C1 + C2) * Cout))),
    )(_rows(x1_2d), _rows(x2_2d),
      p_tail["w2d"].astype(jnp.bfloat16),
      p_tail["bias"].reshape(1, C2).astype(jnp.float32),
      wm[:c1].astype(jnp.bfloat16),
      wm[c1:].astype(jnp.bfloat16),
      p_mix["bias"].reshape(1, Cout).astype(jnp.float32))
    return out[:M] if pad else out


def _fused3x3_fits(H, W, cin, cout, with_res):
    if W % 8 != 0:
        return False                 # keeps the in-kernel reshapes layout-trivial
    need = (2 * (H + 2) * (W + 2) * cin * 2          # padded slab, dbl-buffered
            + 2 * H * W * cout * 2                   # output, dbl-buffered
            + (2 * H * W * cout * 2 if with_res else 0)
            + 9 * cin * cout * 2 + 4 * cout          # resident weights + bias
            + H * W * (cin + cout) * 4)              # in-kernel f32 staging
    return need + _VMEM_SLACK <= _vmem_budget()


def _conv3x3_s1(x_img, p, residual_img=None, out_dtype=jnp.bfloat16):
    """3x3 stride-1 ConvUnit with in-kernel im2col (per-image grid)."""
    N, H, W, Cin = x_img.shape
    Cout = p["w2d"].shape[1]
    xpad = jnp.pad(x_img.astype(jnp.bfloat16), ((0, 0), (1, 1), (1, 1), (0, 0)))
    w9 = p["w2d"].reshape(9, Cin, Cout).astype(jnp.bfloat16)
    bias = p["bias"].reshape(1, Cout).astype(jnp.float32)
    ck = _const_spec_kwargs()
    in_specs = [pl.BlockSpec((1, H + 2, W + 2, Cin), lambda n: (n, 0, 0, 0)),
                pl.BlockSpec((9, Cin, Cout), lambda n: (0, 0, 0), **ck),
                pl.BlockSpec((1, Cout), lambda n: (0, 0), **ck)]
    args = [xpad, w9, bias]
    if residual_img is not None:
        in_specs.append(pl.BlockSpec((1, H, W, Cout), lambda n: (n, 0, 0, 0)))
        args.append(residual_img.astype(jnp.bfloat16))
        kernel = _conv3x3_res_kernel
    else:
        kernel = _conv3x3_kernel
    return pl.pallas_call(
        kernel,
        out_shape=jax.ShapeDtypeStruct((N, H, W, Cout), out_dtype),
        grid=(N,),
        in_specs=in_specs,
        out_specs=pl.BlockSpec((1, H, W, Cout), lambda n: (n, 0, 0, 0)),
        compiler_params=pltpu.CompilerParams(
            dimension_semantics=("parallel",),
            vmem_limit_bytes=_vmem_budget()),
        cost_estimate=pl.CostEstimate(
            flops=int(2 * N * H * W * 9 * Cin * Cout),
            transcendentals=int(N * H * W * Cout),
            bytes_accessed=int(2 * (xpad.size + w9.size + N * H * W * Cout)
                               + (0 if residual_img is None
                                  else 2 * N * H * W * Cout))),
    )(*args)


# ---------------------------------------------------------------------------
# ConvUnit dispatcher + fallback host-side im2col
# ---------------------------------------------------------------------------
def _extract_patches(x_nhwc, k, stride, pad):
    """Host-side im2col in (kh, kw, cin) order -- used only for the stride-2
    downsample conv and for 3x3 shapes the fused kernel skips."""
    N, H, W, C = x_nhwc.shape
    xp = jnp.pad(x_nhwc, ((0, 0), (pad, pad), (pad, pad), (0, 0)))
    Ho = (H + 2 * pad - k) // stride + 1
    Wo = (W + 2 * pad - k) // stride + 1
    cols = []
    for kh in range(k):
        for kw in range(k):
            cols.append(xp[:, kh:kh + stride * (Ho - 1) + 1:stride,
                           kw:kw + stride * (Wo - 1) + 1:stride, :])
    p = jnp.concatenate(cols, axis=-1)
    return p.reshape(N * Ho * Wo, k * k * C), (N, Ho, Wo)


def conv_unit(x_img, p, residual_img=None, out_dtype=jnp.bfloat16):
    """ConvUnit = Conv2d(no bias) + BatchNorm2d(eval, folded) + Mish."""
    k, stride = p["k"], p["stride"]
    N, H, W, Cin = x_img.shape
    Cout = p["w2d"].shape[1]
    if k == 3 and stride == 1 and _fused3x3_fits(H, W, Cin, Cout,
                                                 residual_img is not None):
        return _conv3x3_s1(x_img, p, residual_img, out_dtype)
    if k == 1 and stride == 1:
        x2d = x_img.reshape(N * H * W, Cin)
        Ho, Wo = H, W
    else:
        x2d, (N, Ho, Wo) = _extract_patches(x_img, k, stride, k // 2)
    res2d = None
    if residual_img is not None:
        res2d = residual_img.reshape(N * Ho * Wo, Cout)
    y2d = _rowtiled_conv1x1(x2d, p["w2d"], p["bias"], res2d, out_dtype)
    return y2d.reshape(N, Ho, Wo, Cout)


# ---------------------------------------------------------------------------
# Deterministic parameter construction (shapes from the PyTorch __init__).
# Eval-mode BN scale is folded into the conv weight; weight is stored in
# (kh, kw, cin, cout) order as a (k*k*cin, cout) bf16 matrix.
# ---------------------------------------------------------------------------
def make_conv_unit_params(key, cin, cout, k, stride=1):
    k1, k2, k3, k4, k5 = jax.random.split(key, 5)
    w = 0.1 * jax.random.normal(k1, (cout, cin, k, k), jnp.float32)
    gamma = 1.0 + 0.1 * jax.random.normal(k2, (cout,), jnp.float32)
    beta = 0.1 * jax.random.normal(k3, (cout,), jnp.float32)
    mean = 0.1 * jax.random.normal(k4, (cout,), jnp.float32)
    var = 1.0 + 0.1 * jnp.abs(jax.random.normal(k5, (cout,), jnp.float32))
    eps = 1e-5
    scale = gamma / jnp.sqrt(var + eps)
    bias = beta - mean * scale
    wf = w * scale[:, None, None, None]                          # fold BN scale
    w2d = jnp.transpose(wf, (2, 3, 1, 0)).reshape(k * k * cin, cout)
    return dict(w2d=w2d.astype(jnp.bfloat16), bias=bias.astype(jnp.float32),
                k=k, stride=stride)


def make_csp_params(key, in_ch, out_ch, num_layers, is_head):
    keys = iter(jax.random.split(key, 64))
    P = {"downsample": make_conv_unit_params(next(keys), in_ch, out_ch, 3, stride=2)}
    if is_head:
        c1 = c2 = out_ch
        hidden = out_ch // 2
        n_res = 1
    else:
        c1 = c2 = out_ch // 2
        hidden = c2
        n_res = num_layers
    P["part1"] = make_conv_unit_params(next(keys), out_ch, c1, 1)
    P["part2"] = make_conv_unit_params(next(keys), out_ch, c2, 1)
    P["c1"] = c1
    P["res"] = [(make_conv_unit_params(next(keys), c2, hidden, 1),
                 make_conv_unit_params(next(keys), hidden, c2, 3))
                for _ in range(n_res)]
    P["block_tail"] = make_conv_unit_params(next(keys), c2, c2, 1)
    P["mix"] = make_conv_unit_params(next(keys), c1 + c2, out_ch, 1)
    return P


# ---------------------------------------------------------------------------
# CSPResBlock forward (mirrors the PyTorch module)
# ---------------------------------------------------------------------------
def csp_res_block(x_nchw, P, output_nchw_f32=True):
    # TODO(synk): if the surrounding graph is NHWC/bf16, call with
    # output_nchw_f32=False to skip the boundary transpose + f32 cast.
    x = jnp.transpose(x_nchw, (0, 2, 3, 1)).astype(jnp.bfloat16)  # NCHW -> NHWC
    x = conv_unit(x, P["downsample"])                  # 3x3 stride 2
    N, H, W, _ = x.shape
    M = N * H * W
    x1_2d, x2_2d = _dual_conv1x1(x.reshape(M, -1), P["part1"], P["part2"])
    c2 = x2_2d.shape[1]
    x2 = x2_2d.reshape(N, H, W, c2)
    for p1, p3 in P["res"]:                            # ResBlock: x + conv3(conv1(x))
        h = conv_unit(x2, p1)                          # 1x1 (hidden)
        x2 = conv_unit(h, p3, residual_img=x2)         # fused 3x3 + residual add
    y2d = _tail_mix(x1_2d, x2.reshape(M, c2), P["block_tail"], P["mix"], P["c1"],
                    out_dtype=jnp.float32 if output_nchw_f32 else jnp.bfloat16)
    y = y2d.reshape(N, H, W, -1)
    if output_nchw_f32:
        return jnp.transpose(y, (0, 3, 1, 2))          # back to NCHW (f32)
    return y


# ---------------------------------------------------------------------------
# Pure-JAX reference (same folded bf16 weights, f32 activations) for sanity.
# ---------------------------------------------------------------------------
def _conv_unit_ref(x, p):
    k, s = p["k"], p["stride"]
    cin = x.shape[-1]
    w = p["w2d"].astype(jnp.float32).reshape(k, k, cin, -1)       # HWIO
    y = jax.lax.conv_general_dilated(
        x, w, window_strides=(s, s), padding=[(k // 2, k // 2)] * 2,
        dimension_numbers=("NHWC", "HWIO", "NHWC"))
    y = y + p["bias"]
    return y * jnp.tanh(jax.nn.softplus(y))


def csp_res_block_ref(x_nchw, P):
    x = jnp.transpose(x_nchw, (0, 2, 3, 1)).astype(jnp.bfloat16).astype(jnp.float32)
    x = _conv_unit_ref(x, P["downsample"])
    x1 = _conv_unit_ref(x, P["part1"])
    x2 = _conv_unit_ref(x, P["part2"])
    for p1, p3 in P["res"]:
        x2 = x2 + _conv_unit_ref(_conv_unit_ref(x2, p1), p3)
    x2 = _conv_unit_ref(x2, P["block_tail"])
    y = _conv_unit_ref(jnp.concatenate([x1, x2], axis=-1), P["mix"])
    return jnp.transpose(y, (0, 3, 1, 2))


if __name__ == "__main__":
    key = jax.random.PRNGKey(0)
    kx, kp = jax.random.split(key)

    in_channels, out_channels, num_layers, is_head = 4, 8, 2, False
    x = jax.random.normal(kx, (2, in_channels, 16, 16), jnp.float32)
    params = make_csp_params(kp, in_channels, out_channels, num_layers, is_head)

    _vmem_budget()            # warm the hardware query (outside any trace)
    _const_spec_kwargs()      # run the single-buffer feature probe eagerly

    fwd = jax.jit(functools.partial(csp_res_block, P=params))
    y = fwd(x)
    jax.block_until_ready(y)

    assert y.shape == (2, out_channels, 8, 8), y.shape
    assert bool(jnp.all(jnp.isfinite(y)))

    # Loose sanity check against a pure-JAX reference (bf16 activations in the
    # Pallas path make the comparison approximate).
    y_ref = jax.jit(functools.partial(csp_res_block_ref, P=params))(x)
    jax.block_until_ready(y_ref)
    max_diff = float(jnp.max(jnp.abs(y - y_ref)))
    assert max_diff < 0.1, f"max abs diff vs reference too large: {max_diff}"

    print("KERNEL_OK")
</pallas_src>

<mosaic_0001>
module attributes {stable_mosaic.version = 11 : i64} {
  func.func @k(%arg0: i32, %arg1: memref<8x128xf32, #tpu.memory_space<vmem>>, %arg2: memref<8x128xf32, #tpu.memory_space<vmem>>) attributes {dimension_semantics = [#tpu.dimension_semantics<arbitrary>], iteration_bounds = array<i64: 1>, scalar_prefetch = 0 : i64, scratch_operands = 0 : i64, tpu.core_type = #tpu.core_type<tc>, window_params = [{pipeline_mode = #tpu.pipeline_mode<synchronous>, transform_indices = @transform_0, window_bounds = array<i64: 8, 128>}, {pipeline_mode = #tpu.pipeline_mode<synchronous>, transform_indices = @transform_1, window_bounds = array<i64: 8, 128>}]} {
    %c0 = arith.constant 0 : index
    %c0_0 = arith.constant 0 : index
    %0 = vector.load %arg1[%c0, %c0_0] : memref<8x128xf32, #tpu.memory_space<vmem>>, vector<8x128xf32>
    %c0_1 = arith.constant 0 : index
    %c0_2 = arith.constant 0 : index
    %1 = vector.load %arg2[%c0_1, %c0_2] : memref<8x128xf32, #tpu.memory_space<vmem>>, vector<8x128xf32>
    tpu.vector_store %arg2[%c0_1, %c0_2], %0 {strides = array<i32>} : memref<8x128xf32, #tpu.memory_space<vmem>>, vector<8x128xf32>,
    return
  }
  func.func @transform_0(%arg0: i32) -> (i32, i32) {
    %c0_i32 = arith.constant 0 : i32
    %c0_i32_0 = arith.constant 0 : i32
    %c0_i32_1 = arith.constant 0 : i32
    return %c0_i32, %c0_i32_0 : i32, i32
  }
  func.func @transform_1(%arg0: i32) -> (i32, i32) {
    %c0_i32 = arith.constant 0 : i32
    %c0_i32_0 = arith.constant 0 : i32
    %c0_i32_1 = arith.constant 0 : i32
    return %c0_i32, %c0_i32_0 : i32, i32
  }
}

module attributes {stable_mosaic.version = 11 : i64} {
  func.func @_mm_bias_mish_kernel(%arg0: i32, %arg1: memref<64x36xbf16, #tpu.memory_space<vmem>>, %arg2: memref<36x8xbf16, #tpu.memory_space<vmem>>, %arg3: memref<1x8xf32, #tpu.memory_space<vmem>>, %arg4: memref<64x8xbf16, #tpu.memory_space<vmem>>) attributes {dimension_semantics = [#tpu.dimension_semantics<parallel>], iteration_bounds = array<i64: 2>, scalar_prefetch = 0 : i64, scratch_operands = 0 : i64, tpu.core_type = #tpu.core_type<tc>, window_params = [{transform_indices = @transform_0, window_bounds = array<i64: 64, 36>}, {pipeline_mode = #tpu.pipeline_mode<synchronous>, transform_indices = @transform_1, window_bounds = array<i64: 36, 8>}, {pipeline_mode = #tpu.pipeline_mode<synchronous>, transform_indices = @transform_2, window_bounds = array<i64: 1, 8>}, {transform_indices = @transform_3, window_bounds = array<i64: 64, 8>}]} {
    %c0 = arith.constant 0 : index
    %c0_0 = arith.constant 0 : index
    %0 = vector.load %arg1[%c0, %c0_0] : memref<64x36xbf16, #tpu.memory_space<vmem>>, vector<64x36xbf16>
    %c0_1 = arith.constant 0 : index
    %c0_2 = arith.constant 0 : index
    %1 = vector.load %arg2[%c0_1, %c0_2] : memref<36x8xbf16, #tpu.memory_space<vmem>>, vector<36x8xbf16>
    %cst = arith.constant dense<0.000000e+00> : vector<64x8xf32>
    %2 = tpu.matmul %0, %1, %cst {dimension_numbers = #tpu.dot_dimension_numbers<[1], [0], [0], [1], [0, 0, 1, 1], [], []>} : vector<64x36xbf16>, vector<36x8xbf16>, vector<64x8xf32> -> vector<64x8xf32>
    %c0_3 = arith.constant 0 : index
    %c0_4 = arith.constant 0 : index
    %3 = vector.load %arg3[%c0_3, %c0_4] : memref<1x8xf32, #tpu.memory_space<vmem>>, vector<1x8xf32>
    %4 = vector.broadcast %3 : vector<1x8xf32> to vector<64x8xf32>
    %5 = arith.addf %2, %4 : vector<64x8xf32>
    %cst_5 = arith.constant 3.000000e+01 : f32
    %6 = vector.broadcast %cst_5 : f32 to vector<64x8xf32>
    %7 = arith.minimumf %5, %6 : vector<64x8xf32>
    %8 = math.exp %7 : vector<64x8xf32>
    %cst_6 = arith.constant 2.000000e+00 : f32
    %9 = vector.broadcast %cst_6 : f32 to vector<64x8xf32>
    %10 = arith.addf %8, %9 : vector<64x8xf32>
    %11 = arith.mulf %8, %10 : vector<64x8xf32>
    %12 = arith.mulf %5, %11 : vector<64x8xf32>
    %cst_7 = arith.constant 2.000000e+00 : f32
    %13 = vector.broadcast %cst_7 : f32 to vector<64x8xf32>
    %14 = arith.addf %11, %13 : vector<64x8xf32>
    %15 = tpu.reciprocal %14 {approx = true} : vector<64x8xf32> -> vector<64x8xf32>
    %16 = arith.mulf %12, %15 : vector<64x8xf32>
    %17 = arith.truncf %16 : vector<64x8xf32> to vector<64x8xbf16>
    %c0_8 = arith.constant 0 : index
    %c0_9 = arith.constant 0 : index
    %18 = vector.load %arg4[%c0_8, %c0_9] : memref<64x8xbf16, #tpu.memory_space<vmem>>, vector<64x8xbf16>
    tpu.vector_store %arg4[%c0_8, %c0_9], %17 {strides = array<i32>} : memref<64x8xbf16, #tpu.memory_space<vmem>>, vector<64x8xbf16>,
    return
  }
  func.func @transform_0(%arg0: i32) -> (i32, i32) {
    %c0_i32 = arith.constant 0 : i32
    %c0_i32_0 = arith.constant 0 : i32
    return %arg0, %c0_i32 : i32, i32
  }
  func.func @transform_1(%arg0: i32) -> (i32, i32) {
    %c0_i32 = arith.constant 0 : i32
    %c0_i32_0 = arith.constant 0 : i32
    %c0_i32_1 = arith.constant 0 : i32
    return %c0_i32, %c0_i32_0 : i32, i32
  }
  func.func @transform_2(%arg0: i32) -> (i32, i32) {
    %c0_i32 = arith.constant 0 : i32
    %c0_i32_0 = arith.constant 0 : i32
    %c0_i32_1 = arith.constant 0 : i32
    return %c0_i32, %c0_i32_0 : i32, i32
  }
  func.func @transform_3(%arg0: i32) -> (i32, i32) {
    %c0_i32 = arith.constant 0 : i32
    %c0_i32_0 = arith.constant 0 : i32
    return %arg0, %c0_i32 : i32, i32
  }
}

module attributes {stable_mosaic.version = 11 : i64} {
  func.func @_mm_bias_mish_kernel(%arg0: i32, %arg1: memref<64x4xbf16, #tpu.memory_space<vmem>>, %arg2: memref<4x4xbf16, #tpu.memory_space<vmem>>, %arg3: memref<1x4xf32, #tpu.memory_space<vmem>>, %arg4: memref<64x4xbf16, #tpu.memory_space<vmem>>) attributes {dimension_semantics = [#tpu.dimension_semantics<parallel>], iteration_bounds = array<i64: 2>, scalar_prefetch = 0 : i64, scratch_operands = 0 : i64, tpu.core_type = #tpu.core_type<tc>, window_params = [{transform_indices = @transform_0, window_bounds = array<i64: 64, 4>}, {pipeline_mode = #tpu.pipeline_mode<synchronous>, transform_indices = @transform_1, window_bounds = array<i64: 4, 4>}, {pipeline_mode = #tpu.pipeline_mode<synchronous>, transform_indices = @transform_2, window_bounds = array<i64: 1, 4>}, {transform_indices = @transform_3, window_bounds = array<i64: 64, 4>}]} {
    %c0 = arith.constant 0 : index
    %c0_0 = arith.constant 0 : index
    %0 = vector.load %arg1[%c0, %c0_0] : memref<64x4xbf16, #tpu.memory_space<vmem>>, vector<64x4xbf16>
    %c0_1 = arith.constant 0 : index
    %c0_2 = arith.constant 0 : index
    %1 = vector.load %arg2[%c0_1, %c0_2] : memref<4x4xbf16, #tpu.memory_space<vmem>>, vector<4x4xbf16>
    %cst = arith.constant dense<0.000000e+00> : vector<64x4xf32>
    %2 = tpu.matmul %0, %1, %cst {dimension_numbers = #tpu.dot_dimension_numbers<[1], [0], [0], [1], [0, 0, 1, 1], [], []>} : vector<64x4xbf16>, vector<4x4xbf16>, vector<64x4xf32> -> vector<64x4xf32>
    %c0_3 = arith.constant 0 : index
    %c0_4 = arith.constant 0 : index
    %3 = vector.load %arg3[%c0_3, %c0_4] : memref<1x4xf32, #tpu.memory_space<vmem>>, vector<1x4xf32>
    %4 = vector.broadcast %3 : vector<1x4xf32> to vector<64x4xf32>
    %5 = arith.addf %2, %4 : vector<64x4xf32>
    %cst_5 = arith.constant 3.000000e+01 : f32
    %6 = vector.broadcast %cst_5 : f32 to vector<64x4xf32>
    %7 = arith.minimumf %5, %6 : vector<64x4xf32>
    %8 = math.exp %7 : vector<64x4xf32>
    %cst_6 = arith.constant 2.000000e+00 : f32
    %9 = vector.broadcast %cst_6 : f32 to vector<64x4xf32>
    %10 = arith.addf %8, %9 : vector<64x4xf32>
    %11 = arith.mulf %8, %10 : vector<64x4xf32>
    %12 = arith.mulf %5, %11 : vector<64x4xf32>
    %cst_7 = arith.constant 2.000000e+00 : f32
    %13 = vector.broadcast %cst_7 : f32 to vector<64x4xf32>
    %14 = arith.addf %11, %13 : vector<64x4xf32>
    %15 = tpu.reciprocal %14 {approx = true} : vector<64x4xf32> -> vector<64x4xf32>
    %16 = arith.mulf %12, %15 : vector<64x4xf32>
    %17 = arith.truncf %16 : vector<64x4xf32> to vector<64x4xbf16>
    %c0_8 = arith.constant 0 : index
    %c0_9 = arith.constant 0 : index
    %18 = vector.load %arg4[%c0_8, %c0_9] : memref<64x4xbf16, #tpu.memory_space<vmem>>, vector<64x4xbf16>
    tpu.vector_store %arg4[%c0_8, %c0_9], %17 {strides = array<i32>} : memref<64x4xbf16, #tpu.memory_space<vmem>>, vector<64x4xbf16>,
    return
  }
  func.func @transform_0(%arg0: i32) -> (i32, i32) {
    %c0_i32 = arith.constant 0 : i32
    %c0_i32_0 = arith.constant 0 : i32
    return %arg0, %c0_i32 : i32, i32
  }
  func.func @transform_1(%arg0: i32) -> (i32, i32) {
    %c0_i32 = arith.constant 0 : i32
    %c0_i32_0 = arith.constant 0 : i32
    %c0_i32_1 = arith.constant 0 : i32
    return %c0_i32, %c0_i32_0 : i32, i32
  }
  func.func @transform_2(%arg0: i32) -> (i32, i32) {
    %c0_i32 = arith.constant 0 : i32
    %c0_i32_0 = arith.constant 0 : i32
    %c0_i32_1 = arith.constant 0 : i32
    return %c0_i32, %c0_i32_0 : i32, i32
  }
  func.func @transform_3(%arg0: i32) -> (i32, i32) {
    %c0_i32 = arith.constant 0 : i32
    %c0_i32_0 = arith.constant 0 : i32
    return %arg0, %c0_i32 : i32, i32
  }
}

module attributes {stable_mosaic.version = 11 : i64} {
  func.func @_dual_1x1_kernel(%arg0: i32, %arg1: memref<64x8xbf16, #tpu.memory_space<vmem>>, %arg2: memref<8x4xbf16, #tpu.memory_space<vmem>>, %arg3: memref<1x4xf32, #tpu.memory_space<vmem>>, %arg4: memref<8x4xbf16, #tpu.memory_space<vmem>>, %arg5: memref<1x4xf32, #tpu.memory_space<vmem>>, %arg6: memref<64x4xbf16, #tpu.memory_space<vmem>>, %arg7: memref<64x4xbf16, #tpu.memory_space<vmem>>) attributes {dimension_semantics = [#tpu.dimension_semantics<parallel>], iteration_bounds = array<i64: 2>, scalar_prefetch = 0 : i64, scratch_operands = 0 : i64, tpu.core_type = #tpu.core_type<tc>, window_params = [{transform_indices = @transform_0, window_bounds = array<i64: 64, 8>}, {pipeline_mode = #tpu.pipeline_mode<synchronous>, transform_indices = @transform_1, window_bounds = array<i64: 8, 4>}, {pipeline_mode = #tpu.pipeline_mode<synchronous>, transform_indices = @transform_2, window_bounds = array<i64: 1, 4>}, {pipeline_mode = #tpu.pipeline_mode<synchronous>, transform_indices = @transform_3, window_bounds = array<i64: 8, 4>}, {pipeline_mode = #tpu.pipeline_mode<synchronous>, transform_indices = @transform_4, window_bounds = array<i64: 1, 4>}, {transform_indices = @transform_5, window_bounds = array<i64: 64, 4>}, {transform_indices = @transform_6, window_bounds = array<i64: 64, 4>}]} {
    %c0 = arith.constant 0 : index
    %c0_0 = arith.constant 0 : index
    %0 = vector.load %arg1[%c0, %c0_0] : memref<64x8xbf16, #tpu.memory_space<vmem>>, vector<64x8xbf16>
    %c0_1 = arith.constant 0 : index
    %c0_2 = arith.constant 0 : index
    %1 = vector.load %arg2[%c0_1, %c0_2] : memref<8x4xbf16, #tpu.memory_space<vmem>>, vector<8x4xbf16>
    %cst = arith.constant dense<0.000000e+00> : vector<64x4xf32>
    %2 = tpu.matmul %0, %1, %cst {dimension_numbers = #tpu.dot_dimension_numbers<[1], [0], [0], [1], [0, 0, 1, 1], [], []>} : vector<64x8xbf16>, vector<8x4xbf16>, vector<64x4xf32> -> vector<64x4xf32>
    %c0_3 = arith.constant 0 : index
    %c0_4 = arith.constant 0 : index
    %3 = vector.load %arg3[%c0_3, %c0_4] : memref<1x4xf32, #tpu.memory_space<vmem>>, vector<1x4xf32>
    %4 = vector.broadcast %3 : vector<1x4xf32> to vector<64x4xf32>
    %5 = arith.addf %2, %4 : vector<64x4xf32>
    %cst_5 = arith.constant 3.000000e+01 : f32
    %6 = vector.broadcast %cst_5 : f32 to vector<64x4xf32>
    %7 = arith.minimumf %5, %6 : vector<64x4xf32>
    %8 = math.exp %7 : vector<64x4xf32>
    %cst_6 = arith.constant 2.000000e+00 : f32
    %9 = vector.broadcast %cst_6 : f32 to vector<64x4xf32>
    %10 = arith.addf %8, %9 : vector<64x4xf32>
    %11 = arith.mulf %8, %10 : vector<64x4xf32>
    %12 = arith.mulf %5, %11 : vector<64x4xf32>
    %cst_7 = arith.constant 2.000000e+00 : f32
    %13 = vector.broadcast %cst_7 : f32 to vector<64x4xf32>
    %14 = arith.addf %11, %13 : vector<64x4xf32>
    %15 = tpu.reciprocal %14 {approx = true} : vector<64x4xf32> -> vector<64x4xf32>
    %16 = arith.mulf %12, %15 : vector<64x4xf32>
    %17 = arith.truncf %16 : vector<64x4xf32> to vector<64x4xbf16>
    %c0_8 = arith.constant 0 : index
    %c0_9 = arith.constant 0 : index
    %18 = vector.load %arg6[%c0_8, %c0_9] : memref<64x4xbf16, #tpu.memory_space<vmem>>, vector<64x4xbf16>
    tpu.vector_store %arg6[%c0_8, %c0_9], %17 {strides = array<i32>} : memref<64x4xbf16, #tpu.memory_space<vmem>>, vector<64x4xbf16>,
    %c0_10 = arith.constant 0 : index
    %c0_11 = arith.constant 0 : index
    %19 = vector.load %arg4[%c0_10, %c0_11] : memref<8x4xbf16, #tpu.memory_space<vmem>>, vector<8x4xbf16>
    %cst_12 = arith.constant dense<0.000000e+00> : vector<64x4xf32>
    %20 = tpu.matmul %0, %19, %cst_12 {dimension_numbers = #tpu.dot_dimension_numbers<[1], [0], [0], [1], [0, 0, 1, 1], [], []>} : vector<64x8xbf16>, vector<8x4xbf16>, vector<64x4xf32> -> vector<64x4xf32>
    %c0_13 = arith.constant 0 : index
    %c0_14 = arith.constant 0 : index
    %21 = vector.load %arg5[%c0_13, %c0_14] : memref<1x4xf32, #tpu.memory_space<vmem>>, vector<1x4xf32>
    %22 = vector.broadcast %21 : vector<1x4xf32> to vector<64x4xf32>
    %23 = arith.addf %20, %22 : vector<64x4xf32>
    %cst_15 = arith.constant 3.000000e+01 : f32
    %24 = vector.broadcast %cst_15 : f32 to vector<64x4xf32>
    %25 = arith.minimumf %23, %24 : vector<64x4xf32>
    %26 = math.exp %25 : vector<64x4xf32>
    %cst_16 = arith.constant 2.000000e+00 : f32
    %27 = vector.broadcast %cst_16 : f32 to vector<64x4xf32>
    %28 = arith.addf %26, %27 : vector<64x4xf32>
    %29 = arith.mulf %26, %28 : vector<64x4xf32>
    %30 = arith.mulf %23, %29 : vector<64x4xf32>
    %cst_17 = arith.constant 2.000000e+00 : f32
    %31 = vector.broadcast %cst_17 : f32 to vector<64x4xf32>
    %32 = arith.addf %29, %31 : vector<64x4xf32>
    %33 = tpu.reciprocal %32 {approx = true} : vector<64x4xf32> -> vector<64x4xf32>
    %34 = arith.mulf %30, %33 : vector<64x4xf32>
    %35 = arith.truncf %34 : vector<64x4xf32> to vector<64x4xbf16>
    %c0_18 = arith.constant 0 : index
    %c0_19 = arith.constant 0 : index
    %36 = vector.load %arg7[%c0_18, %c0_19] : memref<64x4xbf16, #tpu.memory_space<vmem>>, vector<64x4xbf16>
    tpu.vector_store %arg7[%c0_18, %c0_19], %35 {strides = array<i32>} : memref<64x4xbf16, #tpu.memory_space<vmem>>, vector<64x4xbf16>,
    return
  }
  func.func @transform_0(%arg0: i32) -> (i32, i32) {
    %c0_i32 = arith.constant 0 : i32
    %c0_i32_0 = arith.constant 0 : i32
    return %arg0, %c0_i32 : i32, i32
  }
  func.func @transform_1(%arg0: i32) -> (i32, i32) {
    %c0_i32 = arith.constant 0 : i32
    %c0_i32_0 = arith.constant 0 : i32
    %c0_i32_1 = arith.constant 0 : i32
    return %c0_i32, %c0_i32_0 : i32, i32
  }
  func.func @transform_2(%arg0: i32) -> (i32, i32) {
    %c0_i32 = arith.constant 0 : i32
    %c0_i32_0 = arith.constant 0 : i32
    %c0_i32_1 = arith.constant 0 : i32
    return %c0_i32, %c0_i32_0 : i32, i32
  }
  func.func @transform_3(%arg0: i32) -> (i32, i32) {
    %c0_i32 = arith.constant 0 : i32
    %c0_i32_0 = arith.constant 0 : i32
    %c0_i32_1 = arith.constant 0 : i32
    return %c0_i32, %c0_i32_0 : i32, i32
  }
  func.func @transform_4(%arg0: i32) -> (i32, i32) {
    %c0_i32 = arith.constant 0 : i32
    %c0_i32_0 = arith.constant 0 : i32
    %c0_i32_1 = arith.constant 0 : i32
    return %c0_i32, %c0_i32_0 : i32, i32
  }
  func.func @transform_5(%arg0: i32) -> (i32, i32) {
    %c0_i32 = arith.constant 0 : i32
    %c0_i32_0 = arith.constant 0 : i32
    return %arg0, %c0_i32 : i32, i32
  }
  func.func @transform_6(%arg0: i32) -> (i32, i32) {
    %c0_i32 = arith.constant 0 : i32
    %c0_i32_0 = arith.constant 0 : i32
    return %arg0, %c0_i32 : i32, i32
  }
}

module attributes {stable_mosaic.version = 11 : i64} {
  func.func @_conv3x3_res_kernel(%arg0: i32, %arg1: memref<1x10x10x4xbf16, #tpu.memory_space<vmem>>, %arg2: memref<9x4x4xbf16, #tpu.memory_space<vmem>>, %arg3: memref<1x4xf32, #tpu.memory_space<vmem>>, %arg4: memref<1x8x8x4xbf16, #tpu.memory_space<vmem>>, %arg5: memref<1x8x8x4xbf16, #tpu.memory_space<vmem>>) attributes {dimension_semantics = [#tpu.dimension_semantics<parallel>], iteration_bounds = array<i64: 2>, scalar_prefetch = 0 : i64, scratch_operands = 0 : i64, tpu.core_type = #tpu.core_type<tc>, window_params = [{transform_indices = @transform_0, window_bounds = array<i64: 1, 10, 10, 4>}, {pipeline_mode = #tpu.pipeline_mode<synchronous>, transform_indices = @transform_1, window_bounds = array<i64: 9, 4, 4>}, {pipeline_mode = #tpu.pipeline_mode<synchronous>, transform_indices = @transform_2, window_bounds = array<i64: 1, 4>}, {transform_indices = @transform_3, window_bounds = array<i64: 1, 8, 8, 4>}, {transform_indices = @transform_4, window_bounds = array<i64: 1, 8, 8, 4>}]} {
    %cst = arith.constant 0.000000e+00 : f32
    %0 = vector.broadcast %cst : f32 to vector<64x4xf32>
    %c0 = arith.constant 0 : index
    %c0_0 = arith.constant 0 : index
    %c0_1 = arith.constant 0 : index
    %c0_2 = arith.constant 0 : index
    %1 = vector.load %arg1[%c0, %c0_0, %c0_1, %c0_2] : memref<1x10x10x4xbf16, #tpu.memory_space<vmem>>, vector<1x8x8x4xbf16>
    %2 = vector.shape_cast %1 : vector<1x8x8x4xbf16> to vector<8x8x4xbf16>
    %3 = arith.extf %2 : vector<8x8x4xbf16> to vector<8x8x4xf32>
    %4 = vector.shape_cast %3 : vector<8x8x4xf32> to vector<64x4xf32>
    %5 = arith.truncf %4 : vector<64x4xf32> to vector<64x4xbf16>
    %c0_3 = arith.constant 0 : index
    %c0_4 = arith.constant 0 : index
    %c0_5 = arith.constant 0 : index
    %6 = vector.load %arg2[%c0_3, %c0_4, %c0_5] : memref<9x4x4xbf16, #tpu.memory_space<vmem>>, vector<1x4x4xbf16>
    %7 = vector.shape_cast %6 : vector<1x4x4xbf16> to vector<4x4xbf16>
    %cst_6 = arith.constant dense<0.000000e+00> : vector<64x4xf32>
    %8 = tpu.matmul %5, %7, %cst_6 {dimension_numbers = #tpu.dot_dimension_numbers<[1], [0], [0], [1], [0, 0, 1, 1], [], []>} : vector<64x4xbf16>, vector<4x4xbf16>, vector<64x4xf32> -> vector<64x4xf32>
    %9 = arith.addf %0, %8 : vector<64x4xf32>
    %c0_7 = arith.constant 0 : index
    %c0_8 = arith.constant 0 : index
    %c1 = arith.constant 1 : index
    %c0_9 = arith.constant 0 : index
    %10 = vector.load %arg1[%c0_7, %c0_8, %c1, %c0_9] : memref<1x10x10x4xbf16, #tpu.memory_space<vmem>>, vector<1x8x8x4xbf16>
    %11 = vector.shape_cast %10 : vector<1x8x8x4xbf16> to vector<8x8x4xbf16>
    %12 = arith.extf %11 : vector<8x8x4xbf16> to vector<8x8x4xf32>
    %13 = vector.shape_cast %12 : vector<8x8x4xf32> to vector<64x4xf32>
    %14 = arith.truncf %13 : vector<64x4xf32> to vector<64x4xbf16>
    %c1_10 = arith.constant 1 : index
    %c0_11 = arith.constant 0 : index
    %c0_12 = arith.constant 0 : index
    %15 = vector.load %arg2[%c1_10, %c0_11, %c0_12] : memref<9x4x4xbf16, #tpu.memory_space<vmem>>, vector<1x4x4xbf16>
    %16 = vector.shape_cast %15 : vector<1x4x4xbf16> to vector<4x4xbf16>
    %cst_13 = arith.constant dense<0.000000e+00> : vector<64x4xf32>
    %17 = tpu.matmul %14, %16, %cst_13 {dimension_numbers = #tpu.dot_dimension_numbers<[1], [0], [0], [1], [0, 0, 1, 1], [], []>} : vector<64x4xbf16>, vector<4x4xbf16>, vector<64x4xf32> -> vector<64x4xf32>
    %18 = arith.addf %9, %17 : vector<64x4xf32>
    %c0_14 = arith.constant 0 : index
    %c0_15 = arith.constant 0 : index
    %c2 = arith.constant 2 : index
    %c0_16 = arith.constant 0 : index
    %19 = vector.load %arg1[%c0_14, %c0_15, %c2, %c0_16] : memref<1x10x10x4xbf16, #tpu.memory_space<vmem>>, vector<1x8x8x4xbf16>
    %20 = vector.shape_cast %19 : vector<1x8x8x4xbf16> to vector<8x8x4xbf16>
    %21 = arith.extf %20 : vector<8x8x4xbf16> to vector<8x8x4xf32>
    %22 = vector.shape_cast %21 : vector<8x8x4xf32> to vector<64x4xf32>
    %23 = arith.truncf %22 : vector<64x4xf32> to vector<64x4xbf16>
    %c2_17 = arith.constant 2 : index
    %c0_18 = arith.constant 0 : index
    %c0_19 = arith.constant 0 : index
    %24 = vector.load %arg2[%c2_17, %c0_18, %c0_19] : memref<9x4x4xbf16, #tpu.memory_space<vmem>>, vector<1x4x4xbf16>
    %25 = vector.shape_cast %24 : vector<1x4x4xbf16> to vector<4x4xbf16>
    %cst_20 = arith.constant dense<0.000000e+00> : vector<64x4xf32>
    %26 = tpu.matmul %23, %25, %cst_20 {dimension_numbers = #tpu.dot_dimension_numbers<[1], [0], [0], [1], [0, 0, 1, 1], [], []>} : vector<64x4xbf16>, vector<4x4xbf16>, vector<64x4xf32> -> vector<64x4xf32>
    %27 = arith.addf %18, %26 : vector<64x4xf32>
    %c0_21 = arith.constant 0 : index
    %c1_22 = arith.constant 1 : index
    %c0_23 = arith.constant 0 : index
    %c0_24 = arith.constant 0 : index
    %28 = vector.load %arg1[%c0_21, %c1_22, %c0_23, %c0_24] : memref<1x10x10x4xbf16, #tpu.memory_space<vmem>>, vector<1x8x8x4xbf16>
    %29 = vector.shape_cast %28 : vector<1x8x8x4xbf16> to vector<8x8x4xbf16>
    %30 = arith.extf %29 : vector<8x8x4xbf16> to vector<8x8x4xf32>
    %31 = vector.shape_cast %30 : vector<8x8x4xf32> to vector<64x4xf32>
    %32 = arith.truncf %31 : vector<64x4xf32> to vector<64x4xbf16>
    %c3 = arith.constant 3 : index
    %c0_25 = arith.constant 0 : index
    %c0_26 = arith.constant 0 : index
    %33 = vector.load %arg2[%c3, %c0_25, %c0_26] : memref<9x4x4xbf16, #tpu.memory_space<vmem>>, vector<1x4x4xbf16>
    %34 = vector.shape_cast %33 : vector<1x4x4xbf16> to vector<4x4xbf16>
    %cst_27 = arith.constant dense<0.000000e+00> : vector<64x4xf32>
    %35 = tpu.matmul %32, %34, %cst_27 {dimension_numbers = #tpu.dot_dimension_numbers<[1], [0], [0], [1], [0, 0, 1, 1], [], []>} : vector<64x4xbf16>, vector<4x4xbf16>, vector<64x4xf32> -> vector<64x4xf32>
    %36 = arith.addf %27, %35 : vector<64x4xf32>
    %c0_28 = arith.constant 0 : index
    %c1_29 = arith.constant 1 : index
    %c1_30 = arith.constant 1 : index
    %c0_31 = arith.constant 0 : index
    %37 = vector.load %arg1[%c0_28, %c1_29, %c1_30, %c0_31] : memref<1x10x10x4xbf16, #tpu.memory_space<vmem>>, vector<1x8x8x4xbf16>
    %38 = vector.shape_cast %37 : vector<1x8x8x4xbf16> to vector<8x8x4xbf16>
    %39 = arith.extf %38 : vector<8x8x4xbf16> to vector<8x8x4xf32>
    %40 = vector.shape_cast %39 : vector<8x8x4xf32> to vector<64x4xf32>
    %41 = arith.truncf %40 : vector<64x4xf32> to vector<64x4xbf16>
    %c4 = arith.constant 4 : index
    %c0_32 = arith.constant 0 : index
    %c0_33 = arith.constant 0 : index
    %42 = vector.load %arg2[%c4, %c0_32, %c0_33] : memref<9x4x4xbf16, #tpu.memory_space<vmem>>, vector<1x4x4xbf16>
    %43 = vector.shape_cast %42 : vector<1x4x4xbf16> to vector<4x4xbf16>
    %cst_34 = arith.constant dense<0.000000e+00> : vector<64x4xf32>
    %44 = tpu.matmul %41, %43, %cst_34 {dimension_numbers = #tpu.dot_dimension_numbers<[1], [0], [0], [1], [0, 0, 1, 1], [], []>} : vector<64x4xbf16>, vector<4x4xbf16>, vector<64x4xf32> -> vector<64x4xf32>
    %45 = arith.addf %36, %44 : vector<64x4xf32>
    %c0_35 = arith.constant 0 : index
    %c1_36 = arith.constant 1 : index
    %c2_37 = arith.constant 2 : index
    %c0_38 = arith.constant 0 : index
    %46 = vector.load %arg1[%c0_35, %c1_36, %c2_37, %c0_38] : memref<1x10x10x4xbf16, #tpu.memory_space<vmem>>, vector<1x8x8x4xbf16>
    %47 = vector.shape_cast %46 : vector<1x8x8x4xbf16> to vector<8x8x4xbf16>
    %48 = arith.extf %47 : vector<8x8x4xbf16> to vector<8x8x4xf32>
    %49 = vector.shape_cast %48 : vector<8x8x4xf32> to vector<64x4xf32>
    %50 = arith.truncf %49 : vector<64x4xf32> to vector<64x4xbf16>
    %c5 = arith.constant 5 : index
    %c0_39 = arith.constant 0 : index
    %c0_40 = arith.constant 0 : index
    %51 = vector.load %arg2[%c5, %c0_39, %c0_40] : memref<9x4x4xbf16, #tpu.memory_space<vmem>>, vector<1x4x4xbf16>
    %52 = vector.shape_cast %51 : vector<1x4x4xbf16> to vector<4x4xbf16>
    %cst_41 = arith.constant dense<0.000000e+00> : vector<64x4xf32>
    %53 = tpu.matmul %50, %52, %cst_41 {dimension_numbers = #tpu.dot_dimension_numbers<[1], [0], [0], [1], [0, 0, 1, 1], [], []>} : vector<64x4xbf16>, vector<4x4xbf16>, vector<64x4xf32> -> vector<64x4xf32>
    %54 = arith.addf %45, %53 : vector<64x4xf32>
    %c0_42 = arith.constant 0 : index
    %c2_43 = arith.constant 2 : index
    %c0_44 = arith.constant 0 : index
    %c0_45 = arith.constant 0 : index
    %55 = vector.load %arg1[%c0_42, %c2_43, %c0_44, %c0_45] : memref<1x10x10x4xbf16, #tpu.memory_space<vmem>>, vector<1x8x8x4xbf16>
    %56 = vector.shape_cast %55 : vector<1x8x8x4xbf16> to vector<8x8x4xbf16>
    %57 = arith.extf %56 : vector<8x8x4xbf16> to vector<8x8x4xf32>
    %58 = vector.shape_cast %57 : vector<8x8x4xf32> to vector<64x4xf32>
    %59 = arith.truncf %58 : vector<64x4xf32> to vector<64x4xbf16>
    %c6 = arith.constant 6 : index
    %c0_46 = arith.constant 0 : index
    %c0_47 = arith.constant 0 : index
    %60 = vector.load %arg2[%c6, %c0_46, %c0_47] : memref<9x4x4xbf16, #tpu.memory_space<vmem>>, vector<1x4x4xbf16>
    %61 = vector.shape_cast %60 : vector<1x4x4xbf16> to vector<4x4xbf16>
    %cst_48 = arith.constant dense<0.000000e+00> : vector<64x4xf32>
    %62 = tpu.matmul %59, %61, %cst_48 {dimension_numbers = #tpu.dot_dimension_numbers<[1], [0], [0], [1], [0, 0, 1, 1], [], []>} : vector<64x4xbf16>, vector<4x4xbf16>, vector<64x4xf32> -> vector<64x4xf32>
    %63 = arith.addf %54, %62 : vector<64x4xf32>
    %c0_49 = arith.constant 0 : index
    %c2_50 = arith.constant 2 : index
    %c1_51 = arith.constant 1 : index
    %c0_52 = arith.constant 0 : index
    %64 = vector.load %arg1[%c0_49, %c2_50, %c1_51, %c0_52] : memref<1x10x10x4xbf16, #tpu.memory_space<vmem>>, vector<1x8x8x4xbf16>
    %65 = vector.shape_cast %64 : vector<1x8x8x4xbf16> to vector<8x8x4xbf16>
    %66 = arith.extf %65 : vector<8x8x4xbf16> to vector<8x8x4xf32>
    %67 = vector.shape_cast %66 : vector<8x8x4xf32> to vector<64x4xf32>
    %68 = arith.truncf %67 : vector<64x4xf32> to vector<64x4xbf16>
    %c7 = arith.constant 7 : index
    %c0_53 = arith.constant 0 : index
    %c0_54 = arith.constant 0 : index
    %69 = vector.load %arg2[%c7, %c0_53, %c0_54] : memref<9x4x4xbf16, #tpu.memory_space<vmem>>, vector<1x4x4xbf16>
    %70 = vector.shape_cast %69 : vector<1x4x4xbf16> to vector<4x4xbf16>
    %cst_55 = arith.constant dense<0.000000e+00> : vector<64x4xf32>
    %71 = tpu.matmul %68, %70, %cst_55 {dimension_numbers = #tpu.dot_dimension_numbers<[1], [0], [0], [1], [0, 0, 1, 1], [], []>} : vector<64x4xbf16>, vector<4x4xbf16>, vector<64x4xf32> -> vector<64x4xf32>
    %72 = arith.addf %63, %71 : vector<64x4xf32>
    %c0_56 = arith.constant 0 : index
    %c2_57 = arith.constant 2 : index
    %c2_58 = arith.constant 2 : index
    %c0_59 = arith.constant 0 : index
    %73 = vector.load %arg1[%c0_56, %c2_57, %c2_58, %c0_59] : memref<1x10x10x4xbf16, #tpu.memory_space<vmem>>, vector<1x8x8x4xbf16>
    %74 = vector.shape_cast %73 : vector<1x8x8x4xbf16> to vector<8x8x4xbf16>
    %75 = arith.extf %74 : vector<8x8x4xbf16> to vector<8x8x4xf32>
    %76 = vector.shape_cast %75 : vector<8x8x4xf32> to vector<64x4xf32>
    %77 = arith.truncf %76 : vector<64x4xf32> to vector<64x4xbf16>
    %c8 = arith.constant 8 : index
    %c0_60 = arith.constant 0 : index
    %c0_61 = arith.constant 0 : index
    %78 = vector.load %arg2[%c8, %c0_60, %c0_61] : memref<9x4x4xbf16, #tpu.memory_space<vmem>>, vector<1x4x4xbf16>
    %79 = vector.shape_cast %78 : vector<1x4x4xbf16> to vector<4x4xbf16>
    %cst_62 = arith.constant dense<0.000000e+00> : vector<64x4xf32>
    %80 = tpu.matmul %77, %79, %cst_62 {dimension_numbers = #tpu.dot_dimension_numbers<[1], [0], [0], [1], [0, 0, 1, 1], [], []>} : vector<64x4xbf16>, vector<4x4xbf16>, vector<64x4xf32> -> vector<64x4xf32>
    %81 = arith.addf %72, %80 : vector<64x4xf32>
    %c0_63 = arith.constant 0 : index
    %c0_64 = arith.constant 0 : index
    %82 = vector.load %arg3[%c0_63, %c0_64] : memref<1x4xf32, #tpu.memory_space<vmem>>, vector<1x4xf32>
    %83 = vector.broadcast %82 : vector<1x4xf32> to vector<64x4xf32>
    %84 = arith.addf %81, %83 : vector<64x4xf32>
    %cst_65 = arith.constant 3.000000e+01 : f32
    %85 = vector.broadcast %cst_65 : f32 to vector<64x4xf32>
    %86 = arith.minimumf %84, %85 : vector<64x4xf32>
    %87 = math.exp %86 : vector<64x4xf32>
    %cst_66 = arith.constant 2.000000e+00 : f32
    %88 = vector.broadcast %cst_66 : f32 to vector<64x4xf32>
    %89 = arith.addf %87, %88 : vector<64x4xf32>
    %90 = arith.mulf %87, %89 : vector<64x4xf32>
    %91 = arith.mulf %84, %90 : vector<64x4xf32>
    %cst_67 = arith.constant 2.000000e+00 : f32
    %92 = vector.broadcast %cst_67 : f32 to vector<64x4xf32>
    %93 = arith.addf %90, %92 : vector<64x4xf32>
    %94 = tpu.reciprocal %93 {approx = true} : vector<64x4xf32> -> vector<64x4xf32>
    %95 = arith.mulf %91, %94 : vector<64x4xf32>
    %c0_68 = arith.constant 0 : index
    %c0_69 = arith.constant 0 : index
    %c0_70 = arith.constant 0 : index
    %c0_71 = arith.constant 0 : index
    %96 = vector.load %arg4[%c0_68, %c0_69, %c0_70, %c0_71] : memref<1x8x8x4xbf16, #tpu.memory_space<vmem>>, vector<1x8x8x4xbf16>
    %97 = arith.extf %96 : vector<1x8x8x4xbf16> to vector<1x8x8x4xf32>
    %98 = vector.shape_cast %97 : vector<1x8x8x4xf32> to vector<64x4xf32>
    %99 = arith.addf %95, %98 : vector<64x4xf32>
    %100 = vector.shape_cast %99 : vector<64x4xf32> to vector<1x8x8x4xf32>
    %101 = arith.truncf %100 : vector<1x8x8x4xf32> to vector<1x8x8x4xbf16>
    %c0_72 = arith.constant 0 : index
    %c0_73 = arith.constant 0 : index
    %c0_74 = arith.constant 0 : index
    %c0_75 = arith.constant 0 : index
    %102 = vector.load %arg5[%c0_72, %c0_73, %c0_74, %c0_75] : memref<1x8x8x4xbf16, #tpu.memory_space<vmem>>, vector<1x8x8x4xbf16>
    tpu.vector_store %arg5[%c0_72, %c0_73, %c0_74, %c0_75], %101 {strides = array<i32>} : memref<1x8x8x4xbf16, #tpu.memory_space<vmem>>, vector<1x8x8x4xbf16>,
    return
  }
  func.func @transform_0(%arg0: i32) -> (i32, i32, i32, i32) {
    %c0_i32 = arith.constant 0 : i32
    %c0_i32_0 = arith.constant 0 : i32
    %c0_i32_1 = arith.constant 0 : i32
    %c0_i32_2 = arith.constant 0 : i32
    return %arg0, %c0_i32, %c0_i32_0, %c0_i32_1 : i32, i32, i32, i32
  }
  func.func @transform_1(%arg0: i32) -> (i32, i32, i32) {
    %c0_i32 = arith.constant 0 : i32
    %c0_i32_0 = arith.constant 0 : i32
    %c0_i32_1 = arith.constant 0 : i32
    %c0_i32_2 = arith.constant 0 : i32
    return %c0_i32, %c0_i32_0, %c0_i32_1 : i32, i32, i32
  }
  func.func @transform_2(%arg0: i32) -> (i32, i32) {
    %c0_i32 = arith.constant 0 : i32
    %c0_i32_0 = arith.constant 0 : i32
    %c0_i32_1 = arith.constant 0 : i32
    return %c0_i32, %c0_i32_0 : i32, i32
  }
  func.func @transform_3(%arg0: i32) -> (i32, i32, i32, i32) {
    %c0_i32 = arith.constant 0 : i32
    %c0_i32_0 = arith.constant 0 : i32
    %c0_i32_1 = arith.constant 0 : i32
    %c0_i32_2 = arith.constant 0 : i32
    return %arg0, %c0_i32, %c0_i32_0, %c0_i32_1 : i32, i32, i32, i32
  }
  func.func @transform_4(%arg0: i32) -> (i32, i32, i32, i32) {
    %c0_i32 = arith.constant 0 : i32
    %c0_i32_0 = arith.constant 0 : i32
    %c0_i32_1 = arith.constant 0 : i32
    %c0_i32_2 = arith.constant 0 : i32
    return %arg0, %c0_i32, %c0_i32_0, %c0_i32_1 : i32, i32, i32, i32
  }
}

module attributes {stable_mosaic.version = 11 : i64} {
  func.func @_tail_mix_kernel(%arg0: i32, %arg1: memref<64x4xbf16, #tpu.memory_space<vmem>>, %arg2: memref<64x4xbf16, #tpu.memory_space<vmem>>, %arg3: memref<4x4xbf16, #tpu.memory_space<vmem>>, %arg4: memref<1x4xf32, #tpu.memory_space<vmem>>, %arg5: memref<4x8xbf16, #tpu.memory_space<vmem>>, %arg6: memref<4x8xbf16, #tpu.memory_space<vmem>>, %arg7: memref<1x8xf32, #tpu.memory_space<vmem>>, %arg8: memref<64x8xf32, #tpu.memory_space<vmem>>) attributes {dimension_semantics = [#tpu.dimension_semantics<parallel>], iteration_bounds = array<i64: 2>, scalar_prefetch = 0 : i64, scratch_operands = 0 : i64, tpu.core_type = #tpu.core_type<tc>, window_params = [{transform_indices = @transform_0, window_bounds = array<i64: 64, 4>}, {transform_indices = @transform_1, window_bounds = array<i64: 64, 4>}, {pipeline_mode = #tpu.pipeline_mode<synchronous>, transform_indices = @transform_2, window_bounds = array<i64: 4, 4>}, {pipeline_mode = #tpu.pipeline_mode<synchronous>, transform_indices = @transform_3, window_bounds = array<i64: 1, 4>}, {pipeline_mode = #tpu.pipeline_mode<synchronous>, transform_indices = @transform_4, window_bounds = array<i64: 4, 8>}, {pipeline_mode = #tpu.pipeline_mode<synchronous>, transform_indices = @transform_5, window_bounds = array<i64: 4, 8>}, {pipeline_mode = #tpu.pipeline_mode<synchronous>, transform_indices = @transform_6, window_bounds = array<i64: 1, 8>}, {transform_indices = @transform_7, window_bounds = array<i64: 64, 8>}]} {
    %c0 = arith.constant 0 : index
    %c0_0 = arith.constant 0 : index
    %0 = vector.load %arg2[%c0, %c0_0] : memref<64x4xbf16, #tpu.memory_space<vmem>>, vector<64x4xbf16>
    %c0_1 = arith.constant 0 : index
    %c0_2 = arith.constant 0 : index
    %1 = vector.load %arg3[%c0_1, %c0_2] : memref<4x4xbf16, #tpu.memory_space<vmem>>, vector<4x4xbf16>
    %cst = arith.constant dense<0.000000e+00> : vector<64x4xf32>
    %2 = tpu.matmul %0, %1, %cst {dimension_numbers = #tpu.dot_dimension_numbers<[1], [0], [0], [1], [0, 0, 1, 1], [], []>} : vector<64x4xbf16>, vector<4x4xbf16>, vector<64x4xf32> -> vector<64x4xf32>
    %c0_3 = arith.constant 0 : index
    %c0_4 = arith.constant 0 : index
    %3 = vector.load %arg4[%c0_3, %c0_4] : memref<1x4xf32, #tpu.memory_space<vmem>>, vector<1x4xf32>
    %4 = vector.broadcast %3 : vector<1x4xf32> to vector<64x4xf32>
    %5 = arith.addf %2, %4 : vector<64x4xf32>
    %cst_5 = arith.constant 3.000000e+01 : f32
    %6 = vector.broadcast %cst_5 : f32 to vector<64x4xf32>
    %7 = arith.minimumf %5, %6 : vector<64x4xf32>
    %8 = math.exp %7 : vector<64x4xf32>
    %cst_6 = arith.constant 2.000000e+00 : f32
    %9 = vector.broadcast %cst_6 : f32 to vector<64x4xf32>
    %10 = arith.addf %8, %9 : vector<64x4xf32>
    %11 = arith.mulf %8, %10 : vector<64x4xf32>
    %12 = arith.mulf %5, %11 : vector<64x4xf32>
    %cst_7 = arith.constant 2.000000e+00 : f32
    %13 = vector.broadcast %cst_7 : f32 to vector<64x4xf32>
    %14 = arith.addf %11, %13 : vector<64x4xf32>
    %15 = tpu.reciprocal %14 {approx = true} : vector<64x4xf32> -> vector<64x4xf32>
    %16 = arith.mulf %12, %15 : vector<64x4xf32>
    %17 = arith.truncf %16 : vector<64x4xf32> to vector<64x4xbf16>
    %c0_8 = arith.constant 0 : index
    %c0_9 = arith.constant 0 : index
    %18 = vector.load %arg1[%c0_8, %c0_9] : memref<64x4xbf16, #tpu.memory_space<vmem>>, vector<64x4xbf16>
    %c0_10 = arith.constant 0 : index
    %c0_11 = arith.constant 0 : index
    %19 = vector.load %arg5[%c0_10, %c0_11] : memref<4x8xbf16, #tpu.memory_space<vmem>>, vector<4x8xbf16>
    %cst_12 = arith.constant dense<0.000000e+00> : vector<64x8xf32>
    %20 = tpu.matmul %18, %19, %cst_12 {dimension_numbers = #tpu.dot_dimension_numbers<[1], [0], [0], [1], [0, 0, 1, 1], [], []>} : vector<64x4xbf16>, vector<4x8xbf16>, vector<64x8xf32> -> vector<64x8xf32>
    %c0_13 = arith.constant 0 : index
    %c0_14 = arith.constant 0 : index
    %21 = vector.load %arg6[%c0_13, %c0_14] : memref<4x8xbf16, #tpu.memory_space<vmem>>, vector<4x8xbf16>
    %cst_15 = arith.constant dense<0.000000e+00> : vector<64x8xf32>
    %22 = tpu.matmul %17, %21, %cst_15 {dimension_numbers = #tpu.dot_dimension_numbers<[1], [0], [0], [1], [0, 0, 1, 1], [], []>} : vector<64x4xbf16>, vector<4x8xbf16>, vector<64x8xf32> -> vector<64x8xf32>
    %23 = arith.addf %20, %22 : vector<64x8xf32>
    %c0_16 = arith.constant 0 : index
    %c0_17 = arith.constant 0 : index
    %24 = vector.load %arg7[%c0_16, %c0_17] : memref<1x8xf32, #tpu.memory_space<vmem>>, vector<1x8xf32>
    %25 = vector.broadcast %24 : vector<1x8xf32> to vector<64x8xf32>
    %26 = arith.addf %23, %25 : vector<64x8xf32>
    %cst_18 = arith.constant 3.000000e+01 : f32
    %27 = vector.broadcast %cst_18 : f32 to vector<64x8xf32>
    %28 = arith.minimumf %26, %27 : vector<64x8xf32>
    %29 = math.exp %28 : vector<64x8xf32>
    %cst_19 = arith.constant 2.000000e+00 : f32
    %30 = vector.broadcast %cst_19 : f32 to vector<64x8xf32>
    %31 = arith.addf %29, %30 : vector<64x8xf32>
    %32 = arith.mulf %29, %31 : vector<64x8xf32>
    %33 = arith.mulf %26, %32 : vector<64x8xf32>
    %cst_20 = arith.constant 2.000000e+00 : f32
    %34 = vector.broadcast %cst_20 : f32 to vector<64x8xf32>
    %35 = arith.addf %32, %34 : vector<64x8xf32>
    %36 = tpu.reciprocal %35 {approx = true} : vector<64x8xf32> -> vector<64x8xf32>
    %37 = arith.mulf %33, %36 : vector<64x8xf32>
    %c0_21 = arith.constant 0 : index
    %c0_22 = arith.constant 0 : index
    %38 = vector.load %arg8[%c0_21, %c0_22] : memref<64x8xf32, #tpu.memory_space<vmem>>, vector<64x8xf32>
    tpu.vector_store %arg8[%c0_21, %c0_22], %37 {strides = array<i32>} : memref<64x8xf32, #tpu.memory_space<vmem>>, vector<64x8xf32>,
    return
  }
  func.func @transform_0(%arg0: i32) -> (i32, i32) {
    %c0_i32 = arith.constant 0 : i32
    %c0_i32_0 = arith.constant 0 : i32
    return %arg0, %c0_i32 : i32, i32
  }
  func.func @transform_1(%arg0: i32) -> (i32, i32) {
    %c0_i32 = arith.constant 0 : i32
    %c0_i32_0 = arith.constant 0 : i32
    return %arg0, %c0_i32 : i32, i32
  }
  func.func @transform_2(%arg0: i32) -> (i32, i32) {
    %c0_i32 = arith.constant 0 : i32
    %c0_i32_0 = arith.constant 0 : i32
    %c0_i32_1 = arith.constant 0 : i32
    return %c0_i32, %c0_i32_0 : i32, i32
  }
  func.func @transform_3(%arg0: i32) -> (i32, i32) {
    %c0_i32 = arith.constant 0 : i32
    %c0_i32_0 = arith.constant 0 : i32
    %c0_i32_1 = arith.constant 0 : i32
    return %c0_i32, %c0_i32_0 : i32, i32
  }
  func.func @transform_4(%arg0: i32) -> (i32, i32) {
    %c0_i32 = arith.constant 0 : i32
    %c0_i32_0 = arith.constant 0 : i32
    %c0_i32_1 = arith.constant 0 : i32
    return %c0_i32, %c0_i32_0 : i32, i32
  }
  func.func @transform_5(%arg0: i32) -> (i32, i32) {
    %c0_i32 = arith.constant 0 : i32
    %c0_i32_0 = arith.constant 0 : i32
    %c0_i32_1 = arith.constant 0 : i32
    return %c0_i32, %c0_i32_0 : i32, i32
  }
  func.func @transform_6(%arg0: i32) -> (i32, i32) {
    %c0_i32 = arith.constant 0 : i32
    %c0_i32_0 = arith.constant 0 : i32
    %c0_i32_1 = arith.constant 0 : i32
    return %c0_i32, %c0_i32_0 : i32, i32
  }
  func.func @transform_7(%arg0: i32) -> (i32, i32) {
    %c0_i32 = arith.constant 0 : i32
    %c0_i32_0 = arith.constant 0 : i32
    return %arg0, %c0_i32 : i32, i32
  }
}

</mosaic_0001>

<bundles_post_ra>
// kernel: tpu_custom_call.1
= control target key start
LH: loop header
LB: loop body
LE: loop exit
PB: predicated region body
PF: predicated region fallthrough
CT: control target
= control target key end

     0   :  { %6 = vsyncpa [#allocation3], 0  ;;  %s114_s0 = inlined_call_operand.hbm [shape: f32[8,128], index: 0, kind: input, shape index: {}]   ;;  %s115_s1 = inlined_call_operand.hbm [shape: f32[8,128], index: 1, kind: output, shape index: {}]  }
   0x1   :  { %7 = vsyncpa [#allocation4], 0  ;;  %s13_s8 = sshll.u32 %s114_s0, 4  ;;  %s96_s9 = smov [#allocation2]   ;;  %s14_s8 = int_to_ptr.hbm [resolvable:$true] %s13_s8 }
   0x2   :  { %s15_s10 = sshll.u32 %s96_s9, 4  ;;  %s16_s10 = int_to_ptr.vmem [resolvable:$true] %s15_s10 }
   0x3   :  { %18 = dma.hbm_to_vmem [thread:$0]  %s14_s8, 128, %s16_s10, [#allocation3]  }
   0x4   :  { %92 = dma.done.wait [#allocation3], 128  }
   0x5   :  { %93 = vsyncadd [#allocation3], 4294967168  ;;  %s97_s11 = smov [#allocation5]   ;;  %s32_s15 = sshll.u32 %s115_s1, 4  ;;  %v23_v0 = vld [vmem:[#allocation2] sm:$0xff]  ;;  %s33_s15 = int_to_ptr.hbm [resolvable:$true] %s32_s15 }
   0x6   :  { %s30_s12 = sshll.u32 %s97_s11, 4  ;;  %24 = vst [vmem:[#allocation5] sm:$0xff] %v23_v0  ;;  %s31_s12 = int_to_ptr.vmem [resolvable:$true] %s30_s12 }
   0x7   :  { %35 = dma.vmem_to_hbm [thread:$0]  %s31_s12, 128, %s33_s15, [#allocation4]  }
   0x8   :  { %94 = dma.done.wait [#allocation4], 128  }
   0x9   :  { %95 = vsyncadd [#allocation4], 4294967168 }
   0xa   :  { %40 = vsyncpa [#allocation3], 1 }
   0xb   :  { %41 = vsyncpa [#allocation4], 1 }

// kernel: csp_res_block.9
= control target key start
LH: loop header
LB: loop body
LE: loop exit
PB: predicated region body
PF: predicated region fallthrough
CT: control target
= control target key end

     0   :  { %s506_s12 = smov 0   ;;  %s578_s0 = inlined_call_operand.vmem [shape: bf16[128,4], index: 0, kind: input, shape index: {}]   ;;  %s579_s1 = inlined_call_operand.vmem [shape: bf16[4,4], index: 1, kind: input, shape index: {}]   ;;  %s580_s2 = inlined_call_operand.vmem [shape: f32[1,4], index: 2, kind: input, shape index: {}]   ;;  %s581_s3 = inlined_call_operand.vmem [shape: bf16[128,4], index: 3, kind: output, shape index: {}]  }
   0x1 LB: > { %s399_s13 = sadd.s32 4294967295, %s484_s12   ;;  %p403_p0 = scmp.ge.s32.totalorder %s484_s12, 1  ;;  %s484_s12 = sphi %s506_s12, %s13_s12  }
   0x2   : > { %p138_p1 = scmp.lt.s32.totalorder %s484_s12, 3 }
   0x4   : > { %p139_p2 = pnand %p403_p0, %p138_p1 }
   0x5   : > { %s404_s16 = sshll.u32 (!%p139_p2), %s399_s13, 3 }
   0x6   : > { %142 = sbr.rel (%p139_p2) target bundleno = 189 (0xbd), region = 32  ;;  %p163_p3 = scmp.lt.s32.totalorder (!%p139_p2), %s404_s16, 15 }
   0xb   : > { %v183_v0 = vld [vmem:[%s579_s1] sm:$0x3]  ;;  %vm221_vm0 = vcmask 1041408   ;;  %s583_s16 = smov (!%p163_p3, %s404_s16), 15  ;;  %vm208_vm1 = vcmask 31744   ;;  %vm334_vm2 = vcmask 27648  }
   0xc   : > { %v223_v1 = vsel %vm221_vm0, %v183_v0, 0  ;;  %s405_s17 = sshll.u32 %s583_s16, 2  ;;  %v445_v6 = vld [vmem:[%s580_s2] ss:$0 sm:$0xff] }
   0xd   : > { %232 = vmatpush.bf16.msra.mxu0 %v223_v1  ;;  %434 = vmatpush.bf16.msra.mxu1 %v223_v1  ;;  %s166_s20 = scalar_lea.vmem %s578_s0, %s405_s17  ;;  %s551_s25 = scalar_lea.vmem %s581_s3, %s405_s17 }
   0xe   : > { %435 = vmatpush.bf16.msra.mxu2 %v223_v1  ;;  %436 = vmatpush.bf16.msra.mxu3 %v223_v1  ;;  %v430_v2 = vld [vmem:[%s166_s20] sm:$0xff]  ;;  %v431_v3 = vld [vmem:[%s166_s20 + $0x8] sm:$0xff]  ;;  %v432_v4 = vld [vmem:[%s166_s20 + $0x10] sm:$0xff] }
   0xf   : > { %v433_v5 = vld [vmem:[%s166_s20 + $0x18] sm:$0xff] }
  0x10   : > { %424 = vmatmul.msk.bf16.vlgmr.msra.gmra.mxu0 %vm208_vm1, %v430_v2  ;;  %425 = vmatmul.msk.bf16.vlgmr.msra.gmra.mxu1 %vm208_vm1, %v431_v3 }
  0x11   : > { %426 = vmatmul.msk.bf16.vlgmr.msra.gmra.mxu2 %vm208_vm1, %v432_v4  ;;  %427 = vmatmul.msk.bf16.vlgmr.msra.gmra.mxu3 %vm208_vm1, %v433_v5 }
  0x8d   : > { %v234_v7 = vpop.f32.mrf.mxu0  ;;  %v239_v8 = vpop.f32.mrf.mxu1 }
  0x8e   : > { %v235_v9 = vadd.f32 %v445_v6, %v234_v7  ;;  %v240_v10 = vadd.f32 %v445_v6, %v239_v8 }
  0x90   : > { %v254_v11 = vmin.f32 %v235_v9, 30.0  ;;  %v256_v12 = vmin.f32 %v240_v10, 30.0 }
  0x92   : > { %v262_v13 = vmul.f32 1.442695, %v254_v11  ;;  %v266_v14 = vmul.f32 1.442695, %v256_v12 }
  0x94   : > { %446 = vpow2.f32 %v262_v13  ;;  %v244_v15 = vpop.f32.mrf.mxu2  ;;  %v249_v16 = vpop.f32.mrf.mxu3 }
  0x95   : > { %448 = vpow2.f32 %v266_v14  ;;  %v528_v17 = vadd.f32 %v445_v6, %v244_v15  ;;  %v530_v18 = vadd.f32 %v445_v6, %v249_v16  ;;  %v236_v19 = vpop.f32.mrf.mxu0  ;;  %v241_v20 = vpop.f32.mrf.mxu1 }
  0x96   : > { %v532_v21 = vadd.f32 %v445_v6, %v236_v19  ;;  %v534_v22 = vadd.f32 %v445_v6, %v241_v20 }
  0x97   : > { %v258_v23 = vmin.f32 %v528_v17, 30.0  ;;  %v260_v24 = vmin.f32 %v530_v18, 30.0 }
  0x98   : > { %v255_v25 = vmin.f32 %v532_v21, 30.0  ;;  %v257_v26 = vmin.f32 %v534_v22, 30.0 }
  0x99   : > { %v270_v27 = vmul.f32 1.442695, %v258_v23  ;;  %v274_v28 = vmul.f32 1.442695, %v260_v24 }
  0x9a   : > { %v447_v29 = vpop.eup %446  ;;  %v264_v30 = vmul.f32 1.442695, %v255_v25  ;;  %v268_v31 = vmul.f32 1.442695, %v257_v26 }
  0x9b   : > { %v449_v32 = vpop.eup %448  ;;  %v278_v33 = vadd.f32 2.0, %v447_v29  ;;  %450 = vpow2.f32 %v270_v27 }
  0x9c   : > { %v280_v34 = vadd.f32 2.0, %v449_v32  ;;  %452 = vpow2.f32 %v274_v28  ;;  %v246_v35 = vpop.f32.mrf.mxu2  ;;  %v251_v36 = vpop.f32.mrf.mxu3 }
  0x9d   : > { %v286_v37 = vmul.f32 %v447_v29, %v278_v33  ;;  %454 = vpow2.f32 %v264_v30  ;;  %v540_v38 = vadd.f32 %v445_v6, %v246_v35  ;;  %v542_v39 = vadd.f32 %v445_v6, %v251_v36 }
  0x9e   : > { %v288_v40 = vmul.f32 %v449_v32, %v280_v34  ;;  %456 = vpow2.f32 %v268_v31 }
  0x9f   : > { %v302_v41 = vadd.f32 2.0, %v286_v37  ;;  %v259_v42 = vmin.f32 %v540_v38, 30.0  ;;  %v261_v43 = vmin.f32 %v542_v39, 30.0  ;;  %v294_v57 = vmul.f32 %v286_v37, %v235_v9 }
  0xa0   : > { %v304_v44 = vadd.f32 2.0, %v288_v40  ;;  %v296_v61 = vmul.f32 %v288_v40, %v240_v10 }
  0xa1   : > { %v451_v45 = vpop.eup %450  ;;  %458 = vrcp.f32 %v302_v41  ;;  %v272_v46 = vmul.f32 1.442695, %v259_v42  ;;  %v276_v47 = vmul.f32 1.442695, %v261_v43 }
  0xa2   : > { %v453_v48 = vpop.eup %452  ;;  %460 = vrcp.f32 %v304_v44  ;;  %v282_v49 = vadd.f32 2.0, %v451_v45 }
  0xa3   : > { %v455_v50 = vpop.eup %454  ;;  %v284_v51 = vadd.f32 2.0, %v453_v48  ;;  %462 = vpow2.f32 %v272_v46 }
  0xa4   : > { %v457_v52 = vpop.eup %456  ;;  %v290_v53 = vmul.f32 %v451_v45, %v282_v49  ;;  %v279_v54 = vadd.f32 2.0, %v455_v50  ;;  %464 = vpow2.f32 %v276_v47 }
  0xa5   : > { %v292_v55 = vmul.f32 %v453_v48, %v284_v51  ;;  %v281_v56 = vadd.f32 2.0, %v457_v52 }
  0xa6   : > { %v306_v58 = vadd.f32 2.0, %v290_v53  ;;  %v287_v59 = vmul.f32 %v455_v50, %v279_v54  ;;  %v298_v12 = vmul.f32 %v290_v53, %v528_v17 }
  0xa7   : > { %v459_v60 = vpop.eup %458  ;;  %v308_v62 = vadd.f32 2.0, %v292_v55  ;;  %v289_v63 = vmul.f32 %v457_v52, %v281_v56  ;;  %v300_v15 = vmul.f32 %v292_v55, %v530_v18 }
  0xa8   : > { %v461_v0 = vpop.eup %460  ;;  %v318_v1 = vmul.f32 %v459_v60, %v294_v57  ;;  %466 = vrcp.f32 %v306_v58  ;;  %v303_v2 = vadd.f32 2.0, %v287_v59  ;;  %v295_v23 = vmul.f32 %v287_v59, %v532_v21 }
  0xa9   : > { %v463_v3 = vpop.eup %462  ;;  %v320_v4 = vmul.f32 %v461_v0, %v296_v61  ;;  %468 = vrcp.f32 %v308_v62  ;;  %v305_v5 = vadd.f32 2.0, %v289_v63  ;;  %v297_v27 = vmul.f32 %v289_v63, %v534_v22 }
  0xaa   : > { %v465_v6 = vpop.eup %464  ;;  %v326_v7 = vpack.c.bf16 %v318_v1, %v318_v1  ;;  %470 = vrcp.f32 %v303_v2  ;;  %v283_v8 = vadd.f32 2.0, %v463_v3 }
  0xab   : > { %v328_v9 = vpack.c.bf16 %v320_v4, %v320_v4  ;;  %472 = vrcp.f32 %v305_v5  ;;  %v285_v10 = vadd.f32 2.0, %v465_v6 }
  0xac   : > { %335 = vst.msk [vmem:[%s551_s25] sm:$0xf] %vm334_vm2, %v326_v7  ;;  %v291_v11 = vmul.f32 %v463_v3, %v283_v8 }
  0xad   : > { %337 = vst.msk [vmem:[%s551_s25 + $0x8] sm:$0xf] %vm334_vm2, %v328_v9  ;;  %v293_v13 = vmul.f32 %v465_v6, %v285_v10 }
  0xae   : > { %v467_v14 = vpop.eup %466  ;;  %v307_v16 = vadd.f32 2.0, %v291_v11  ;;  %v299_v32 = vmul.f32 %v291_v11, %v540_v38 }
  0xaf   : > { %v469_v19 = vpop.eup %468  ;;  %v322_v20 = vmul.f32 %v467_v14, %v298_v12  ;;  %v309_v24 = vadd.f32 2.0, %v293_v13  ;;  %v301_v33 = vmul.f32 %v293_v13, %v542_v39 }
  0xb0   : > { %v471_v25 = vpop.eup %470  ;;  %v324_v26 = vmul.f32 %v469_v19, %v300_v15  ;;  %474 = vrcp.f32 %v307_v16 }
  0xb1   : > { %v473_v17 = vpop.eup %472  ;;  %v330_v28 = vpack.c.bf16 %v322_v20, %v322_v20  ;;  %v319_v29 = vmul.f32 %v471_v25, %v295_v23  ;;  %476 = vrcp.f32 %v309_v24 }
  0xb2   : > { %v332_v18 = vpack.c.bf16 %v324_v26, %v324_v26  ;;  %v321_v30 = vmul.f32 %v473_v17, %v297_v27 }
  0xb3   : > { %339 = vst.msk [vmem:[%s551_s25 + $0x10] sm:$0xf] %vm334_vm2, %v330_v28  ;;  %v327_v31 = vpack.c.bf16 %v319_v29, %v319_v29 }
  0xb4   : > { %341 = vst.msk [vmem:[%s551_s25 + $0x18] sm:$0xf] %vm334_vm2, %v332_v18  ;;  %v329_v21 = vpack.c.bf16 %v321_v30, %v321_v30 }
  0xb5   : > { %336 = vst.msk [vmem:[%s551_s25 + $0x4] sm:$0xf] %vm334_vm2, %v327_v31 }
  0xb6   : > { %v475_v22 = vpop.eup %474  ;;  %338 = vst.msk [vmem:[%s551_s25 + $0xc] sm:$0xf] %vm334_vm2, %v329_v21 }
  0xb7   : > { %v477_v34 = vpop.eup %476  ;;  %v323_v35 = vmul.f32 %v475_v22, %v299_v32 }
  0xb8   : > { %v325_v36 = vmul.f32 %v477_v34, %v301_v33 }
  0xb9   : > { %v331_v37 = vpack.c.bf16 %v323_v35, %v323_v35 }
  0xba   : > { %v333_v40 = vpack.c.bf16 %v325_v36, %v325_v36 }
  0xbb   : > { %340 = vst.msk [vmem:[%s551_s25 + $0x14] sm:$0xf] %vm334_vm2, %v331_v37 }
  0xbc   : > { %342 = vst.msk [vmem:[%s551_s25 + $0x1c] sm:$0xf] %vm334_vm2, %v333_v40 }
  0xbd PF: > { %s13_s12 = sadd.s32 1, %s484_s12  }
  0xbe   : > { %p10_p4 = scmp.ge.s32.totalorder %s13_s12, 4  }
  0xc0   :  { %12 = sbr.rel (!%p10_p4) target bundleno = 1 (0x1), region = 62 }

// kernel: csp_res_block.7
= control target key start
LH: loop header
LB: loop body
LE: loop exit
PB: predicated region body
PF: predicated region fallthrough
CT: control target
= control target key end

     0   :  { %s541_s12 = smov 0   ;;  %s619_s0 = inlined_call_operand.vmem [shape: bf16[128,36], index: 0, kind: input, shape index: {}]   ;;  %s620_s1 = inlined_call_operand.vmem [shape: bf16[36,8], index: 1, kind: input, shape index: {}]   ;;  %s621_s2 = inlined_call_operand.vmem [shape: f32[1,8], index: 2, kind: input, shape index: {}]   ;;  %s622_s3 = inlined_call_operand.vmem [shape: bf16[128,8], index: 3, kind: output, shape index: {}]  }
   0x1 LB: > { %s418_s13 = sadd.s32 4294967295, %s519_s12   ;;  %p422_p0 = scmp.ge.s32.totalorder %s519_s12, 1  ;;  %s519_s12 = sphi %s541_s12, %s13_s12  }
   0x2   : > { %p138_p1 = scmp.lt.s32.totalorder %s519_s12, 3 }
   0x4   : > { %p139_p2 = pnand %p422_p0, %p138_p1 }
   0x5   : > { %s423_s16 = sshll.u32 (!%p139_p2), %s418_s13, 3 }
   0x6   : > { %142 = sbr.rel (%p139_p2) target bundleno = 201 (0xc9), region = 32  ;;  %p163_p3 = scmp.lt.s32.totalorder (!%p139_p2), %s423_s16, 15 }
   0xb   : > { %v187_v0 = vld [vmem:[%s620_s1 + $0x10] sm:$0x3]  ;;  %vm240_vm0 = vcmask 1041408   ;;  %s624_s16 = smov (!%p163_p3, %s423_s16), 15  ;;  %v462_v4 = vld [vmem:[%s620_s1 + $0x8] sm:$0xff]  ;;  %v461_v5 = vld [vmem:[%s620_s1] sm:$0xff] }
   0xc   : > { %v221_v1 = vunpack.c.l.b16 %v187_v0  ;;  %s424_s19 = sshll.u32 %s624_s16, 2  ;;  %vm227_vm1 = vcmask 293888   ;;  %v480_v10 = vld [vmem:[%s621_s2] ss:$0 sm:$0xff]  ;;  %vm353_vm2 = vcmask 60416  }
   0xd   : > { %s166_s24 = scalar_lea.vmem %s619_s0, %s424_s19  ;;  %s592_s29 = scalar_lea.vmem %s622_s3, %s424_s19 }
   0xe   : > { %v224_v2 = vpack.c.b16 %v221_v1, %v221_v1  ;;  %v457_v6 = vld [vmem:[%s166_s24] sm:$0xff]  ;;  %v458_v7 = vld [vmem:[%s166_s24 + $0x8] sm:$0xff]  ;;  %v459_v8 = vld [vmem:[%s166_s24 + $0x10] sm:$0xff] }
   0xf   : > { %v460_v9 = vld [vmem:[%s166_s24 + $0x18] sm:$0xff] }
  0x10   : > { %v242_v3 = vsel %vm240_vm0, %v224_v2, 0 }
  0x11   : > { %249 = vmatpush.bf16.msra.mxu0 %v242_v3  ;;  %463 = vmatpush.bf16.msra.mxu1 %v242_v3 }
  0x12   : > { %464 = vmatpush.bf16.msra.mxu2 %v242_v3  ;;  %465 = vmatpush.bf16.msra.mxu3 %v242_v3 }
  0x15   : > { %250 = vmatpush.bf16.msra.mxu0 %v462_v4  ;;  %466 = vmatpush.bf16.msra.mxu1 %v462_v4 }
  0x16   : > { %467 = vmatpush.bf16.msra.mxu2 %v462_v4  ;;  %468 = vmatpush.bf16.msra.mxu3 %v462_v4 }
  0x19   : > { %251 = vmatpush.bf16.msra.mxu0 %v461_v5  ;;  %469 = vmatpush.bf16.msra.mxu1 %v461_v5 }
  0x1a   : > { %470 = vmatpush.bf16.msra.mxu2 %v461_v5  ;;  %471 = vmatpush.bf16.msra.mxu3 %v461_v5 }
  0x1c   : > { %451 = vmatmul.msk.bf16.vlgmr.msra.gmra.mxu0 %vm227_vm1, %v457_v6  ;;  %452 = vmatmul.msk.bf16.vlgmr.msra.gmra.mxu1 %vm227_vm1, %v458_v7 }
  0x1d   : > { %453 = vmatmul.msk.bf16.vlgmr.msra.gmra.mxu2 %vm227_vm1, %v459_v8  ;;  %454 = vmatmul.msk.bf16.vlgmr.msra.gmra.mxu3 %vm227_vm1, %v460_v9 }
  0x99   : > { %v253_v11 = vpop.f32.mrf.mxu0  ;;  %v258_v12 = vpop.f32.mrf.mxu1 }
  0x9a   : > { %v254_v13 = vadd.f32 %v480_v10, %v253_v11  ;;  %v259_v14 = vadd.f32 %v480_v10, %v258_v12 }
  0x9c   : > { %v273_v15 = vmin.f32 %v254_v13, 30.0  ;;  %v275_v16 = vmin.f32 %v259_v14, 30.0 }
  0x9e   : > { %v281_v17 = vmul.f32 1.442695, %v273_v15  ;;  %v285_v18 = vmul.f32 1.442695, %v275_v16 }
  0xa0   : > { %481 = vpow2.f32 %v281_v17  ;;  %v263_v19 = vpop.f32.mrf.mxu2  ;;  %v268_v20 = vpop.f32.mrf.mxu3 }
  0xa1   : > { %483 = vpow2.f32 %v285_v18  ;;  %v569_v21 = vadd.f32 %v480_v10, %v263_v19  ;;  %v571_v22 = vadd.f32 %v480_v10, %v268_v20  ;;  %v255_v23 = vpop.f32.mrf.mxu0  ;;  %v260_v24 = vpop.f32.mrf.mxu1 }
  0xa2   : > { %v573_v25 = vadd.f32 %v480_v10, %v255_v23  ;;  %v575_v26 = vadd.f32 %v480_v10, %v260_v24 }
  0xa3   : > { %v277_v27 = vmin.f32 %v569_v21, 30.0  ;;  %v279_v28 = vmin.f32 %v571_v22, 30.0 }
  0xa4   : > { %v274_v29 = vmin.f32 %v573_v25, 30.0  ;;  %v276_v30 = vmin.f32 %v575_v26, 30.0 }
  0xa5   : > { %v289_v31 = vmul.f32 1.442695, %v277_v27  ;;  %v293_v32 = vmul.f32 1.442695, %v279_v28 }
  0xa6   : > { %v482_v33 = vpop.eup %481  ;;  %v283_v34 = vmul.f32 1.442695, %v274_v29  ;;  %v287_v35 = vmul.f32 1.442695, %v276_v30 }
  0xa7   : > { %v484_v36 = vpop.eup %483  ;;  %v297_v37 = vadd.f32 2.0, %v482_v33  ;;  %485 = vpow2.f32 %v289_v31 }
  0xa8   : > { %v299_v38 = vadd.f32 2.0, %v484_v36  ;;  %487 = vpow2.f32 %v293_v32  ;;  %v265_v39 = vpop.f32.mrf.mxu2  ;;  %v270_v40 = vpop.f32.mrf.mxu3 }
  0xa9   : > { %v305_v41 = vmul.f32 %v482_v33, %v297_v37  ;;  %489 = vpow2.f32 %v283_v34  ;;  %v581_v42 = vadd.f32 %v480_v10, %v265_v39  ;;  %v583_v43 = vadd.f32 %v480_v10, %v270_v40 }
  0xaa   : > { %v307_v44 = vmul.f32 %v484_v36, %v299_v38  ;;  %491 = vpow2.f32 %v287_v35 }
  0xab   : > { %v321_v45 = vadd.f32 2.0, %v305_v41  ;;  %v278_v46 = vmin.f32 %v581_v42, 30.0  ;;  %v280_v47 = vmin.f32 %v583_v43, 30.0  ;;  %v313_v61 = vmul.f32 %v305_v41, %v254_v13 }
  0xac   : > { %v323_v48 = vadd.f32 2.0, %v307_v44  ;;  %v315_v1 = vmul.f32 %v307_v44, %v259_v14 }
  0xad   : > { %v486_v49 = vpop.eup %485  ;;  %493 = vrcp.f32 %v321_v45  ;;  %v291_v50 = vmul.f32 1.442695, %v278_v46  ;;  %v295_v51 = vmul.f32 1.442695, %v280_v47 }
  0xae   : > { %v488_v52 = vpop.eup %487  ;;  %495 = vrcp.f32 %v323_v48  ;;  %v301_v53 = vadd.f32 2.0, %v486_v49 }
  0xaf   : > { %v490_v54 = vpop.eup %489  ;;  %v303_v55 = vadd.f32 2.0, %v488_v52  ;;  %497 = vpow2.f32 %v291_v50 }
  0xb0   : > { %v492_v56 = vpop.eup %491  ;;  %v309_v57 = vmul.f32 %v486_v49, %v301_v53  ;;  %v298_v58 = vadd.f32 2.0, %v490_v54  ;;  %499 = vpow2.f32 %v295_v51 }
  0xb1   : > { %v311_v59 = vmul.f32 %v488_v52, %v303_v55  ;;  %v300_v60 = vadd.f32 2.0, %v492_v56 }
  0xb2   : > { %v325_v62 = vadd.f32 2.0, %v309_v57  ;;  %v306_v63 = vmul.f32 %v490_v54, %v298_v58  ;;  %v317_v16 = vmul.f32 %v309_v57, %v569_v21 }
  0xb3   : > { %v494_v0 = vpop.eup %493  ;;  %v327_v2 = vadd.f32 2.0, %v311_v59  ;;  %v308_v3 = vmul.f32 %v492_v56, %v300_v60  ;;  %v319_v19 = vmul.f32 %v311_v59, %v571_v22 }
  0xb4   : > { %v496_v4 = vpop.eup %495  ;;  %v337_v5 = vmul.f32 %v494_v0, %v313_v61  ;;  %501 = vrcp.f32 %v325_v62  ;;  %v322_v6 = vadd.f32 2.0, %v306_v63  ;;  %v314_v27 = vmul.f32 %v306_v63, %v573_v25 }
  0xb5   : > { %v498_v7 = vpop.eup %497  ;;  %v339_v8 = vmul.f32 %v496_v4, %v315_v1  ;;  %503 = vrcp.f32 %v327_v2  ;;  %v324_v9 = vadd.f32 2.0, %v308_v3  ;;  %v316_v31 = vmul.f32 %v308_v3, %v575_v26 }
  0xb6   : > { %v500_v10 = vpop.eup %499  ;;  %v345_v11 = vpack.c.bf16 %v337_v5, %v337_v5  ;;  %505 = vrcp.f32 %v322_v6  ;;  %v302_v12 = vadd.f32 2.0, %v498_v7 }
  0xb7   : > { %v347_v13 = vpack.c.bf16 %v339_v8, %v339_v8  ;;  %507 = vrcp.f32 %v324_v9  ;;  %v304_v14 = vadd.f32 2.0, %v500_v10 }
  0xb8   : > { %354 = vst.msk [vmem:[%s592_s29] sm:$0xf] %vm353_vm2, %v345_v11  ;;  %v310_v15 = vmul.f32 %v498_v7, %v302_v12 }
  0xb9   : > { %356 = vst.msk [vmem:[%s592_s29 + $0x8] sm:$0xf] %vm353_vm2, %v347_v13  ;;  %v312_v17 = vmul.f32 %v500_v10, %v304_v14 }
  0xba   : > { %v502_v18 = vpop.eup %501  ;;  %v326_v20 = vadd.f32 2.0, %v310_v15  ;;  %v318_v36 = vmul.f32 %v310_v15, %v581_v42 }
  0xbb   : > { %v504_v23 = vpop.eup %503  ;;  %v341_v24 = vmul.f32 %v502_v18, %v317_v16  ;;  %v328_v28 = vadd.f32 2.0, %v312_v17  ;;  %v320_v37 = vmul.f32 %v312_v17, %v583_v43 }
  0xbc   : > { %v506_v29 = vpop.eup %505  ;;  %v343_v30 = vmul.f32 %v504_v23, %v319_v19  ;;  %509 = vrcp.f32 %v326_v20 }
  0xbd   : > { %v508_v21 = vpop.eup %507  ;;  %v349_v32 = vpack.c.bf16 %v341_v24, %v341_v24  ;;  %v338_v33 = vmul.f32 %v506_v29, %v314_v27  ;;  %511 = vrcp.f32 %v328_v28 }
  0xbe   : > { %v351_v22 = vpack.c.bf16 %v343_v30, %v343_v30  ;;  %v340_v34 = vmul.f32 %v508_v21, %v316_v31 }
  0xbf   : > { %358 = vst.msk [vmem:[%s592_s29 + $0x10] sm:$0xf] %vm353_vm2, %v349_v32  ;;  %v346_v35 = vpack.c.bf16 %v338_v33, %v338_v33 }
  0xc0   : > { %360 = vst.msk [vmem:[%s592_s29 + $0x18] sm:$0xf] %vm353_vm2, %v351_v22  ;;  %v348_v25 = vpack.c.bf16 %v340_v34, %v340_v34 }
  0xc1   : > { %355 = vst.msk [vmem:[%s592_s29 + $0x4] sm:$0xf] %vm353_vm2, %v346_v35 }
  0xc2   : > { %v510_v26 = vpop.eup %509  ;;  %357 = vst.msk [vmem:[%s592_s29 + $0xc] sm:$0xf] %vm353_vm2, %v348_v25 }
  0xc3   : > { %v512_v38 = vpop.eup %511  ;;  %v342_v39 = vmul.f32 %v510_v26, %v318_v36 }
  0xc4   : > { %v344_v40 = vmul.f32 %v512_v38, %v320_v37 }
  0xc5   : > { %v350_v41 = vpack.c.bf16 %v342_v39, %v342_v39 }
  0xc6   : > { %v352_v44 = vpack.c.bf16 %v344_v40, %v344_v40 }
  0xc7   : > { %359 = vst.msk [vmem:[%s592_s29 + $0x14] sm:$0xf] %vm353_vm2, %v350_v41 }
  0xc8   : > { %361 = vst.msk [vmem:[%s592_s29 + $0x1c] sm:$0xf] %vm353_vm2, %v352_v44 }
  0xc9 PF: > { %s13_s12 = sadd.s32 1, %s519_s12  }
  0xca   : > { %p10_p4 = scmp.ge.s32.totalorder %s13_s12, 4  }
  0xcc   :  { %12 = sbr.rel (!%p10_p4) target bundleno = 1 (0x1), region = 62 }

// kernel: csp_res_block.8
= control target key start
LH: loop header
LB: loop body
LE: loop exit
PB: predicated region body
PF: predicated region fallthrough
CT: control target
= control target key end

     0   :  { %s813_s21 = smov 0   ;;  %s970_s0 = inlined_call_operand.vmem [shape: bf16[128,8], index: 0, kind: input, shape index: {}]   ;;  %s971_s1 = inlined_call_operand.vmem [shape: bf16[8,4], index: 1, kind: input, shape index: {}]   ;;  %s972_s2 = inlined_call_operand.vmem [shape: f32[1,4], index: 2, kind: input, shape index: {}]   ;;  %s973_s3 = inlined_call_operand.vmem [shape: bf16[8,4], index: 3, kind: input, shape index: {}]   ;;  %s974_s4 = inlined_call_operand.vmem [shape: f32[1,4], index: 4, kind: input, shape index: {}]   ;;  %s975_s5 = inlined_call_operand.vmem [shape: bf16[128,4], index: 5, kind: output, shape index: {0}]   ;;  %s976_s6 = inlined_call_operand.vmem [shape: bf16[128,4], index: 6, kind: output, shape index: {1}]  }
   0x1 LB: > { %s653_s22 = sadd.s32 4294967295, %s776_s21   ;;  %p657_p0 = scmp.ge.s32.totalorder %s776_s21, 1  ;;  %s776_s21 = sphi %s813_s21, %s17_s21  }
   0x2   : > { %p216_p1 = scmp.lt.s32.totalorder %s776_s21, 3 }
   0x4   : > { %p217_p2 = pnand %p657_p0, %p216_p1 }
   0x5   : > { %s658_s27 = sshll.u32 (!%p217_p2), %s653_s22, 3 }
   0x6   : > { %220 = sbr.rel (%p217_p2) target bundleno = 211 (0xd3), region = 40  ;;  %p252_p3 = scmp.lt.s32.totalorder (!%p217_p2), %s658_s27, 15 }
   0xb   : > { %v278_v0 = vld [vmem:[%s971_s1] sm:$0xf]  ;;  %vm316_vm0 = vcmask 1043456   ;;  %s978_s27 = smov (!%p252_p3, %s658_s27), 15  ;;  %vm303_vm1 = vcmask 64512   ;;  %vm429_vm2 = vcmask 27648  }
   0xc   : > { %v438_v1 = vld [vmem:[%s973_s3] sm:$0xf]  ;;  %v318_v2 = vsel %vm316_vm0, %v278_v0, 0  ;;  %s827_s28 = sshll.u32 %s978_s27, 2 }
   0xd   : > { %v444_v3 = vsel %vm316_vm0, %v438_v1, 0  ;;  %327 = vmatpush.bf16.msra.mxu0 %v318_v2  ;;  %694 = vmatpush.bf16.msra.mxu2 %v318_v2  ;;  %s255_s7 = scalar_lea.vmem %s970_s0, %s827_s28  ;;  %v836_v8 = vld [vmem:[%s972_s2] ss:$0 sm:$0xff]  ;;  %s894_s14 = scalar_lea.vmem %s975_s5, %s827_s28 }
   0xe   : > { %453 = vmatpush.bf16.msra.mxu1 %v444_v3  ;;  %695 = vmatpush.bf16.msra.mxu3 %v444_v3  ;;  %v690_v4 = vld [vmem:[%s255_s7] sm:$0xff]  ;;  %v692_v5 = vld [vmem:[%s255_s7 + $0x10] sm:$0xff]  ;;  %v691_v6 = vld [vmem:[%s255_s7 + $0x8] sm:$0xff]  ;;  %s903_s17 = scalar_lea.vmem %s976_s6, %s827_s28 }
   0xf   : > { %v693_v7 = vld [vmem:[%s255_s7 + $0x18] sm:$0xff]  ;;  %v841_v9 = vld [vmem:[%s974_s4] ss:$0 sm:$0xff] }
  0x10   : > { %680 = vmatmul.msk.bf16.vlgmr.msra.gmra.mxu0 %vm303_vm1, %v690_v4  ;;  %682 = vmatmul.msk.bf16.vlgmr.msra.gmra.mxu2 %vm303_vm1, %v692_v5 }
  0x11   : > { %684 = vmatmul.msk.bf16.vlgmr.msra.gmra.mxu1 %vm303_vm1, %v690_v4  ;;  %686 = vmatmul.msk.bf16.vlgmr.msra.gmra.mxu3 %vm303_vm1, %v692_v5 }
  0x20   : > { %681 = vmatmul.msk.bf16.gmra.mxu0 %vm303_vm1, %v691_v6  ;;  %683 = vmatmul.msk.bf16.gmra.mxu2 %vm303_vm1, %v693_v7 }
  0x21   : > { %685 = vmatmul.msk.bf16.gmra.mxu1 %vm303_vm1, %v691_v6  ;;  %687 = vmatmul.msk.bf16.gmra.mxu3 %vm303_vm1, %v693_v7 }
  0x8d   : > { %v329_v10 = vpop.f32.mrf.mxu0 }
  0x8e   : > { %v844_v11 = vadd.f32 %v836_v8, %v329_v10  ;;  %v455_v12 = vpop.f32.mrf.mxu1 }
  0x8f   : > { %v847_v13 = vadd.f32 %v841_v9, %v455_v12 }
  0x90   : > { %v349_v14 = vmin.f32 %v844_v11, 30.0 }
  0x91   : > { %v475_v15 = vmin.f32 %v847_v13, 30.0 }
  0x92   : > { %v357_v16 = vmul.f32 1.442695, %v349_v14 }
  0x93   : > { %v483_v17 = vmul.f32 1.442695, %v475_v15  ;;  %v339_v18 = vpop.f32.mrf.mxu2 }
  0x94   : > { %706 = vpow2.f32 %v357_v16  ;;  %v852_v19 = vadd.f32 %v836_v8, %v339_v18  ;;  %v465_v20 = vpop.f32.mrf.mxu3 }
  0x95   : > { %708 = vpow2.f32 %v483_v17  ;;  %v855_v21 = vadd.f32 %v841_v9, %v465_v20  ;;  %v331_v22 = vpop.f32.mrf.mxu0 }
  0x96   : > { %v353_v23 = vmin.f32 %v852_v19, 30.0  ;;  %v859_v24 = vadd.f32 %v836_v8, %v331_v22  ;;  %v457_v25 = vpop.f32.mrf.mxu1 }
  0x97   : > { %v479_v26 = vmin.f32 %v855_v21, 30.0  ;;  %v863_v27 = vadd.f32 %v841_v9, %v457_v25 }
  0x98   : > { %v365_v28 = vmul.f32 1.442695, %v353_v23  ;;  %v350_v29 = vmin.f32 %v859_v24, 30.0 }
  0x99   : > { %v491_v30 = vmul.f32 1.442695, %v479_v26  ;;  %v476_v31 = vmin.f32 %v863_v27, 30.0 }
  0x9a   : > { %v707_v32 = vpop.eup %706  ;;  %710 = vpow2.f32 %v365_v28  ;;  %v359_v33 = vmul.f32 1.442695, %v350_v29 }
  0x9b   : > { %v709_v34 = vpop.eup %708  ;;  %v373_v35 = vadd.f32 2.0, %v707_v32  ;;  %712 = vpow2.f32 %v491_v30  ;;  %v485_v36 = vmul.f32 1.442695, %v476_v31  ;;  %v341_v37 = vpop.f32.mrf.mxu2 }
  0x9c   : > { %v499_v38 = vadd.f32 2.0, %v709_v34  ;;  %714 = vpow2.f32 %v359_v33  ;;  %v868_v39 = vadd.f32 %v836_v8, %v341_v37  ;;  %v467_v40 = vpop.f32.mrf.mxu3 }
  0x9d   : > { %v381_v41 = vmul.f32 %v707_v32, %v373_v35  ;;  %716 = vpow2.f32 %v485_v36  ;;  %v871_v42 = vadd.f32 %v841_v9, %v467_v40  ;;  %v334_v43 = vpop.f32.mrf.mxu0 }
  0x9e   : > { %v507_v44 = vmul.f32 %v709_v34, %v499_v38  ;;  %v354_v45 = vmin.f32 %v868_v39, 30.0  ;;  %v875_v46 = vadd.f32 %v836_v8, %v334_v43  ;;  %v460_v47 = vpop.f32.mrf.mxu1 }
  0x9f   : > { %v397_v48 = vadd.f32 2.0, %v381_v41  ;;  %v480_v49 = vmin.f32 %v871_v42, 30.0  ;;  %v879_v50 = vadd.f32 %v841_v9, %v460_v47  ;;  %v389_v10 = vmul.f32 %v381_v41, %v844_v11 }
  0xa0   : > { %v711_v51 = vpop.eup %710  ;;  %v523_v52 = vadd.f32 2.0, %v507_v44  ;;  %v367_v53 = vmul.f32 1.442695, %v354_v45  ;;  %v351_v54 = vmin.f32 %v875_v46, 30.0  ;;  %v515_v17 = vmul.f32 %v507_v44, %v847_v13 }
  0xa1   : > { %v713_v55 = vpop.eup %712  ;;  %718 = vrcp.f32 %v397_v48  ;;  %v377_v56 = vadd.f32 2.0, %v711_v51  ;;  %v493_v57 = vmul.f32 1.442695, %v480_v49  ;;  %v477_v58 = vmin.f32 %v879_v50, 30.0 }
  0xa2   : > { %v715_v59 = vpop.eup %714  ;;  %720 = vrcp.f32 %v523_v52  ;;  %v503_v60 = vadd.f32 2.0, %v713_v55  ;;  %v361_v61 = vmul.f32 1.442695, %v351_v54 }
  0xa3   : > { %v717_v62 = vpop.eup %716  ;;  %v385_v63 = vmul.f32 %v711_v51, %v377_v56  ;;  %v374_v0 = vadd.f32 2.0, %v715_v59  ;;  %722 = vpow2.f32 %v367_v53  ;;  %v487_v1 = vmul.f32 1.442695, %v477_v58  ;;  %v344_v2 = vpop.f32.mrf.mxu2 }
  0xa4   : > { %v511_v3 = vmul.f32 %v713_v55, %v503_v60  ;;  %v500_v4 = vadd.f32 2.0, %v717_v62  ;;  %724 = vpow2.f32 %v493_v57  ;;  %v884_v5 = vadd.f32 %v836_v8, %v344_v2  ;;  %v470_v15 = vpop.f32.mrf.mxu3 }
  0xa5   : > { %v401_v6 = vadd.f32 2.0, %v385_v63  ;;  %v382_v7 = vmul.f32 %v715_v59, %v374_v0  ;;  %726 = vpow2.f32 %v361_v61  ;;  %v336_v22 = vpop.f32.mrf.mxu0  ;;  %v393_v26 = vmul.f32 %v385_v63, %v852_v19 }
  0xa6   : > { %v527_v12 = vadd.f32 2.0, %v511_v3  ;;  %v508_v14 = vmul.f32 %v717_v62, %v500_v4  ;;  %728 = vpow2.f32 %v487_v1  ;;  %v355_v20 = vmin.f32 %v884_v5, 30.0  ;;  %v462_v38 = vpop.f32.mrf.mxu1 }
  0xa7   : > { %v719_v16 = vpop.eup %718  ;;  %730 = vrcp.f32 %v401_v6  ;;  %v398_v18 = vadd.f32 2.0, %v382_v7  ;;  %v897_v30 = vadd.f32 %v841_v9, %v470_v15  ;;  %v906_v33 = vadd.f32 %v836_v8, %v336_v22 }
  0xa8   : > { %v721_v23 = vpop.eup %720  ;;  %v413_v25 = vmul.f32 %v719_v16, %v389_v10  ;;  %732 = vrcp.f32 %v527_v12  ;;  %v524_v11 = vadd.f32 2.0, %v508_v14  ;;  %v369_v13 = vmul.f32 1.442695, %v355_v20 }
  0xa9   : > { %v723_v28 = vpop.eup %722  ;;  %v539_v29 = vmul.f32 %v721_v23, %v515_v17  ;;  %734 = vrcp.f32 %v398_v18  ;;  %v481_v37 = vmin.f32 %v897_v30, 30.0  ;;  %v519_v41 = vmul.f32 %v511_v3, %v855_v21 }
  0xaa   : > { %v725_v31 = vpop.eup %724  ;;  %v421_v32 = vpack.c.bf16 %v413_v25, %v413_v25  ;;  %736 = vrcp.f32 %v524_v11  ;;  %v378_v19 = vadd.f32 2.0, %v723_v28  ;;  %v390_v43 = vmul.f32 %v382_v7, %v859_v24 }
  0xab   : > { %v727_v34 = vpop.eup %726  ;;  %v547_v35 = vpack.c.bf16 %v539_v29, %v539_v29  ;;  %v504_v36 = vadd.f32 2.0, %v725_v31  ;;  %738 = vpow2.f32 %v369_v13  ;;  %v516_v48 = vmul.f32 %v508_v14, %v863_v27  ;;  %v346_v53 = vpop.f32.mrf.mxu2 }
  0xac   : > { %v729_v40 = vpop.eup %728  ;;  %430 = vst.msk [vmem:[%s894_s14] sm:$0xf] %vm429_vm2, %v421_v32  ;;  %v386_v44 = vmul.f32 %v723_v28, %v378_v19  ;;  %v375_v45 = vadd.f32 2.0, %v727_v34  ;;  %v352_v52 = vmin.f32 %v906_v33, 30.0  ;;  %v918_v21 = vadd.f32 %v841_v9, %v462_v38  ;;  %v472_v6 = vpop.f32.mrf.mxu3 }
  0xad   : > { %v731_v47 = vpop.eup %730  ;;  %555 = vst.msk [vmem:[%s903_s17] sm:$0xf] %vm429_vm2, %v547_v35  ;;  %v512_v49 = vmul.f32 %v725_v31, %v504_v36  ;;  %v501_v51 = vadd.f32 2.0, %v729_v40  ;;  %v495_v61 = vmul.f32 1.442695, %v481_v37  ;;  %v921_v0 = vadd.f32 %v836_v8, %v346_v53 }
  0xae   : > { %v733_v54 = vpop.eup %732  ;;  %v417_v55 = vmul.f32 %v731_v47, %v393_v26  ;;  %v402_v56 = vadd.f32 2.0, %v386_v44  ;;  %v383_v57 = vmul.f32 %v727_v34, %v375_v45  ;;  %v363_v15 = vmul.f32 1.442695, %v352_v52 }
  0xaf   : > { %v735_v24 = vpop.eup %734  ;;  %v543_v58 = vmul.f32 %v733_v54, %v519_v41  ;;  %v528_v59 = vadd.f32 2.0, %v512_v49  ;;  %v509_v60 = vmul.f32 %v729_v40, %v501_v51  ;;  %v478_v8 = vmin.f32 %v918_v21, 30.0 }
  0xb0   : > { %v737_v27 = vpop.eup %736  ;;  %v425_v62 = vpack.c.bf16 %v417_v55, %v417_v55  ;;  %v414_v63 = vmul.f32 %v735_v24, %v390_v43  ;;  %740 = vrcp.f32 %v402_v56  ;;  %v399_v4 = vadd.f32 2.0, %v383_v57 }
  0xb1   : > { %v739_v1 = vpop.eup %738  ;;  %v551_v2 = vpack.c.bf16 %v543_v58, %v543_v58  ;;  %v540_v3 = vmul.f32 %v737_v27, %v516_v48  ;;  %742 = vrcp.f32 %v528_v59  ;;  %v525_v10 = vadd.f32 2.0, %v509_v60 }
  0xb2   : > { %434 = vst.msk [vmem:[%s894_s14 + $0x10] sm:$0xf] %vm429_vm2, %v425_v62  ;;  %v422_v7 = vpack.c.bf16 %v414_v63, %v414_v63  ;;  %v379_v12 = vadd.f32 2.0, %v739_v1  ;;  %744 = vrcp.f32 %v399_v4  ;;  %v356_v17 = vmin.f32 %v921_v0, 30.0 }
  0xb3   : > { %559 = vst.msk [vmem:[%s903_s17 + $0x10] sm:$0xf] %vm429_vm2, %v551_v2  ;;  %v548_v14 = vpack.c.bf16 %v540_v3, %v540_v3  ;;  %746 = vrcp.f32 %v525_v10  ;;  %v932_v18 = vadd.f32 %v841_v9, %v472_v6  ;;  %v394_v20 = vmul.f32 %v386_v44, %v868_v39 }
  0xb4   : > { %431 = vst.msk [vmem:[%s894_s14 + $0x4] sm:$0xf] %vm429_vm2, %v422_v7  ;;  %v387_v16 = vmul.f32 %v739_v1, %v379_v12  ;;  %748 = vpow2.f32 %v495_v61  ;;  %v489_v22 = vmul.f32 1.442695, %v478_v8  ;;  %v520_v25 = vmul.f32 %v512_v49, %v871_v42 }
  0xb5   : > { %556 = vst.msk [vmem:[%s903_s17 + $0x4] sm:$0xf] %vm429_vm2, %v548_v14  ;;  %750 = vpow2.f32 %v363_v15  ;;  %v371_v11 = vmul.f32 1.442695, %v356_v17  ;;  %v482_v13 = vmin.f32 %v932_v18, 30.0  ;;  %v391_v31 = vmul.f32 %v383_v57, %v875_v46 }
  0xb6   : > { %v741_v23 = vpop.eup %740  ;;  %v403_v26 = vadd.f32 2.0, %v387_v16  ;;  %752 = vpow2.f32 %v489_v22  ;;  %v517_v19 = vmul.f32 %v509_v60, %v879_v50  ;;  %v395_v50 = vmul.f32 %v387_v16, %v884_v5 }
  0xb7   : > { %v743_v28 = vpop.eup %742  ;;  %v418_v29 = vmul.f32 %v741_v23, %v394_v20  ;;  %v497_v42 = vmul.f32 1.442695, %v482_v13 }
  0xb8   : > { %v544_v9 = vmul.f32 %v743_v28, %v520_v25  ;;  %754 = vrcp.f32 %v403_v26  ;;  %v745_v39 = vpop.eup %744 }
  0xb9   : > { %v426_v32 = vpack.c.bf16 %v418_v29, %v418_v29  ;;  %756 = vpow2.f32 %v371_v11  ;;  %v747_v34 = vpop.eup %746  ;;  %v415_v36 = vmul.f32 %v745_v39, %v391_v31 }
  0xba   : > { %v552_v35 = vpack.c.bf16 %v544_v9, %v544_v9  ;;  %v749_v37 = vpop.eup %748  ;;  %v541_v38 = vmul.f32 %v747_v34, %v517_v19  ;;  %758 = vpow2.f32 %v497_v42 }
  0xbb   : > { %435 = vst.msk [vmem:[%s894_s14 + $0x14] sm:$0xf] %vm429_vm2, %v426_v32  ;;  %v751_v40 = vpop.eup %750  ;;  %v423_v46 = vpack.c.bf16 %v415_v36, %v415_v36  ;;  %v505_v41 = vadd.f32 2.0, %v749_v37 }
  0xbc   : > { %560 = vst.msk [vmem:[%s903_s17 + $0x14] sm:$0xf] %vm429_vm2, %v552_v35  ;;  %v753_v43 = vpop.eup %752  ;;  %v549_v44 = vpack.c.bf16 %v541_v38, %v541_v38  ;;  %v376_v45 = vadd.f32 2.0, %v751_v40 }
  0xbd   : > { %432 = vst.msk [vmem:[%s894_s14 + $0x8] sm:$0xf] %vm429_vm2, %v423_v46  ;;  %v513_v48 = vmul.f32 %v749_v37, %v505_v41  ;;  %v502_v49 = vadd.f32 2.0, %v753_v43 }
  0xbe   : > { %v755_v47 = vpop.eup %754  ;;  %557 = vst.msk [vmem:[%s903_s17 + $0x8] sm:$0xf] %vm429_vm2, %v549_v44  ;;  %v384_v53 = vmul.f32 %v751_v40, %v376_v45 }
  0xbf   : > { %v757_v51 = vpop.eup %756  ;;  %v419_v52 = vmul.f32 %v755_v47, %v395_v50  ;;  %v529_v54 = vadd.f32 2.0, %v513_v48  ;;  %v510_v55 = vmul.f32 %v753_v43, %v502_v49  ;;  %v521_v62 = vmul.f32 %v513_v48, %v897_v30 }
  0xc0   : > { %v380_v56 = vadd.f32 2.0, %v757_v51  ;;  %v759_v57 = vpop.eup %758  ;;  %v400_v58 = vadd.f32 2.0, %v384_v53  ;;  %v392_v2 = vmul.f32 %v384_v53, %v906_v33 }
  0xc1   : > { %v427_v24 = vpack.c.bf16 %v419_v52, %v419_v52  ;;  %760 = vrcp.f32 %v529_v54  ;;  %v526_v5 = vadd.f32 2.0, %v510_v55  ;;  %v506_v60 = vadd.f32 2.0, %v759_v57 }
  0xc2   : > { %v388_v59 = vmul.f32 %v757_v51, %v380_v56  ;;  %762 = vrcp.f32 %v400_v58  ;;  %v518_v6 = vmul.f32 %v510_v55, %v918_v21 }
  0xc3   : > { %436 = vst.msk [vmem:[%s894_s14 + $0x18] sm:$0xf] %vm429_vm2, %v427_v24  ;;  %764 = vrcp.f32 %v526_v5  ;;  %v514_v27 = vmul.f32 %v759_v57, %v506_v60 }
  0xc4   : > { %v404_v61 = vadd.f32 2.0, %v388_v59  ;;  %v396_v15 = vmul.f32 %v388_v59, %v921_v0 }
  0xc5   : > { %v530_v63 = vadd.f32 2.0, %v514_v27  ;;  %v522_v17 = vmul.f32 %v514_v27, %v932_v18 }
  0xc6   : > { %766 = vrcp.f32 %v404_v61 }
  0xc7   : > { %v761_v1 = vpop.eup %760  ;;  %768 = vrcp.f32 %v530_v63 }
  0xc8   : > { %v763_v3 = vpop.eup %762  ;;  %v545_v4 = vmul.f32 %v761_v1, %v521_v62 }
  0xc9   : > { %v765_v7 = vpop.eup %764  ;;  %v416_v10 = vmul.f32 %v763_v3, %v392_v2 }
  0xca   : > { %v553_v12 = vpack.c.bf16 %v545_v4, %v545_v4  ;;  %v542_v14 = vmul.f32 %v765_v7, %v518_v6 }
  0xcb   : > { %v424_v8 = vpack.c.bf16 %v416_v10, %v416_v10 }
  0xcc   : > { %v767_v30 = vpop.eup %766  ;;  %561 = vst.msk [vmem:[%s903_s17 + $0x18] sm:$0xf] %vm429_vm2, %v553_v12  ;;  %v550_v16 = vpack.c.bf16 %v542_v14, %v542_v14 }
  0xcd   : > { %v420_v33 = vmul.f32 %v767_v30, %v396_v15  ;;  %433 = vst.msk [vmem:[%s894_s14 + $0xc] sm:$0xf] %vm429_vm2, %v424_v8  ;;  %v769_v21 = vpop.eup %768 }
  0xce   : > { %558 = vst.msk [vmem:[%s903_s17 + $0xc] sm:$0xf] %vm429_vm2, %v550_v16  ;;  %v546_v22 = vmul.f32 %v769_v21, %v522_v17 }
  0xcf   : > { %v428_v20 = vpack.c.bf16 %v420_v33, %v420_v33 }
  0xd0   : > { %v554_v23 = vpack.c.bf16 %v546_v22, %v546_v22 }
  0xd1   : > { %437 = vst.msk [vmem:[%s894_s14 + $0x1c] sm:$0xf] %vm429_vm2, %v428_v20 }
  0xd2   : > { %562 = vst.msk [vmem:[%s903_s17 + $0x1c] sm:$0xf] %vm429_vm2, %v554_v23 }
  0xd3 PF: > { %s17_s21 = sadd.s32 1, %s776_s21  }
  0xd4   : > { %p14_p4 = scmp.ge.s32.totalorder %s17_s21, 4  }
  0xd6   :  { %16 = sbr.rel (!%p14_p4) target bundleno = 1 (0x1), region = 82 }

// kernel: csp_res_block.13
= control target key start
LH: loop header
LB: loop body
LE: loop exit
PB: predicated region body
PF: predicated region fallthrough
CT: control target
= control target key end

     0   :  { %s929_s24 = smov 0   ;;  %s1039_s0 = inlined_call_operand.vmem [shape: bf16[128,4], index: 0, kind: input, shape index: {}]   ;;  %s1040_s1 = inlined_call_operand.vmem [shape: bf16[128,4], index: 1, kind: input, shape index: {}]   ;;  %s1041_s2 = inlined_call_operand.vmem [shape: bf16[4,4], index: 2, kind: input, shape index: {}]   ;;  %s1042_s3 = inlined_call_operand.vmem [shape: f32[1,4], index: 3, kind: input, shape index: {}]   ;;  %s1043_s4 = inlined_call_operand.vmem [shape: bf16[4,8], index: 4, kind: input, shape index: {}]   ;;  %s1044_s5 = inlined_call_operand.vmem [shape: bf16[4,8], index: 5, kind: input, shape index: {}]   ;;  %s1045_s6 = inlined_call_operand.vmem [shape: f32[1,8], index: 6, kind: input, shape index: {}]   ;;  %s1046_s7 = inlined_call_operand.vmem [shape: f32[128,8], index: 7, kind: output, shape index: {}]  }
   0x1 LB: > { %s739_s25 = sadd.s32 4294967295, %s887_s24   ;;  %p743_p0 = scmp.ge.s32.totalorder %s887_s24, 1  ;;  %s887_s24 = sphi %s929_s24, %s17_s24  }
   0x2   : > { %p249_p1 = scmp.lt.s32.totalorder %s887_s24, 3 }
   0x4   : > { %p250_p2 = pnand %p743_p0, %p249_p1 }
   0x5   : > { %s744_s28 = sshll.u32 (!%p250_p2), %s739_s25, 3 }
   0x6   : > { %253 = sbr.rel (%p250_p2) target bundleno = 383 (0x17f), region = 48  ;;  %p287_p3 = scmp.lt.s32.totalorder (!%p250_p2), %s744_s28, 15 }
   0xb   : > { %v313_v0 = vld [vmem:[%s1041_s2] sm:$0x3]  ;;  %vm351_vm0 = vcmask 1041408   ;;  %s1048_s28 = smov (!%p287_p3, %s744_s28), 15  ;;  %vm338_vm1 = vcmask 31744   ;;  %vm662_vm2 = vcmask 64512  }
   0xc   : > { %v353_v1 = vsel %vm351_vm0, %v313_v0, 0  ;;  %s745_s29 = sshll.u32 %s1048_s28, 2  ;;  %v468_v6 = vld [vmem:[%s1043_s4] sm:$0x3]  ;;  %s749_s21 = sshll.u32 %s1048_s28, 3 }
   0xd   : > { %362 = vmatpush.bf16.msra.mxu0 %v353_v1  ;;  %804 = vmatpush.bf16.msra.mxu3 %v353_v1  ;;  %s296_s9 = scalar_lea.vmem %s1040_s1, %s745_s29  ;;  %s957_s14 = scalar_lea.vmem %s1039_s0, %s745_s29  ;;  %v547_v7 = vsel %vm351_vm0, %v468_v6, 0  ;;  %v963_v8 = vld [vmem:[%s1042_s3] ss:$0 sm:$0xff] }
   0xe   : > { %v796_v2 = vld [vmem:[%s296_s9] sm:$0xff]  ;;  %v797_v3 = vld [vmem:[%s296_s9 + $0x8] sm:$0xff]  ;;  %v798_v4 = vld [vmem:[%s296_s9 + $0x10] sm:$0xff]  ;;  %806 = vmatpush.bf16.msra.mxu2 %v547_v7  ;;  %s1014_s25 = scalar_lea.vmem %s1046_s7, %s749_s21 }
   0xf   : > { %v799_v5 = vld [vmem:[%s296_s9 + $0x18] sm:$0xff]  ;;  %v801_v9 = vld [vmem:[%s957_s14 + $0x8] sm:$0xff]  ;;  %v469_v12 = vld [vmem:[%s1044_s5] sm:$0x3] }
  0x10   : > { %766 = vmatmul.msk.bf16.vlgmr.msra.gmra.mxu0 %vm338_vm1, %v796_v2  ;;  %767 = vmatmul.msk.bf16.vlgmr.msra.gmra.mxu3 %vm338_vm1, %v797_v3  ;;  %v483_v14 = vsel %vm351_vm0, %v469_v12, 0  ;;  %v802_v25 = vld [vmem:[%s957_s14 + $0x10] sm:$0xff]  ;;  %v803_v47 = vld [vmem:[%s957_s14 + $0x18] sm:$0xff] }
  0x11   : > { %791 = vmatmul.msk.bf16.vlgmr.msra.gmra.mxu2 %vm338_vm1, %v801_v9  ;;  %492 = vmatpush.bf16.msrb.mxu0 %v483_v14 }
  0x12   : > { %805 = vmatpush.bf16.msra.mxu1 %v483_v14 }
  0x15   : > { %556 = vmatpush.bf16.msra.mxu0 %v547_v7 }
  0x20   : > { %768 = vmatmul.msk.bf16.gmra.mxu3 %vm338_vm1, %v798_v4 }
  0x21   : > { %792 = vmatmul.msk.bf16.gmra.mxu2 %vm338_vm1, %v802_v25 }
  0x30   : > { %769 = vmatmul.msk.bf16.gmra.mxu3 %vm338_vm1, %v799_v5 }
  0x31   : > { %793 = vmatmul.msk.bf16.gmra.mxu2 %vm338_vm1, %v803_v47 }
  0x8d   : > { %v364_v10 = vpop.f32.mrf.mxu0 }
  0x8e   : > { %v365_v11 = vadd.f32 %v963_v8, %v364_v10 }
  0x90   : > { %v384_v13 = vmin.f32 %v365_v11, 30.0 }
  0x92   : > { %v392_v15 = vmul.f32 1.442695, %v384_v13 }
  0x93   : > { %v369_v16 = vpop.f32.mrf.mxu3 }
  0x94   : > { %817 = vpow2.f32 %v392_v15  ;;  %v370_v17 = vadd.f32 %v963_v8, %v369_v16 }
  0x95   : > { %v366_v18 = vpop.f32.mrf.mxu0 }
  0x96   : > { %v386_v19 = vmin.f32 %v370_v17, 30.0  ;;  %v367_v20 = vadd.f32 %v963_v8, %v366_v18 }
  0x98   : > { %v396_v21 = vmul.f32 1.442695, %v386_v19  ;;  %v385_v22 = vmin.f32 %v367_v20, 30.0 }
  0x9a   : > { %v818_v23 = vpop.eup %817  ;;  %819 = vpow2.f32 %v396_v21  ;;  %v394_v24 = vmul.f32 1.442695, %v385_v22  ;;  %v800_v22 = vld [vmem:[%s957_s14] sm:$0xff] }
  0x9b   : > { %v408_v26 = vadd.f32 2.0, %v818_v23  ;;  %v371_v27 = vpop.f32.mrf.mxu3 }
  0x9c   : > { %821 = vpow2.f32 %v394_v24  ;;  %v372_v28 = vadd.f32 %v963_v8, %v371_v27 }
  0x9d   : > { %v416_v30 = vmul.f32 %v818_v23, %v408_v26 }
  0x9e   : > { %v387_v29 = vmin.f32 %v372_v28, 30.0 }
  0x9f   : > { %v432_v35 = vadd.f32 2.0, %v416_v30  ;;  %v424_v50 = vmul.f32 %v416_v30, %v365_v11 }
  0xa0   : > { %v820_v31 = vpop.eup %819  ;;  %v398_v32 = vmul.f32 1.442695, %v387_v29 }
  0xa1   : > { %v410_v33 = vadd.f32 2.0, %v820_v31 }
  0xa2   : > { %v822_v34 = vpop.eup %821  ;;  %823 = vpow2.f32 %v398_v32 }
  0xa3   : > { %v409_v36 = vadd.f32 2.0, %v822_v34  ;;  %v374_v37 = vpop.f32.mrf.mxu3  ;;  %v418_v39 = vmul.f32 %v820_v31, %v410_v33  ;;  %825 = vrcp.f32 %v432_v35 }
  0xa4   : > { %v978_v38 = vadd.f32 %v963_v8, %v374_v37 }
  0xa5   : > { %v417_v40 = vmul.f32 %v822_v34, %v409_v36  ;;  %v434_v45 = vadd.f32 2.0, %v418_v39  ;;  %v426_v1 = vmul.f32 %v418_v39, %v370_v17 }
  0xa6   : > { %v388_v41 = vmin.f32 %v978_v38, 30.0 }
  0xa7   : > { %v433_v42 = vadd.f32 2.0, %v417_v40  ;;  %v425_v54 = vmul.f32 %v417_v40, %v367_v20 }
  0xa8   : > { %v824_v43 = vpop.eup %823  ;;  %v400_v44 = vmul.f32 1.442695, %v388_v41 }
  0xa9   : > { %827 = vrcp.f32 %v433_v42  ;;  %v411_v46 = vadd.f32 2.0, %v824_v43  ;;  %v826_v52 = vpop.eup %825 }
  0xaa   : > { %829 = vpow2.f32 %v400_v44  ;;  %v448_v58 = vmul.f32 %v826_v52, %v424_v50 }
  0xab   : > { %v419_v48 = vmul.f32 %v824_v43, %v411_v46  ;;  %v376_v49 = vpop.f32.mrf.mxu3  ;;  %831 = vrcp.f32 %v434_v45  ;;  %v563_v43 = vpop.f32.mrf.mxu2  ;;  %v996_v45 = vld [vmem:[%s1045_s6] ss:$0 sm:$0xff] }
  0xac   : > { %v377_v51 = vadd.f32 %v963_v8, %v376_v49 }
  0xad   : > { %v435_v53 = vadd.f32 2.0, %v419_v48  ;;  %v427_v2 = vmul.f32 %v419_v48, %v372_v28 }
  0xae   : > { %v389_v55 = vmin.f32 %v377_v51, 30.0 }
  0xaf   : > { %v828_v56 = vpop.eup %827  ;;  %833 = vrcp.f32 %v435_v53 }
  0xb0   : > { %v830_v57 = vpop.eup %829  ;;  %v449_v59 = vmul.f32 %v828_v56, %v425_v54  ;;  %v402_v60 = vmul.f32 1.442695, %v389_v55 }
  0xb1   : > { %v412_v61 = vadd.f32 2.0, %v830_v57  ;;  %v832_v63 = vpop.eup %831 }
  0xb2   : > { %v456_v62 = vpack.c.bf16 %v449_v59, %v448_v58  ;;  %835 = vpow2.f32 %v402_v60  ;;  %v450_v6 = vmul.f32 %v832_v63, %v426_v1 }
  0xb3   : > { %v379_v0 = vpop.f32.mrf.mxu3  ;;  %v420_v5 = vmul.f32 %v830_v57, %v412_v61  ;;  %v565_v47 = vpop.f32.mrf.mxu2 }
  0xb4   : > { %v380_v3 = vadd.f32 %v963_v8, %v379_v0  ;;  %770 = vmatmul.msk.bf16.vlgmr.msrb.gmra.mxu0 %vm338_vm1, %v456_v62 }
  0xb5   : > { %v834_v4 = vpop.eup %833  ;;  %v436_v13 = vadd.f32 2.0, %v420_v5  ;;  %v428_v25 = vmul.f32 %v420_v5, %v978_v38 }
  0xb6   : > { %v451_v7 = vmul.f32 %v834_v4, %v427_v2  ;;  %v390_v9 = vmin.f32 %v380_v3, 30.0 }
  0xb8   : > { %v836_v10 = vpop.eup %835  ;;  %v404_v11 = vmul.f32 1.442695, %v390_v9  ;;  %v457_v12 = vpack.c.bf16 %v451_v7, %v450_v6 }
  0xb9   : > { %v413_v14 = vadd.f32 2.0, %v836_v10 }
  0xba   : > { %837 = vpow2.f32 %v404_v11  ;;  %771 = vmatmul.msk.bf16.vlgmr.msra.gmra.mxu1 %vm338_vm1, %v457_v12 }
  0xbb   : > { %v421_v15 = vmul.f32 %v836_v10, %v413_v14  ;;  %v381_v16 = vpop.f32.mrf.mxu3  ;;  %839 = vrcp.f32 %v436_v13  ;;  %v568_v55 = vpop.f32.mrf.mxu2 }
  0xbc   : > { %v382_v17 = vadd.f32 %v963_v8, %v381_v16 }
  0xbd   : > { %v437_v18 = vadd.f32 2.0, %v421_v15  ;;  %v429_v26 = vmul.f32 %v421_v15, %v377_v51 }
  0xbe   : > { %v391_v19 = vmin.f32 %v382_v17, 30.0 }
  0xbf   : > { %841 = vrcp.f32 %v437_v18 }
  0xc0   : > { %v838_v20 = vpop.eup %837  ;;  %v406_v21 = vmul.f32 1.442695, %v391_v19 }
  0xc1   : > { %v414_v23 = vadd.f32 2.0, %v838_v20  ;;  %v840_v24 = vpop.eup %839 }
  0xc2   : > { %843 = vpow2.f32 %v406_v21  ;;  %v452_v29 = vmul.f32 %v840_v24, %v428_v25 }
  0xc3   : > { %v422_v28 = vmul.f32 %v838_v20, %v414_v23  ;;  %v570_v10 = vpop.f32.mrf.mxu2 }
  0xc4   : > { %790 = vmatmul.msk.bf16.vlgmr.msra.gmra.mxu0 %vm338_vm1, %v800_v22 }
  0xc5   : > { %v842_v27 = vpop.eup %841  ;;  %v438_v32 = vadd.f32 2.0, %v422_v28  ;;  %v430_v37 = vmul.f32 %v422_v28, %v380_v3 }
  0xc6   : > { %v453_v30 = vmul.f32 %v842_v27, %v429_v26 }
  0xc7   : > { %845 = vrcp.f32 %v438_v32 }
  0xc8   : > { %v844_v8 = vpop.eup %843  ;;  %v458_v31 = vpack.c.bf16 %v453_v30, %v452_v29 }
  0xc9   : > { %v415_v33 = vadd.f32 2.0, %v844_v8 }
  0xca   : > { %772 = vmatmul.msk.bf16.gmra.mxu1 %vm338_vm1, %v458_v31 }
  0xcb   : > { %v423_v34 = vmul.f32 %v844_v8, %v415_v33  ;;  %v573_v8 = vpop.f32.mrf.mxu2 }
  0xcd   : > { %v439_v35 = vadd.f32 2.0, %v423_v34  ;;  %v846_v36 = vpop.eup %845  ;;  %v431_v38 = vmul.f32 %v423_v34, %v382_v17 }
  0xce   : > { %v454_v40 = vmul.f32 %v846_v36, %v430_v37 }
  0xcf   : > { %847 = vrcp.f32 %v439_v35 }
  0xd5   : > { %v848_v39 = vpop.eup %847 }
  0xd6   : > { %v455_v41 = vmul.f32 %v848_v39, %v431_v38 }
  0xd8   : > { %v459_v42 = vpack.c.bf16 %v455_v41, %v454_v40 }
  0xda   : > { %773 = vmatmul.msk.bf16.gmra.mxu1 %vm338_vm1, %v459_v42 }
 0x131   : > { %v494_v44 = vpop.f32.mrf.mxu0 }
 0x137   : > { %v499_v46 = vpop.f32.mrf.mxu1 }
 0x138   : > { %v564_v48 = vadd.f32 %v563_v43, %v499_v46 }
 0x139   : > { %v496_v49 = vpop.f32.mrf.mxu0 }
 0x13a   : > { %v584_v50 = vadd.f32 %v996_v45, %v564_v48 }
 0x13c   : > { %v592_v51 = vmin.f32 %v584_v50, 30.0 }
 0x13e   : > { %v602_v52 = vmul.f32 1.442695, %v592_v51 }
 0x13f   : > { %v501_v53 = vpop.f32.mrf.mxu1 }
 0x140   : > { %849 = vpow2.f32 %v602_v52  ;;  %v566_v54 = vadd.f32 %v565_v47, %v501_v53 }
 0x141   : > { %v558_v56 = vpop.f32.mrf.mxu0 }
 0x142   : > { %v585_v57 = vadd.f32 %v996_v45, %v566_v54  ;;  %v559_v58 = vadd.f32 %v558_v56, %v494_v44  ;;  %v575_v54 = vpop.f32.mrf.mxu2 }
 0x144   : > { %v593_v59 = vmin.f32 %v585_v57, 30.0  ;;  %v582_v60 = vadd.f32 %v996_v45, %v559_v58 }
 0x146   : > { %v850_v61 = vpop.eup %849  ;;  %v604_v62 = vmul.f32 1.442695, %v593_v59  ;;  %v590_v63 = vmin.f32 %v582_v60, 30.0 }
 0x147   : > { %v616_v0 = vadd.f32 2.0, %v850_v61  ;;  %v504_v1 = vpop.f32.mrf.mxu1 }
 0x148   : > { %851 = vpow2.f32 %v604_v62  ;;  %v598_v2 = vmul.f32 1.442695, %v590_v63  ;;  %v569_v3 = vadd.f32 %v568_v55, %v504_v1 }
 0x149   : > { %v624_v4 = vmul.f32 %v850_v61, %v616_v0  ;;  %v560_v5 = vpop.f32.mrf.mxu0 }
 0x14a   : > { %853 = vpow2.f32 %v598_v2  ;;  %v1002_v6 = vadd.f32 %v996_v45, %v569_v3  ;;  %v561_v7 = vadd.f32 %v560_v5, %v496_v49 }
 0x14b   : > { %v640_v9 = vadd.f32 2.0, %v624_v4  ;;  %v632_v23 = vmul.f32 %v624_v4, %v584_v50 }
 0x14c   : > { %v594_v11 = vmin.f32 %v1002_v6, 30.0  ;;  %v1006_v12 = vadd.f32 %v996_v45, %v561_v7 }
 0x14d   : > { %855 = vrcp.f32 %v640_v9 }
 0x14e   : > { %v852_v13 = vpop.eup %851  ;;  %v606_v14 = vmul.f32 1.442695, %v594_v11  ;;  %v591_v15 = vmin.f32 %v1006_v12, 30.0 }
 0x14f   : > { %v617_v16 = vadd.f32 2.0, %v852_v13  ;;  %v506_v17 = vpop.f32.mrf.mxu1 }
 0x150   : > { %v854_v18 = vpop.eup %853  ;;  %857 = vpow2.f32 %v606_v14  ;;  %v600_v19 = vmul.f32 1.442695, %v591_v15  ;;  %v571_v20 = vadd.f32 %v570_v10, %v506_v17 }
 0x151   : > { %v625_v21 = vmul.f32 %v852_v13, %v617_v16  ;;  %v614_v22 = vadd.f32 2.0, %v854_v18 }
 0x152   : > { %859 = vpow2.f32 %v600_v19  ;;  %v587_v24 = vadd.f32 %v996_v45, %v571_v20 }
 0x153   : > { %v856_v25 = vpop.eup %855  ;;  %v641_v26 = vadd.f32 2.0, %v625_v21  ;;  %v622_v27 = vmul.f32 %v854_v18, %v614_v22  ;;  %v633_v39 = vmul.f32 %v625_v21, %v585_v57 }
 0x154   : > { %v656_v28 = vmul.f32 %v856_v25, %v632_v23  ;;  %v595_v29 = vmin.f32 %v587_v24, 30.0 }
 0x155   : > { %861 = vrcp.f32 %v641_v26  ;;  %v638_v30 = vadd.f32 2.0, %v622_v27  ;;  %v630_v46 = vmul.f32 %v622_v27, %v582_v60 }
 0x156   : > { %v858_v31 = vpop.eup %857  ;;  %665 = vst.msk [vmem:[%s1014_s25 + $0x10] sm:$0xff] %vm662_vm2, %v656_v28  ;;  %v608_v32 = vmul.f32 1.442695, %v595_v29 }
 0x157   : > { %863 = vrcp.f32 %v638_v30  ;;  %v618_v33 = vadd.f32 2.0, %v858_v31  ;;  %v509_v34 = vpop.f32.mrf.mxu1 }
 0x158   : > { %v860_v35 = vpop.eup %859  ;;  %865 = vpow2.f32 %v608_v32  ;;  %v574_v36 = vadd.f32 %v573_v8, %v509_v34 }
 0x159   : > { %v626_v37 = vmul.f32 %v858_v31, %v618_v33  ;;  %v615_v38 = vadd.f32 2.0, %v860_v35 }
 0x15a   : > { %v588_v40 = vadd.f32 %v996_v45, %v574_v36 }
 0x15b   : > { %v862_v41 = vpop.eup %861  ;;  %v642_v42 = vadd.f32 2.0, %v626_v37  ;;  %v623_v43 = vmul.f32 %v860_v35, %v615_v38  ;;  %v634_v58 = vmul.f32 %v626_v37, %v1002_v6 }
 0x15c   : > { %v657_v44 = vmul.f32 %v862_v41, %v633_v39  ;;  %v596_v47 = vmin.f32 %v588_v40, 30.0 }
 0x15d   : > { %v864_v48 = vpop.eup %863  ;;  %867 = vrcp.f32 %v642_v42  ;;  %v639_v49 = vadd.f32 2.0, %v623_v43  ;;  %v631_v63 = vmul.f32 %v623_v43, %v1006_v12 }
 0x15e   : > { %v866_v50 = vpop.eup %865  ;;  %666 = vst.msk [vmem:[%s1014_s25 + $0x18] sm:$0xff] %vm662_vm2, %v657_v44  ;;  %v654_v51 = vmul.f32 %v864_v48, %v630_v46  ;;  %v610_v52 = vmul.f32 1.442695, %v596_v47 }
 0x15f   : > { %869 = vrcp.f32 %v639_v49  ;;  %v619_v53 = vadd.f32 2.0, %v866_v50  ;;  %v511_v55 = vpop.f32.mrf.mxu1 }
 0x160   : > { %663 = vst.msk [vmem:[%s1014_s25] sm:$0xff] %vm662_vm2, %v654_v51  ;;  %871 = vpow2.f32 %v610_v52  ;;  %v576_v56 = vadd.f32 %v575_v54, %v511_v55 }
 0x161   : > { %v627_v57 = vmul.f32 %v866_v50, %v619_v53 }
 0x162   : > { %v589_v59 = vadd.f32 %v996_v45, %v576_v56 }
 0x163   : > { %v868_v60 = vpop.eup %867  ;;  %v643_v61 = vadd.f32 2.0, %v627_v57  ;;  %v635_v6 = vmul.f32 %v627_v57, %v587_v24 }
 0x164   : > { %v658_v62 = vmul.f32 %v868_v60, %v634_v58  ;;  %v597_v0 = vmin.f32 %v589_v59, 30.0 }
 0x165   : > { %v870_v1 = vpop.eup %869  ;;  %873 = vrcp.f32 %v643_v61 }
 0x166   : > { %v872_v2 = vpop.eup %871  ;;  %667 = vst.msk [vmem:[%s1014_s25 + $0x20] sm:$0xff] %vm662_vm2, %v658_v62  ;;  %v655_v3 = vmul.f32 %v870_v1, %v631_v63  ;;  %v612_v4 = vmul.f32 1.442695, %v597_v0 }
 0x167   : > { %v620_v5 = vadd.f32 2.0, %v872_v2 }
 0x168   : > { %664 = vst.msk [vmem:[%s1014_s25 + $0x8] sm:$0xff] %vm662_vm2, %v655_v3  ;;  %875 = vpow2.f32 %v612_v4 }
 0x169   : > { %v628_v45 = vmul.f32 %v872_v2, %v620_v5 }
 0x16b   : > { %v874_v7 = vpop.eup %873  ;;  %v644_v9 = vadd.f32 2.0, %v628_v45  ;;  %v636_v14 = vmul.f32 %v628_v45, %v588_v40 }
 0x16c   : > { %v659_v10 = vmul.f32 %v874_v7, %v635_v6 }
 0x16d   : > { %877 = vrcp.f32 %v644_v9 }
 0x16e   : > { %v876_v11 = vpop.eup %875  ;;  %668 = vst.msk [vmem:[%s1014_s25 + $0x28] sm:$0xff] %vm662_vm2, %v659_v10 }
 0x16f   : > { %v621_v12 = vadd.f32 2.0, %v876_v11 }
 0x171   : > { %v629_v13 = vmul.f32 %v876_v11, %v621_v12 }
 0x173   : > { %v878_v15 = vpop.eup %877  ;;  %v645_v16 = vadd.f32 2.0, %v629_v13  ;;  %v637_v18 = vmul.f32 %v629_v13, %v589_v59 }
 0x174   : > { %v660_v17 = vmul.f32 %v878_v15, %v636_v14 }
 0x175   : > { %879 = vrcp.f32 %v645_v16 }
 0x176   : > { %669 = vst.msk [vmem:[%s1014_s25 + $0x30] sm:$0xff] %vm662_vm2, %v660_v17 }
 0x17b   : > { %v880_v19 = vpop.eup %879 }
 0x17c   : > { %v661_v20 = vmul.f32 %v880_v19, %v637_v18 }
 0x17e   : > { %670 = vst.msk [vmem:[%s1014_s25 + $0x38] sm:$0xff] %vm662_vm2, %v661_v20 }
 0x17f PF: > { %s17_s24 = sadd.s32 1, %s887_s24  }
 0x180   : > { %p14_p4 = scmp.ge.s32.totalorder %s17_s24, 4  }
 0x182   :  { %16 = sbr.rel (!%p14_p4) target bundleno = 1 (0x1), region = 81 }

// kernel: csp_res_block.10
= control target key start
LH: loop header
LB: loop body
LE: loop exit
PB: predicated region body
PF: predicated region fallthrough
CT: control target
= control target key end

     0   :  { %s1621_s15 = smov 0   ;;  %s2131_s0 = inlined_call_operand.vmem [shape: bf16[2,10,10,4], index: 0, kind: input, shape index: {}]   ;;  %s2132_s1 = inlined_call_operand.vmem [shape: bf16[9,4,4], index: 1, kind: input, shape index: {}]   ;;  %s2133_s2 = inlined_call_operand.vmem [shape: f32[1,4], index: 2, kind: input, shape index: {}]   ;;  %s2134_s3 = inlined_call_operand.vmem [shape: bf16[2,8,8,4], index: 3, kind: input, shape index: {}]   ;;  %s2135_s4 = inlined_call_operand.vmem [shape: bf16[2,8,8,4], index: 4, kind: output, shape index: {}]  }
   0x1 LB: > { %s1362_s16 = sadd.s32 4294967295, %s1594_s15   ;;  %p1366_p0 = scmp.ge.s32.totalorder %s1594_s15, 1  ;;  %s1594_s15 = sphi %s1621_s15, %s14_s15  }
   0x2   : > { %p172_p1 = scmp.lt.s32.totalorder %s1594_s15, 3 }
   0x4   : > { %p173_p2 = pnand %p1366_p0, %p172_p1 }
   0x5   : > { %p203_p3 = scmp.lt.s32.totalorder (!%p173_p2), %s1362_s16, 1 }
   0x6   : > { %176 = sbr.rel (%p173_p2) target bundleno = 334 (0x14e), region = 36 }
   0xb   : > { %v1372_v0 = vld [vmem:[%s2132_s1 + $0x2] sm:$0x3]  ;;  %vm324_vm0 = vcmask 1041408   ;;  %v1381_v2 = vld [vmem:[%s2132_s1 + $0x4] sm:$0x3]  ;;  %s2137_s16 = smov (!%p203_p3, %s1362_s16), 1 }
   0xc   : > { %v326_v1 = vsel %vm324_vm0, %v1372_v0, 0  ;;  %v1410_v3 = vld [vmem:[%s2132_s1 + $0x6] sm:$0x3]  ;;  %v477_v4 = vsel %vm324_vm0, %v1381_v2, 0  ;;  %v239_v6 = vld [vmem:[%s2132_s1] sm:$0x3] }
   0xd   : > { %1543 = vmatpush.bf16.msra.mxu1 %v326_v1  ;;  %1544 = vmatpush.bf16.msra.mxu2 %v326_v1  ;;  %v552_v5 = vsel %vm324_vm0, %v1410_v3, 0  ;;  %v370_v7 = vsel %vm324_vm0, %v239_v6, 0  ;;  %v1431_v8 = vld [vmem:[%s2132_s1 + $0x8] sm:$0x3]  ;;  %s1546_s27 = smul.u32 80, %s2137_s16  ;;  %vm272_vm1 = vcmask 1046528  }
   0xe   : > { %1545 = vmatpush.bf16.msra.mxu3 %v326_v1  ;;  %335 = vmatpush.bf16.msra.mxu0 %v326_v1  ;;  %v690_v9 = vsel %vm324_vm0, %v1431_v8, 0  ;;  %v1473_v10 = vld [vmem:[%s2132_s1 + $0xc] sm:$0x3]  ;;  %vm311_vm2 = vcmask 31744   ;;  %vm425_vm3 = vcmask 1045504   ;;  %s1514_s17 = sshll.u32 %s2137_s16, 5 }
   0xf   : > { %s1658_s6 = scalar_lea.vmem %s2131_s0, %s1546_s27  ;;  %v1661_v11 = vsel %vm324_vm0, %v1473_v10, 0  ;;  %s2063_s20 = scalar_lea.vmem %s2134_s3, %s1514_s17  ;;  %vm1286_vm4 = vcmask 27648  }
  0x10   : > { %v1664_v12 = vld [vmem:[%s1658_s6 + $0x10] sm:$0xf]  ;;  %v1667_v13 = vld [vmem:[%s1658_s6 + $0x18] sm:$0xf]  ;;  %v1670_v14 = vld [vmem:[%s1658_s6 + $0x14] sm:$0x1]  ;;  %s2084_s23 = scalar_lea.vmem %s2135_s4, %s1514_s17 }
  0x11   : > { %486 = vmatpush.bf16.msrb.mxu2 %v477_v4  ;;  %379 = vmatpush.bf16.msrb.mxu1 %v370_v7  ;;  %v229_v15 = vunpack.c.l.bf16 %v1664_v12  ;;  %v230_v16 = vunpack.c.l.bf16 %v1667_v13  ;;  %v1675_v17 = vld [vmem:[%s1658_s6 + $0x1c] sm:$0x1]  ;;  %v250_v18 = vunpack.c.l.bf16 %v1670_v14  ;;  %v1679_v19 = vld [vmem:[%s1658_s6 + $0x20] sm:$0xf]  ;;  %v1682_v20 = vld [vmem:[%s1658_s6 + $0x28] sm:$0xf] }
  0x12   : > { %561 = vmatpush.bf16.msrb.mxu3 %v552_v5  ;;  %699 = vmatpush.bf16.msrb.mxu0 %v690_v9  ;;  %v251_v21 = vunpack.c.l.bf16 %v1675_v17  ;;  %v231_v22 = vunpack.c.l.bf16 %v1679_v19  ;;  %v232_v23 = vunpack.c.l.bf16 %v1682_v20  ;;  %v1688_v24 = vld [vmem:[%s1658_s6 + $0x24] sm:$0x1]  ;;  %v1691_v25 = vld [vmem:[%s1658_s6 + $0x2c] sm:$0x1]  ;;  %v1694_v26 = vld [vmem:[%s1658_s6 + $0x30] sm:$0xf] }
  0x13   : > { %v279_v27 = vrot.slane %v229_v15, 1  ;;  %v280_v28 = vrot.slane %v250_v18, 1  ;;  %v282_v29 = vrot.slane %v230_v16, 1  ;;  %v252_v30 = vunpack.c.l.bf16 %v1688_v24  ;;  %v1704_v31 = vld [vmem:[%s1658_s6 + $0x38] sm:$0xf] }
  0x14   : > { %v283_v32 = vrot.slane %v251_v21, 1  ;;  %v253_v33 = vunpack.c.l.bf16 %v1691_v25  ;;  %v285_v34 = vrot.slane %v231_v22, 1  ;;  %v288_v35 = vrot.slane %v232_v23, 1  ;;  %v1714_v36 = vld [vmem:[%s1658_s6 + $0x34] sm:$0x1] }
  0x15   : > { %v281_v37 = vsel %vm272_vm1, %v279_v27, %v280_v28  ;;  %v286_v38 = vrot.slane %v252_v30, 1  ;;  %v233_v39 = vunpack.c.l.bf16 %v1694_v26  ;;  %v234_v40 = vunpack.c.l.bf16 %v1704_v31  ;;  %v1722_v41 = vld [vmem:[%s1658_s6 + $0x3c] sm:$0x1]  ;;  %v219_v42 = vld [vmem:[%s1658_s6] sm:$0xf] }
  0x16   : > { %v284_v43 = vsel %vm272_vm1, %v282_v29, %v283_v32  ;;  %v289_v44 = vrot.slane %v253_v33, 1  ;;  %v254_v45 = vunpack.c.l.bf16 %v1714_v36  ;;  %v255_v46 = vunpack.c.l.bf16 %v1722_v41  ;;  %v220_v47 = vld [vmem:[%s1658_s6 + $0x8] sm:$0xf]  ;;  %v240_v48 = vld [vmem:[%s1658_s6 + $0x4] sm:$0x1] }
  0x17   : > { %v306_v49 = vpack.c.bf16 %v284_v43, %v281_v37  ;;  %v287_v50 = vsel %vm272_vm1, %v285_v34, %v286_v38  ;;  %v291_v51 = vrot.slane %v233_v39, 1  ;;  %v294_v52 = vrot.slane %v234_v40, 1  ;;  %v241_v53 = vld [vmem:[%s1658_s6 + $0xc] sm:$0x1]  ;;  %v401_v54 = vld [vmem:[%s1658_s6] sm:$0xe] }
  0x18   : > { %v290_v55 = vsel %vm272_vm1, %v288_v35, %v289_v44  ;;  %v292_v56 = vrot.slane %v254_v45, 1  ;;  %v295_v57 = vrot.slane %v255_v46, 1  ;;  %v227_v58 = vunpack.c.l.bf16 %v219_v42  ;;  %v402_v63 = vld [vmem:[%s1658_s6 + $0x8] sm:$0xe]  ;;  %v1494_v9 = vld [vmem:[%s2132_s1 + $0xe] sm:$0x3] }
  0x19   : > { %1374 = vmatmul.msk.bf16.vlgmr.msra.gmra.mxu1 %vm311_vm2, %v306_v49  ;;  %v307_v59 = vpack.c.bf16 %v290_v55, %v287_v50  ;;  %v228_v60 = vunpack.c.l.bf16 %v220_v47  ;;  %v248_v61 = vunpack.c.l.bf16 %v240_v48  ;;  %v249_v62 = vunpack.c.l.bf16 %v241_v53  ;;  %v1415_v28 = vld [vmem:[%s1658_s6 + $0x8] sm:$0xf]  ;;  %v1507_v32 = vld [vmem:[%s2132_s1 + $0x10] sm:$0x3]  ;;  %v1764_v34 = vld [vmem:[%s1658_s6 + $0xc] sm:$0x1] }
  0x1a   : > { %v293_v0 = vsel %vm272_vm1, %v291_v51, %v292_v56  ;;  %v296_v1 = vsel %vm272_vm1, %v294_v52, %v295_v57  ;;  %v273_v2 = vrot.slane %v227_v58, 1  ;;  %v409_v3 = vunpack.c.l.bf16 %v401_v54  ;;  %v1444_v29 = vld [vmem:[%s2132_s1 + $0xa] sm:$0x3]  ;;  %v1417_v35 = vld [vmem:[%s1658_s6 + $0x10] sm:$0xf] }
  0x1b   : > { %1375 = vmatmul.msk.bf16.vlgmr.msra.gmra.mxu2 %vm311_vm2, %v307_v59  ;;  %v308_v4 = vpack.c.bf16 %v296_v1, %v293_v0  ;;  %v274_v5 = vrot.slane %v248_v61, 1  ;;  %v276_v6 = vrot.slane %v228_v60, 1  ;;  %v277_v7 = vrot.slane %v249_v62, 1  ;;  %v1768_v37 = vld [vmem:[%s1658_s6 + $0x14] sm:$0x1] }
  0x1c   : > { %v410_v8 = vunpack.c.l.bf16 %v402_v63  ;;  %888 = vmatpush.bf16.msra.mxu2 %v1661_v11  ;;  %v426_v38 = vrot.slane %v409_v3, 2  ;;  %v427_v42 = vrot.slane %v248_v61, 2  ;;  %v1017_v43 = vsel %vm324_vm0, %v1494_v9, 0  ;;  %v1396_v63 = vld [vmem:[%s1658_s6 + $0x8] sm:$0xf] }
  0x1d   : > { %1376 = vmatmul.msk.bf16.vlgmr.msra.gmra.mxu3 %vm311_vm2, %v308_v4  ;;  %v275_v10 = vsel %vm272_vm1, %v273_v2, %v274_v5  ;;  %v278_v27 = vsel %vm272_vm1, %v276_v6, %v277_v7  ;;  %v430_v47 = vrot.slane %v249_v62, 2  ;;  %v804_v48 = vsel %vm324_vm0, %v1444_v29, 0  ;;  %v1516_v0 = vld [vmem:[%s1658_s6 + $0xc] sm:$0xf0]  ;;  %v404_v4 = vld [vmem:[%s1658_s6 + $0x18] sm:$0xe] }
  0x1e   : > { %v305_v11 = vpack.c.bf16 %v278_v27, %v275_v10  ;;  %v429_v44 = vrot.slane %v410_v8, 2  ;;  %1026 = vmatpush.bf16.msra.mxu3 %v1017_v43  ;;  %v1131_v49 = vsel %vm324_vm0, %v1507_v32, 0  ;;  %v607_v50 = vunpack.c.l.bf16 %v1415_v28  ;;  %813 = vmatpush.bf16.msra.mxu1 %v804_v48  ;;  %v403_v3 = vld [vmem:[%s1658_s6 + $0x10] sm:$0xe]  ;;  %v1419_v8 = vld [vmem:[%s1658_s6 + $0x18] sm:$0xf] }
  0x1f   : > { %v608_v51 = vunpack.c.l.bf16 %v1764_v34  ;;  %v609_v52 = vunpack.c.l.bf16 %v1417_v35  ;;  %v610_v53 = vunpack.c.l.bf16 %v1768_v37  ;;  %v235_v54 = vpack.c.bf16 %v228_v60, %v227_v58  ;;  %v1793_v9 = vld [vmem:[%s1658_s6 + $0x1c] sm:$0x1]  ;;  %v1421_v10 = vld [vmem:[%s1658_s6 + $0x20] sm:$0xf]  ;;  %v1797_v27 = vld [vmem:[%s1658_s6 + $0x24] sm:$0x1] }
  0x20   : > { %1373 = vmatmul.msk.bf16.vlgmr.msra.gmra.mxu0 %vm311_vm2, %v305_v11  ;;  %v428_v55 = vsel %vm425_vm3, %v426_v38, %v427_v42  ;;  %v431_v56 = vsel %vm425_vm3, %v429_v44, %v430_v47  ;;  %v639_v57 = vrot.slane %v607_v50, 1  ;;  %v1397_v58 = vor.u32 %v1516_v0, %v1396_v63  ;;  %v1400_v44 = vld [vmem:[%s1658_s6 + $0x18] sm:$0xf]  ;;  %v1517_v12 = vld [vmem:[%s1658_s6 + $0x1c] sm:$0xf0] }
  0x21   : > { %1140 = vmatpush.bf16.msra.mxu0 %v1131_v49  ;;  %v640_v59 = vrot.slane %v608_v51, 1  ;;  %v642_v61 = vrot.slane %v609_v52, 1  ;;  %v643_v62 = vrot.slane %v610_v53, 1  ;;  %v458_v1 = vpack.c.bf16 %v431_v56, %v428_v55  ;;  %v405_v48 = vld [vmem:[%s1658_s6 + $0x20] sm:$0xe] }
  0x22   : > { %v411_v6 = vunpack.c.l.bf16 %v403_v3  ;;  %v412_v7 = vunpack.c.l.bf16 %v404_v4  ;;  %v433_v28 = vrot.slane %v250_v18, 2  ;;  %v436_v11 = vrot.slane %v251_v21, 2  ;;  %v406_v49 = vld [vmem:[%s1658_s6 + $0x28] sm:$0xe]  ;;  %v1833_v56 = vld [vmem:[%s1658_s6 + $0x2c] sm:$0x1] }
  0x23   : > { %v641_v60 = vsel %vm272_vm1, %v639_v57, %v640_v59  ;;  %v644_v2 = vsel %vm272_vm1, %v642_v61, %v643_v62  ;;  %v1808_v35 = vpack.c.bf16 %v234_v40, %v233_v39  ;;  %v611_v38 = vunpack.c.l.bf16 %v1419_v8  ;;  %v1423_v55 = vld [vmem:[%s1658_s6 + $0x28] sm:$0xf]  ;;  %v1425_v57 = vld [vmem:[%s1658_s6 + $0x30] sm:$0xf]  ;;  %v1837_v59 = vld [vmem:[%s1658_s6 + $0x34] sm:$0x1] }
  0x24   : > { %v671_v5 = vpack.c.bf16 %v644_v2, %v641_v60  ;;  %v432_v29 = vrot.slane %v411_v6, 2  ;;  %v435_v32 = vrot.slane %v412_v7, 2  ;;  %v612_v42 = vunpack.c.l.bf16 %v1793_v9  ;;  %v1404_v6 = vld [vmem:[%s1658_s6 + $0x28] sm:$0xf]  ;;  %v1518_v19 = vld [vmem:[%s1658_s6 + $0x2c] sm:$0xf0] }
  0x25   : > { %v613_v14 = vunpack.c.l.bf16 %v1421_v10  ;;  %v614_v18 = vunpack.c.l.bf16 %v1797_v27  ;;  %v236_v17 = vpack.c.bf16 %v230_v16, %v229_v15  ;;  %v645_v31 = vrot.slane %v611_v38, 1  ;;  %v407_v8 = vld [vmem:[%s1658_s6 + $0x30] sm:$0xe]  ;;  %v408_v10 = vld [vmem:[%s1658_s6 + $0x38] sm:$0xe] }
  0x26   : > { %v434_v21 = vsel %vm425_vm3, %v432_v29, %v433_v28  ;;  %v437_v26 = vsel %vm425_vm3, %v435_v32, %v436_v11  ;;  %v646_v39 = vrot.slane %v612_v42, 1  ;;  %v1401_v15 = vor.u32 %v1517_v12, %v1400_v44  ;;  %v1427_v11 = vld [vmem:[%s1658_s6 + $0x38] sm:$0xf]  ;;  %v1867_v38 = vld [vmem:[%s1658_s6 + $0x3c] sm:$0x1] }
  0x27   : > { %v648_v40 = vrot.slane %v613_v14, 1  ;;  %v649_v43 = vrot.slane %v614_v18, 1  ;;  %v459_v13 = vpack.c.bf16 %v437_v26, %v434_v21  ;;  %v413_v52 = vunpack.c.l.bf16 %v405_v48  ;;  %v1429_v14 = vld [vmem:[%s1658_s6 + $0x40] sm:$0xf] }
  0x28   : > { %v647_v16 = vsel %vm272_vm1, %v645_v31, %v646_v39  ;;  %v439_v62 = vrot.slane %v252_v30, 2  ;;  %v442_v0 = vrot.slane %v253_v33, 2  ;;  %v617_v60 = vunpack.c.l.bf16 %v1425_v57  ;;  %v1519_v48 = vld [vmem:[%s1658_s6 + $0x3c] sm:$0xf0] }
  0x29   : > { %1377 = vmatmul.msk.bf16.vlgmr.msrb.gmra.mxu1 %vm311_vm2, %v235_v54  ;;  %v650_v47 = vsel %vm272_vm1, %v648_v40, %v649_v43  ;;  %v414_v54 = vunpack.c.l.bf16 %v406_v49  ;;  %v438_v61 = vrot.slane %v413_v52, 2  ;;  %v618_v2 = vunpack.c.l.bf16 %v1837_v59  ;;  %v1437_v49 = vld [vmem:[%s1658_s6 + $0x10] sm:$0xe] }
  0x2a   : > { %v672_v50 = vpack.c.bf16 %v650_v47, %v647_v16  ;;  %v237_v3 = vpack.c.bf16 %v232_v23, %v231_v22  ;;  %v654_v33 = vrot.slane %v617_v60, 1  ;;  %v1405_v22 = vor.u32 %v1518_v19, %v1404_v6  ;;  %v1408_v47 = vld [vmem:[%s1658_s6 + $0x38] sm:$0xf]  ;;  %v1499_v6 = vld [vmem:[%s1658_s6 + $0x10] sm:$0xe] }
  0x2b   : > { %1382 = vmatmul.msk.bf16.vlgmr.msrb.gmra.mxu2 %vm311_vm2, %v458_v1  ;;  %v441_v63 = vrot.slane %v414_v54, 2  ;;  %v615_v1 = vunpack.c.l.bf16 %v1423_v55  ;;  %v440_v24 = vsel %vm425_vm3, %v438_v61, %v439_v62  ;;  %v415_v29 = vunpack.c.l.bf16 %v407_v8  ;;  %v1478_v62 = vld [vmem:[%s1658_s6 + $0x10] sm:$0xf]  ;;  %v1500_v19 = vld [vmem:[%s1658_s6 + $0x18] sm:$0xe] }
  0x2c   : > { %v416_v32 = vunpack.c.l.bf16 %v408_v10  ;;  %v445_v26 = vrot.slane %v254_v45, 2  ;;  %v448_v39 = vrot.slane %v255_v46, 2  ;;  %v619_v40 = vunpack.c.l.bf16 %v1427_v11  ;;  %v1436_v46 = vld [vmem:[%s1658_s6 + $0x8] sm:$0xe]  ;;  %v1459_v10 = vld [vmem:[%s1658_s6 + $0x10] sm:$0xf] }
  0x2d   : > { %1411 = vmatmul.msk.bf16.vlgmr.msrb.gmra.mxu3 %vm311_vm2, %v1397_v58  ;;  %v616_v58 = vunpack.c.l.bf16 %v1833_v56  ;;  %v443_v30 = vsel %vm425_vm3, %v441_v63, %v442_v0  ;;  %v651_v4 = vrot.slane %v615_v1, 1  ;;  %v444_v21 = vrot.slane %v415_v29, 2  ;;  %v1479_v63 = vld [vmem:[%s1658_s6 + $0x14] sm:$0x1]  ;;  %v1480_v0 = vld [vmem:[%s1658_s6 + $0x18] sm:$0xf] }
  0x2e   : > { %v460_v20 = vpack.c.bf16 %v443_v30, %v440_v24  ;;  %v447_v31 = vrot.slane %v416_v32, 2  ;;  %v620_v43 = vunpack.c.l.bf16 %v1867_v38  ;;  %v621_v44 = vunpack.c.l.bf16 %v1429_v14  ;;  %v1481_v1 = vld [vmem:[%s1658_s6 + $0x1c] sm:$0x1] }
  0x2f   : > { %v652_v25 = vrot.slane %v616_v58, 1  ;;  %v657_v16 = vrot.slane %v619_v40, 1  ;;  %v737_v52 = vunpack.c.l.bf16 %v1436_v46  ;;  %v1409_v54 = vor.u32 %v1519_v48, %v1408_v47  ;;  %v1484_v46 = vld [vmem:[%s1658_s6 + $0x28] sm:$0xf]  ;;  %v1485_v47 = vld [vmem:[%s1658_s6 + $0x2c] sm:$0x1] }
  0x30   : > { %1432 = vmatmul.msk.bf16.vlgmr.msrb.gmra.mxu0 %vm311_vm2, %v671_v5  ;;  %v655_v5 = vrot.slane %v618_v2, 1  ;;  %v658_v36 = vrot.slane %v620_v43, 1  ;;  %v660_v45 = vrot.slane %v621_v44, 1  ;;  %v738_v61 = vunpack.c.l.bf16 %v1437_v49 }
  0x31   : > { %v653_v23 = vsel %vm272_vm1, %v651_v4, %v652_v25  ;;  %v754_v60 = vrot.slane %v608_v51, 2  ;;  %v753_v24 = vrot.slane %v737_v52, 2  ;;  %v935_v30 = vunpack.c.l.bf16 %v1479_v63 }
  0x32   : > { %v656_v7 = vsel %vm272_vm1, %v654_v33, %v655_v5  ;;  %v659_v55 = vsel %vm272_vm1, %v657_v16, %v658_v36  ;;  %v757_v4 = vrot.slane %v610_v53, 2  ;;  %v756_v25 = vrot.slane %v738_v61, 2 }
  0x33   : > { %v673_v28 = vpack.c.bf16 %v656_v7, %v653_v23  ;;  %v936_v33 = vunpack.c.l.bf16 %v1480_v0  ;;  %v937_v5 = vunpack.c.l.bf16 %v1481_v1  ;;  %v755_v34 = vsel %vm425_vm3, %v753_v24, %v754_v60 }
  0x34   : > { %v758_v37 = vsel %vm425_vm3, %v756_v25, %v757_v4  ;;  %v1065_v7 = vunpack.c.l.bf16 %v1500_v19  ;;  %v1081_v14 = vrot.slane %v935_v30, 2  ;;  %v760_v49 = vrot.slane %v612_v42, 2  ;;  %v1440_v19 = vld [vmem:[%s1658_s6 + $0x28] sm:$0xe] }
  0x35   : > { %v969_v53 = vrot.slane %v936_v33, 1  ;;  %v970_v23 = vrot.slane %v937_v5, 1  ;;  %v785_v8 = vpack.c.bf16 %v758_v37, %v755_v34  ;;  %v940_v63 = vunpack.c.l.bf16 %v1484_v46 }
  0x36   : > { %v941_v0 = vunpack.c.l.bf16 %v1485_v47 }
  0x37   : > { %v971_v11 = vsel %vm272_vm1, %v969_v53, %v970_v23  ;;  %v741_v23 = vunpack.c.l.bf16 %v1440_v19 }
  0x38   : > { %v976_v24 = vrot.slane %v941_v0, 1 }
  0x39   : > { %1378 = vmatmul.msk.bf16.gmra.mxu1 %vm311_vm2, %v236_v17  ;;  %v1871_v17 = vld [vmem:[%s1658_s6 + $0x44] sm:$0x1] }
  0x3a   : > { %v622_v12 = vunpack.c.l.bf16 %v1871_v17 }
  0x3b   : > { %1383 = vmatmul.msk.bf16.gmra.mxu2 %vm311_vm2, %v459_v13  ;;  %v446_v13 = vsel %vm425_vm3, %v444_v21, %v445_v26  ;;  %v1083_v21 = vrot.slane %v1065_v7, 2  ;;  %v1084_v26 = vrot.slane %v937_v5, 2  ;;  %v1090_v5 = vrot.slane %v941_v0, 2 }
  0x3c   : > { %v661_v41 = vrot.slane %v622_v12, 1 }
  0x3d   : > { %1412 = vmatmul.msk.bf16.gmra.mxu3 %vm311_vm2, %v1401_v15  ;;  %v449_v15 = vsel %vm425_vm3, %v447_v31, %v448_v39  ;;  %v1438_v31 = vld [vmem:[%s1658_s6 + $0x18] sm:$0xe]  ;;  %v1439_v39 = vld [vmem:[%s1658_s6 + $0x20] sm:$0xe] }
  0x3e   : > { %v662_v57 = vsel %vm272_vm1, %v660_v45, %v661_v41  ;;  %v739_v16 = vunpack.c.l.bf16 %v1438_v31  ;;  %v740_v36 = vunpack.c.l.bf16 %v1439_v39  ;;  %v1482_v45 = vld [vmem:[%s1658_s6 + $0x20] sm:$0xf]  ;;  %v1483_v41 = vld [vmem:[%s1658_s6 + $0x24] sm:$0x1] }
  0x3f   : > { %v938_v61 = vunpack.c.l.bf16 %v1482_v45 }
  0x40   : > { %1433 = vmatmul.msk.bf16.gmra.mxu0 %vm311_vm2, %v672_v50  ;;  %v461_v50 = vpack.c.bf16 %v449_v15, %v446_v13  ;;  %v1085_v15 = vsel %vm425_vm3, %v1083_v21, %v1084_v26  ;;  %v759_v52 = vrot.slane %v739_v16, 2  ;;  %v766_v21 = vrot.slane %v616_v58, 2  ;;  %v1504_v16 = vld [vmem:[%s1658_s6 + $0x38] sm:$0xe] }
  0x41   : > { %v972_v1 = vrot.slane %v938_v61, 1  ;;  %v1069_v47 = vunpack.c.l.bf16 %v1504_v16 }
  0x42   : > { %v761_v27 = vsel %vm425_vm3, %v759_v52, %v760_v49  ;;  %v1522_v49 = vld [vmem:[%s1658_s6 + $0x34] sm:$0xf0] }
  0x49   : > { %1379 = vmatmul.msk.bf16.gmra.mxu1 %vm311_vm2, %v237_v3  ;;  %v674_v3 = vpack.c.bf16 %v662_v57, %v659_v55  ;;  %v1501_v55 = vld [vmem:[%s1658_s6 + $0x20] sm:$0xe]  ;;  %v1502_v57 = vld [vmem:[%s1658_s6 + $0x28] sm:$0xe] }
  0x4a   : > { %v1066_v9 = vunpack.c.l.bf16 %v1501_v55  ;;  %v1067_v42 = vunpack.c.l.bf16 %v1502_v57  ;;  %v1095_v57 = vrot.slane %v1069_v47, 2 }
  0x4b   : > { %1384 = vmatmul.msk.bf16.gmra.mxu2 %vm311_vm2, %v460_v20  ;;  %v967_v20 = vrot.slane %v935_v30, 1  ;;  %v1521_v30 = vld [vmem:[%s1658_s6 + $0x24] sm:$0xf0] }
  0x4c   : > { %v1086_v4 = vrot.slane %v1066_v9, 2  ;;  %v1089_v33 = vrot.slane %v1067_v42, 2 }
  0x4d   : > { %1413 = vmatmul.msk.bf16.gmra.mxu3 %vm311_vm2, %v1405_v22  ;;  %v1064_v22 = vunpack.c.l.bf16 %v1499_v6 }
  0x4e   : > { %v1091_v53 = vsel %vm425_vm3, %v1089_v33, %v1090_v5  ;;  %v775_v5 = vrot.slane %v622_v12, 2 }
  0x4f   : > { %v1080_v32 = vrot.slane %v1064_v22, 2 }
  0x50   : > { %1434 = vmatmul.msk.bf16.gmra.mxu0 %vm311_vm2, %v673_v28  ;;  %v1520_v28 = vld [vmem:[%s1658_s6 + $0x14] sm:$0xf0] }
  0x51   : > { %v1460_v40 = vor.u32 %v1520_v28, %v1459_v10  ;;  %v1082_v13 = vsel %vm425_vm3, %v1080_v32, %v1081_v14  ;;  %v1486_v10 = vld [vmem:[%s1658_s6 + $0x30] sm:$0xf]  ;;  %v1487_v28 = vld [vmem:[%s1658_s6 + $0x34] sm:$0x1]  ;;  %v1489_v32 = vld [vmem:[%s1658_s6 + $0x3c] sm:$0x1] }
  0x52   : > { %v1112_v48 = vpack.c.bf16 %v1085_v15, %v1082_v13  ;;  %v765_v14 = vrot.slane %v741_v23, 2  ;;  %v942_v26 = vunpack.c.l.bf16 %v1486_v10  ;;  %v943_v31 = vunpack.c.l.bf16 %v1487_v28  ;;  %v1503_v15 = vld [vmem:[%s1658_s6 + $0x30] sm:$0xe]  ;;  %v1471_v10 = vld [vmem:[%s1658_s6 + $0x40] sm:$0xf] }
  0x53   : > { %v945_v13 = vunpack.c.l.bf16 %v1489_v32  ;;  %v1068_v45 = vunpack.c.l.bf16 %v1503_v15  ;;  %v1523_v28 = vld [vmem:[%s1658_s6 + $0x44] sm:$0xf0] }
  0x54   : > { %v978_v56 = vrot.slane %v942_v26, 1  ;;  %v979_v58 = vrot.slane %v943_v31, 1  ;;  %v1093_v55 = vrot.slane %v943_v31, 2 }
  0x55   : > { %v982_v59 = vrot.slane %v945_v13, 1  ;;  %v1092_v52 = vrot.slane %v1068_v45, 2  ;;  %v1096_v61 = vrot.slane %v945_v13, 2 }
  0x57   : > { %v1094_v42 = vsel %vm425_vm3, %v1092_v52, %v1093_v55 }
  0x59   : > { %1380 = vmatmul.msk.bf16.gmra.mxu1 %vm311_vm2, %v1808_v35  ;;  %v934_v35 = vunpack.c.l.bf16 %v1478_v62  ;;  %v939_v62 = vunpack.c.l.bf16 %v1483_v41 }
  0x5b   : > { %1385 = vmatmul.msk.bf16.gmra.mxu2 %vm311_vm2, %v461_v50  ;;  %v966_v51 = vrot.slane %v934_v35, 1  ;;  %v763_v50 = vrot.slane %v614_v18, 2  ;;  %v973_v60 = vrot.slane %v939_v62, 1  ;;  %v1463_v35 = vld [vmem:[%s1658_s6 + $0x20] sm:$0xf]  ;;  %v1087_v25 = vrot.slane %v939_v62, 2 }
  0x5c   : > { %v1464_v22 = vor.u32 %v1521_v30, %v1463_v35  ;;  %v1442_v62 = vld [vmem:[%s1658_s6 + $0x38] sm:$0xe]  ;;  %v1493_v35 = vld [vmem:[%s1658_s6 + $0x4c] sm:$0x1] }
  0x5d   : > { %1414 = vmatmul.msk.bf16.gmra.mxu3 %vm311_vm2, %v1409_v54  ;;  %v968_v29 = vsel %vm272_vm1, %v966_v51, %v967_v20  ;;  %v762_v54 = vrot.slane %v740_v36, 2  ;;  %v974_v34 = vsel %vm272_vm1, %v972_v1, %v973_v60  ;;  %v1441_v20 = vld [vmem:[%s1658_s6 + $0x30] sm:$0xe]  ;;  %v1088_v37 = vsel %vm425_vm3, %v1086_v4, %v1087_v25  ;;  %v1490_v60 = vld [vmem:[%s1658_s6 + $0x40] sm:$0xf] }
  0x5e   : > { %v998_v44 = vpack.c.bf16 %v971_v11, %v968_v29  ;;  %v1488_v29 = vld [vmem:[%s1658_s6 + $0x38] sm:$0xf]  ;;  %v1113_v11 = vpack.c.bf16 %v1091_v53, %v1088_v37  ;;  %v767_v36 = vsel %vm425_vm3, %v765_v14, %v766_v21  ;;  %v772_v25 = vrot.slane %v620_v43, 2 }
  0x5f   : > { %v764_v18 = vsel %vm425_vm3, %v762_v54, %v763_v50  ;;  %v980_v50 = vsel %vm272_vm1, %v978_v56, %v979_v58 }
  0x60   : > { %1435 = vmatmul.msk.bf16.gmra.mxu0 %vm311_vm2, %v674_v3  ;;  %v975_v3 = vrot.slane %v940_v63, 1  ;;  %v786_v6 = vpack.c.bf16 %v764_v18, %v761_v27  ;;  %v1443_v63 = vld [vmem:[%s1658_s6 + $0x40] sm:$0xe]  ;;  %v1097_v27 = vsel %vm425_vm3, %v1095_v57, %v1096_v61  ;;  %v743_v18 = vunpack.c.l.bf16 %v1442_v62 }
  0x61   : > { %v744_v1 = vunpack.c.l.bf16 %v1443_v63  ;;  %v1114_v30 = vpack.c.bf16 %v1097_v27, %v1094_v42 }
  0x62   : > { %v977_v51 = vsel %vm272_vm1, %v975_v3, %v976_v24  ;;  %v1491_v3 = vld [vmem:[%s1658_s6 + $0x44] sm:$0x1]  ;;  %v1492_v24 = vld [vmem:[%s1658_s6 + $0x48] sm:$0xf]  ;;  %v771_v4 = vrot.slane %v743_v18, 2 }
  0x63   : > { %v999_v7 = vpack.c.bf16 %v977_v51, %v974_v34  ;;  %v774_v33 = vrot.slane %v744_v1, 2  ;;  %v947_v19 = vunpack.c.l.bf16 %v1491_v3  ;;  %v948_v34 = vunpack.c.l.bf16 %v1492_v24 }
  0x64   : > { %v949_v51 = vunpack.c.l.bf16 %v1493_v35  ;;  %v773_v37 = vsel %vm425_vm3, %v771_v4, %v772_v25 }
  0x65   : > { %v776_v53 = vsel %vm425_vm3, %v774_v33, %v775_v5  ;;  %v987_v17 = vrot.slane %v948_v34, 1  ;;  %v1099_v32 = vrot.slane %v947_v19, 2 }
  0x66   : > { %v988_v12 = vrot.slane %v949_v51, 1  ;;  %v1102_v14 = vrot.slane %v949_v51, 2 }
  0x68   : > { %v989_v31 = vsel %vm272_vm1, %v987_v17, %v988_v12 }
  0x69   : > { %1445 = vmatmul.msk.bf16.vlgmr.msra.gmra.mxu1 %vm311_vm2, %v785_v8  ;;  %v742_v8 = vunpack.c.l.bf16 %v1441_v20  ;;  %v1505_v20 = vld [vmem:[%s1658_s6 + $0x40] sm:$0xe] }
  0x6a   : > { %v1070_v38 = vunpack.c.l.bf16 %v1505_v20 }
  0x6b   : > { %1474 = vmatmul.msk.bf16.vlgmr.msra.gmra.mxu2 %vm311_vm2, %v1460_v40  ;;  %v768_v39 = vrot.slane %v742_v8, 2  ;;  %v769_v40 = vrot.slane %v618_v2, 2  ;;  %v788_v8 = vpack.c.bf16 %v776_v53, %v773_v37 }
  0x6d   : > { %1495 = vmatmul.msk.bf16.vlgmr.msra.gmra.mxu3 %vm311_vm2, %v998_v44  ;;  %v944_v44 = vunpack.c.l.bf16 %v1488_v29  ;;  %v770_v41 = vsel %vm425_vm3, %v768_v39, %v769_v40  ;;  %v1098_v29 = vrot.slane %v1070_v38, 2  ;;  %v1472_v39 = vor.u32 %v1523_v28, %v1471_v10 }
  0x6e   : > { %v787_v2 = vpack.c.bf16 %v770_v41, %v767_v36 }
  0x6f   : > { %v981_v46 = vrot.slane %v944_v44, 1  ;;  %v1100_v44 = vsel %vm425_vm3, %v1098_v29, %v1099_v32 }
  0x70   : > { %1508 = vmatmul.msk.bf16.vlgmr.msra.gmra.mxu0 %vm311_vm2, %v1112_v48  ;;  %v1467_v48 = vld [vmem:[%s1658_s6 + $0x30] sm:$0xf] }
  0x71   : > { %v983_v54 = vsel %vm272_vm1, %v981_v46, %v982_v59  ;;  %v1468_v0 = vor.u32 %v1522_v49, %v1467_v48 }
  0x72   : > { %v1000_v9 = vpack.c.bf16 %v983_v54, %v980_v50 }
  0x79   : > { %1446 = vmatmul.msk.bf16.gmra.mxu1 %vm311_vm2, %v786_v6  ;;  %v946_v6 = vunpack.c.l.bf16 %v1490_v60 }
  0x7b   : > { %1475 = vmatmul.msk.bf16.gmra.mxu2 %vm311_vm2, %v1464_v22  ;;  %v1506_v22 = vld [vmem:[%s1658_s6 + $0x48] sm:$0xe]  ;;  %v984_v23 = vrot.slane %v946_v6, 1 }
  0x7c   : > { %v1071_v43 = vunpack.c.l.bf16 %v1506_v22 }
  0x7d   : > { %1496 = vmatmul.msk.bf16.gmra.mxu3 %vm311_vm2, %v999_v7  ;;  %v985_v7 = vrot.slane %v947_v19, 1 }
  0x7f   : > { %v986_v26 = vsel %vm272_vm1, %v984_v23, %v985_v7 }
  0x80   : > { %1509 = vmatmul.msk.bf16.gmra.mxu0 %vm311_vm2, %v1113_v11  ;;  %v1101_v11 = vrot.slane %v1071_v43, 2  ;;  %v1001_v40 = vpack.c.bf16 %v989_v31, %v986_v26 }
  0x82   : > { %v1103_v13 = vsel %vm425_vm3, %v1101_v11, %v1102_v14  ;;  %v2041_v14 = vld [vmem:[%s2133_s2] ss:$0 sm:$0xff] }
  0x83   : > { %v1115_v15 = vpack.c.bf16 %v1103_v13, %v1100_v44 }
  0x89   : > { %1447 = vmatmul.msk.bf16.gmra.mxu1 %vm311_vm2, %v787_v2 }
  0x8b   : > { %1476 = vmatmul.msk.bf16.gmra.mxu2 %vm311_vm2, %v1468_v0 }
  0x8d   : > { %1497 = vmatmul.msk.bf16.gmra.mxu3 %vm311_vm2, %v1000_v9 }
  0x90   : > { %1510 = vmatmul.msk.bf16.gmra.mxu0 %vm311_vm2, %v1114_v30 }
  0x96   : > { %v1983_v21 = vpop.f32.mrf.mxu1 }
  0x99   : > { %1448 = vmatmul.msk.bf16.gmra.mxu1 %vm311_vm2, %v788_v8 }
  0x9b   : > { %1477 = vmatmul.msk.bf16.gmra.mxu2 %vm311_vm2, %v1472_v39 }
  0x9d   : > { %v337_v16 = vpop.f32.mrf.mxu0  ;;  %1498 = vmatmul.msk.bf16.gmra.mxu3 %vm311_vm2, %v1001_v40 }
  0x9e   : > { %v1992_v36 = vpop.f32.mrf.mxu2  ;;  %v1994_v56 = vpop.f32.mrf.mxu1 }
  0xa0   : > { %1511 = vmatmul.msk.bf16.gmra.mxu0 %vm311_vm2, %v1115_v15  ;;  %v1997_v58 = vpop.f32.mrf.mxu3 }
  0xa5   : > { %v339_v45 = vpop.f32.mrf.mxu0 }
  0xa6   : > { %v1999_v41 = vpop.f32.mrf.mxu2  ;;  %v381_v46 = vpop.f32.mrf.mxu1 }
  0xa7   : > { %v382_v19 = vadd.f32 %v381_v46, %v337_v16 }
  0xa8   : > { %v2001_v59 = vpop.f32.mrf.mxu3 }
  0xad   : > { %v701_v47 = vpop.f32.mrf.mxu0 }
  0xae   : > { %v488_v2 = vpop.f32.mrf.mxu2  ;;  %v383_v48 = vpop.f32.mrf.mxu1 }
  0xaf   : > { %v508_v34 = vadd.f32 %v488_v2, %v382_v19  ;;  %v384_v38 = vadd.f32 %v383_v48, %v339_v45 }
  0xb0   : > { %v563_v49 = vpop.f32.mrf.mxu3 }
  0xb1   : > { %v583_v37 = vadd.f32 %v563_v49, %v508_v34 }
  0xb3   : > { %v721_v23 = vadd.f32 %v701_v47, %v583_v37 }
  0xb5   : > { %v703_v50 = vpop.f32.mrf.mxu0 }
  0xb6   : > { %v490_v52 = vpop.f32.mrf.mxu2  ;;  %v386_v54 = vpop.f32.mrf.mxu1 }
  0xb7   : > { %v509_v43 = vadd.f32 %v490_v52, %v384_v38  ;;  %v387_v32 = vadd.f32 %v386_v54, %v1983_v21 }
  0xb8   : > { %v565_v55 = vpop.f32.mrf.mxu3 }
  0xb9   : > { %v584_v10 = vadd.f32 %v565_v55, %v509_v43 }
  0xbb   : > { %v722_v39 = vadd.f32 %v703_v50, %v584_v10 }
  0xbd   : > { %v706_v57 = vpop.f32.mrf.mxu0 }
  0xbe   : > { %v493_v61 = vpop.f32.mrf.mxu2  ;;  %v388_v62 = vpop.f32.mrf.mxu1 }
  0xbf   : > { %v510_v26 = vadd.f32 %v493_v61, %v387_v32  ;;  %v389_v21 = vadd.f32 %v388_v62, %v1994_v56 }
  0xc0   : > { %v568_v63 = vpop.f32.mrf.mxu3 }
  0xc1   : > { %v585_v45 = vadd.f32 %v568_v63, %v510_v26 }
  0xc3   : > { %v723_v55 = vadd.f32 %v706_v57, %v585_v45 }
  0xc5   : > { %v2003_v0 = vpop.f32.mrf.mxu0 }
  0xc6   : > { %v495_v9 = vpop.f32.mrf.mxu2  ;;  %v2005_v42 = vpop.f32.mrf.mxu1 }
  0xc7   : > { %v511_v52 = vadd.f32 %v495_v9, %v389_v21  ;;  %v392_v62 = vadd.f32 %v2005_v42, %v1992_v36 }
  0xc8   : > { %v570_v27 = vpop.f32.mrf.mxu3 }
  0xc9   : > { %v586_v63 = vadd.f32 %v570_v27, %v511_v52 }
  0xcd   : > { %v2007_v18 = vpop.f32.mrf.mxu0 }
  0xce   : > { %v2009_v1 = vpop.f32.mrf.mxu2  ;;  %v2011_v60 = vpop.f32.mrf.mxu1 }
  0xd0   : > { %v2013_v3 = vpop.f32.mrf.mxu3 }
  0xd5   : > { %v2015_v24 = vpop.f32.mrf.mxu0 }
  0xd6   : > { %v2017_v35 = vpop.f32.mrf.mxu2  ;;  %v2019_v30 = vpop.f32.mrf.mxu1 }
  0xd8   : > { %v2021_v4 = vpop.f32.mrf.mxu3 }
  0xdd   : > { %v2023_v25 = vpop.f32.mrf.mxu0 }
  0xde   : > { %v2025_v33 = vpop.f32.mrf.mxu2  ;;  %v2027_v5 = vpop.f32.mrf.mxu1 }
  0xe0   : > { %v2029_v6 = vpop.f32.mrf.mxu3 }
  0xe5   : > { %v2031_v51 = vpop.f32.mrf.mxu0 }
  0xe6   : > { %v2033_v20 = vpop.f32.mrf.mxu2  ;;  %v815_v22 = vpop.f32.mrf.mxu1 }
  0xe7   : > { %v835_v7 = vadd.f32 %v815_v22, %v721_v23 }
  0xe8   : > { %v2035_v53 = vpop.f32.mrf.mxu3 }
  0xed   : > { %v1142_v17 = vpop.f32.mrf.mxu0 }
  0xee   : > { %v890_v12 = vpop.f32.mrf.mxu2  ;;  %v817_v8 = vpop.f32.mrf.mxu1 }
  0xef   : > { %v910_v28 = vadd.f32 %v890_v12, %v835_v7  ;;  %v836_v44 = vadd.f32 %v817_v8, %v722_v39  ;;  %v512_v7 = vadd.f32 %v2009_v1, %v392_v62  ;;  %v724_v12 = vadd.f32 %v2003_v0, %v586_v63 }
  0xf0   : > { %v1028_v29 = vpop.f32.mrf.mxu3 }
  0xf1   : > { %v1048_v11 = vadd.f32 %v1028_v29, %v910_v28  ;;  %v587_v42 = vadd.f32 %v2013_v3, %v512_v7 }
  0xf3   : > { %v1162_v31 = vadd.f32 %v1142_v17, %v1048_v11  ;;  %v725_v45 = vadd.f32 %v2007_v18, %v587_v42  ;;  %v397_v18 = vadd.f32 %v2019_v30, %v1997_v58 }
  0xf5   : > { %v1174_v40 = vadd.f32 %v2041_v14, %v1162_v31  ;;  %v1144_v13 = vpop.f32.mrf.mxu0  ;;  %v394_v31 = vadd.f32 %v2011_v60, %v1999_v41 }
  0xf6   : > { %v892_v15 = vpop.f32.mrf.mxu2  ;;  %v820_v16 = vpop.f32.mrf.mxu1 }
  0xf7   : > { %v1182_v46 = vmin.f32 %v1174_v40, 30.0  ;;  %v911_v47 = vadd.f32 %v892_v15, %v836_v44  ;;  %v837_v61 = vadd.f32 %v820_v16, %v723_v55  ;;  %v513_v15 = vadd.f32 %v2017_v35, %v394_v31 }
  0xf8   : > { %v1030_v2 = vpop.f32.mrf.mxu3 }
  0xf9   : > { %v1190_v48 = vmul.f32 1.442695, %v1182_v46  ;;  %v1049_v49 = vadd.f32 %v1030_v2, %v911_v47  ;;  %v588_v55 = vadd.f32 %v2021_v4, %v513_v15 }
  0xfb   : > { %1556 = vpow2.f32 %v1190_v48  ;;  %v1163_v54 = vadd.f32 %v1144_v13, %v1049_v49  ;;  %v1525_v13 = vld [vmem:[%s2063_s20] sm:$0xff]   ;;  %v726_v30 = vadd.f32 %v2015_v24, %v588_v55 }
  0xfc   : > { %v1526_v2 = vunpack.c.l.bf16 %v1525_v13 }
  0xfd   : > { %v2046_v50 = vadd.f32 %v2041_v14, %v1163_v54  ;;  %v1147_v19 = vpop.f32.mrf.mxu0 }
  0xfe   : > { %v895_v34 = vpop.f32.mrf.mxu2  ;;  %v822_v22 = vpop.f32.mrf.mxu1 }
  0xff   : > { %v1183_v37 = vmin.f32 %v2046_v50, 30.0  ;;  %v912_v38 = vadd.f32 %v895_v34, %v837_v61  ;;  %v838_v10 = vadd.f32 %v822_v22, %v724_v12 }
 0x100   : > { %v1033_v43 = vpop.f32.mrf.mxu3 }
 0x101   : > { %v1557_v56 = vpop.eup %1556  ;;  %v1192_v9 = vmul.f32 1.442695, %v1183_v37  ;;  %v1050_v57 = vadd.f32 %v1033_v43, %v912_v38  ;;  %v514_v38 = vadd.f32 %v2025_v33, %v397_v18  ;;  %v1527_v33 = vunpack.c.h.bf16 %v1525_v13 }
 0x102   : > { %v1206_v23 = vadd.f32 2.0, %v1557_v56 }
 0x103   : > { %1558 = vpow2.f32 %v1192_v9  ;;  %v1164_v17 = vadd.f32 %v1147_v19, %v1050_v57  ;;  %v589_v7 = vadd.f32 %v2029_v6, %v514_v38 }
 0x104   : > { %v1214_v27 = vmul.f32 %v1557_v56, %v1206_v23 }
 0x105   : > { %v2055_v8 = vadd.f32 %v2041_v14, %v1164_v17  ;;  %v1149_v28 = vpop.f32.mrf.mxu0 }
 0x106   : > { %v1230_v29 = vadd.f32 2.0, %v1214_v27  ;;  %v897_v32 = vpop.f32.mrf.mxu2  ;;  %v825_v36 = vpop.f32.mrf.mxu1  ;;  %v1222_v47 = vmul.f32 %v1214_v27, %v1174_v40 }
 0x107   : > { %v1184_v0 = vmin.f32 %v2055_v8, 30.0  ;;  %v913_v1 = vadd.f32 %v897_v32, %v838_v10  ;;  %v839_v48 = vadd.f32 %v825_v36, %v725_v45  ;;  %v399_v36 = vadd.f32 %v2027_v5, %v2001_v59 }
 0x108   : > { %1560 = vrcp.f32 %v1230_v29  ;;  %v1035_v11 = vpop.f32.mrf.mxu3 }
 0x109   : > { %v1559_v26 = vpop.eup %1558  ;;  %v1194_v39 = vmul.f32 1.442695, %v1184_v0  ;;  %v1051_v44 = vadd.f32 %v1035_v11, %v913_v1  ;;  %v1540_v11 = vld [vmem:[%s2063_s20 + $0x8] sm:$0xff]   ;;  %v515_v31 = vadd.f32 %v2033_v20, %v399_v36 }
 0x10a   : > { %v1207_v3 = vadd.f32 2.0, %v1559_v26  ;;  %v1530_v15 = vunpack.c.l.bf16 %v1540_v11 }
 0x10b   : > { %1562 = vpow2.f32 %v1194_v39  ;;  %v1165_v16 = vadd.f32 %v1149_v28, %v1051_v44 }
 0x10c   : > { %v1215_v46 = vmul.f32 %v1559_v26, %v1207_v3  ;;  %v727_v26 = vadd.f32 %v2023_v25, %v589_v7  ;;  %v590_v25 = vadd.f32 %v2035_v53, %v515_v31 }
 0x10d   : > { %v2072_v21 = vadd.f32 %v2041_v14, %v1165_v16  ;;  %v1152_v49 = vpop.f32.mrf.mxu0 }
 0x10e   : > { %v1561_v52 = vpop.eup %1560  ;;  %v1231_v41 = vadd.f32 2.0, %v1215_v46  ;;  %v900_v60 = vpop.f32.mrf.mxu2  ;;  %v1223_v62 = vmul.f32 %v1215_v46, %v2046_v50 }
 0x10f   : > { %v827_v54 = vpop.f32.mrf.mxu1  ;;  %v1246_v35 = vmul.f32 %v1561_v52, %v1222_v47  ;;  %v1185_v61 = vmin.f32 %v2072_v21, 30.0  ;;  %v914_v19 = vadd.f32 %v900_v60, %v839_v48 }
 0x110   : > { %1564 = vrcp.f32 %v1231_v41  ;;  %v1038_v40 = vpop.f32.mrf.mxu3  ;;  %v840_v57 = vadd.f32 %v827_v54, %v726_v30 }
 0x111   : > { %v1563_v34 = vpop.eup %1562  ;;  %v1270_v22 = vadd.f32 %v1526_v2, %v1246_v35  ;;  %v1196_v63 = vmul.f32 1.442695, %v1185_v61  ;;  %v1052_v37 = vadd.f32 %v1038_v40, %v914_v19  ;;  %v728_v19 = vadd.f32 %v2031_v51, %v590_v25 }
 0x112   : > { %v1208_v4 = vadd.f32 2.0, %v1563_v34  ;;  %v1531_v40 = vunpack.c.h.bf16 %v1540_v11 }
 0x113   : > { %v1278_v43 = vpack.c.bf16 %v1270_v22, %v1270_v22  ;;  %1566 = vpow2.f32 %v1196_v63  ;;  %v1166_v58 = vadd.f32 %v1152_v49, %v1052_v37 }
 0x114   : > { %v1216_v56 = vmul.f32 %v1563_v34, %v1208_v4 }
 0x115   : > { %1287 = vst.msk [vmem:[%s2084_s23] sm:$0xf] %vm1286_vm4, %v1278_v43  ;;  %v2091_v9 = vadd.f32 %v2041_v14, %v1166_v58  ;;  %v1154_v12 = vpop.f32.mrf.mxu0 }
 0x116   : > { %v1565_v23 = vpop.eup %1564  ;;  %v1232_v17 = vadd.f32 2.0, %v1216_v56  ;;  %v902_v27 = vpop.f32.mrf.mxu2  ;;  %v1224_v3 = vmul.f32 %v1216_v56, %v2055_v8 }
 0x117   : > { %v1247_v10 = vmul.f32 %v1565_v23, %v1223_v62  ;;  %v1186_v24 = vmin.f32 %v2091_v9, 30.0  ;;  %v915_v28 = vadd.f32 %v902_v27, %v840_v57  ;;  %v830_v50 = vpop.f32.mrf.mxu1  ;;  %v1541_v57 = vld [vmem:[%s2063_s20 + $0x10] sm:$0xff]  }
 0x118   : > { %1568 = vrcp.f32 %v1232_v17  ;;  %v1040_v29 = vpop.f32.mrf.mxu3  ;;  %v841_v5 = vadd.f32 %v830_v50, %v727_v26  ;;  %v1535_v26 = vunpack.c.h.bf16 %v1541_v57 }
 0x119   : > { %v1567_v32 = vpop.eup %1566  ;;  %v1271_v42 = vadd.f32 %v1527_v33, %v1247_v10  ;;  %v1198_v0 = vmul.f32 1.442695, %v1186_v24  ;;  %v1053_v1 = vadd.f32 %v1040_v29, %v915_v28  ;;  %v1534_v10 = vunpack.c.l.bf16 %v1541_v57 }
 0x11a   : > { %v1209_v6 = vadd.f32 2.0, %v1567_v32 }
 0x11b   : > { %v1279_v39 = vpack.c.bf16 %v1271_v42, %v1271_v42  ;;  %1570 = vpow2.f32 %v1198_v0  ;;  %v1167_v44 = vadd.f32 %v1154_v12, %v1053_v1 }
 0x11c   : > { %v1217_v13 = vmul.f32 %v1567_v32, %v1209_v6 }
 0x11d   : > { %1288 = vst.msk [vmem:[%s2084_s23 + $0x4] sm:$0xf] %vm1286_vm4, %v1279_v39  ;;  %v2104_v59 = vadd.f32 %v2041_v14, %v1167_v44  ;;  %v1157_v48 = vpop.f32.mrf.mxu0 }
 0x11e   : > { %v1569_v16 = vpop.eup %1568  ;;  %v1233_v45 = vadd.f32 2.0, %v1217_v13  ;;  %v905_v46 = vpop.f32.mrf.mxu2  ;;  %v1225_v18 = vmul.f32 %v1217_v13, %v2072_v21 }
 0x11f   : > { %v1248_v47 = vmul.f32 %v1569_v16, %v1224_v3  ;;  %v1187_v20 = vmin.f32 %v2104_v59, 30.0  ;;  %v916_v2 = vadd.f32 %v905_v46, %v841_v5  ;;  %v832_v55 = vpop.f32.mrf.mxu1  ;;  %v1542_v3 = vld [vmem:[%s2063_s20 + $0x18] sm:$0xff]  }
 0x120   : > { %1572 = vrcp.f32 %v1233_v45  ;;  %v1043_v49 = vpop.f32.mrf.mxu3  ;;  %v842_v22 = vadd.f32 %v832_v55, %v728_v19  ;;  %v1538_v46 = vunpack.c.l.bf16 %v1542_v3 }
 0x121   : > { %v1571_v52 = vpop.eup %1570  ;;  %v1272_v8 = vadd.f32 %v1530_v15, %v1248_v47  ;;  %v1200_v41 = vmul.f32 1.442695, %v1187_v20  ;;  %v1054_v60 = vadd.f32 %v1043_v49, %v916_v2  ;;  %v1539_v49 = vunpack.c.h.bf16 %v1542_v3 }
 0x122   : > { %v1210_v54 = vadd.f32 2.0, %v1571_v52 }
 0x123   : > { %v1280_v35 = vpack.c.bf16 %v1272_v8, %v1272_v8  ;;  %1574 = vpow2.f32 %v1200_v41  ;;  %v1168_v61 = vadd.f32 %v1157_v48, %v1054_v60 }
 0x124   : > { %v1218_v53 = vmul.f32 %v1571_v52, %v1210_v54 }
 0x125   : > { %1289 = vst.msk [vmem:[%s2084_s23 + $0x8] sm:$0xf] %vm1286_vm4, %v1280_v35  ;;  %v1180_v34 = vadd.f32 %v2041_v14, %v1168_v61  ;;  %v1159_v23 = vpop.f32.mrf.mxu0 }
 0x126   : > { %v1573_v63 = vpop.eup %1572  ;;  %v1234_v37 = vadd.f32 2.0, %v1218_v53  ;;  %v907_v38 = vpop.f32.mrf.mxu2  ;;  %v1226_v27 = vmul.f32 %v1218_v53, %v2091_v9 }
 0x127   : > { %v1249_v4 = vmul.f32 %v1573_v63, %v1225_v18  ;;  %v1188_v43 = vmin.f32 %v1180_v34, 30.0  ;;  %v917_v58 = vadd.f32 %v907_v38, %v842_v22 }
 0x128   : > { %1576 = vrcp.f32 %v1234_v37  ;;  %v1045_v30 = vpop.f32.mrf.mxu3 }
 0x129   : > { %v1575_v51 = vpop.eup %1574  ;;  %v1273_v56 = vadd.f32 %v1531_v40, %v1249_v4  ;;  %v1202_v62 = vmul.f32 1.442695, %v1188_v43  ;;  %v1055_v33 = vadd.f32 %v1045_v30, %v917_v58 }
 0x12a   : > { %v1211_v21 = vadd.f32 2.0, %v1575_v51 }
 0x12b   : > { %v1281_v7 = vpack.c.bf16 %v1273_v56, %v1273_v56  ;;  %1578 = vpow2.f32 %v1202_v62  ;;  %v1169_v17 = vadd.f32 %v1159_v23, %v1055_v33 }
 0x12c   : > { %v1219_v12 = vmul.f32 %v1575_v51, %v1211_v21 }
 0x12d   : > { %1290 = vst.msk [vmem:[%s2084_s23 + $0xc] sm:$0xf] %vm1286_vm4, %v1281_v7  ;;  %v1181_v24 = vadd.f32 %v2041_v14, %v1169_v17 }
 0x12e   : > { %v1577_v28 = vpop.eup %1576  ;;  %v1235_v29 = vadd.f32 2.0, %v1219_v12  ;;  %v1227_v9 = vmul.f32 %v1219_v12, %v2104_v59 }
 0x12f   : > { %v1250_v50 = vmul.f32 %v1577_v28, %v1226_v27  ;;  %v1189_v32 = vmin.f32 %v1181_v24, 30.0 }
 0x130   : > { %1580 = vrcp.f32 %v1235_v29 }
 0x131   : > { %v1579_v36 = vpop.eup %1578  ;;  %v1274_v42 = vadd.f32 %v1534_v10, %v1250_v50  ;;  %v1204_v0 = vmul.f32 1.442695, %v1189_v32 }
 0x132   : > { %v1212_v1 = vadd.f32 2.0, %v1579_v36 }
 0x133   : > { %v1282_v11 = vpack.c.bf16 %v1274_v42, %v1274_v42  ;;  %1582 = vpow2.f32 %v1204_v0 }
 0x134   : > { %v1220_v6 = vmul.f32 %v1579_v36, %v1212_v1 }
 0x135   : > { %1291 = vst.msk [vmem:[%s2084_s23 + $0x10] sm:$0xf] %vm1286_vm4, %v1282_v11 }
 0x136   : > { %v1581_v14 = vpop.eup %1580  ;;  %v1236_v31 = vadd.f32 2.0, %v1220_v6  ;;  %v1228_v45 = vmul.f32 %v1220_v6, %v1180_v34 }
 0x137   : > { %v1251_v39 = vmul.f32 %v1581_v14, %v1227_v9 }
 0x138   : > { %1584 = vrcp.f32 %v1236_v31 }
 0x139   : > { %v1583_v44 = vpop.eup %1582  ;;  %v1275_v13 = vadd.f32 %v1535_v26, %v1251_v39 }
 0x13a   : > { %v1213_v15 = vadd.f32 2.0, %v1583_v44 }
 0x13b   : > { %v1283_v5 = vpack.c.bf16 %v1275_v13, %v1275_v13 }
 0x13c   : > { %v1221_v16 = vmul.f32 %v1583_v44, %v1213_v15 }
 0x13d   : > { %1292 = vst.msk [vmem:[%s2084_s23 + $0x14] sm:$0xf] %vm1286_vm4, %v1283_v5 }
 0x13e   : > { %v1585_v25 = vpop.eup %1584  ;;  %v1237_v47 = vadd.f32 2.0, %v1221_v16  ;;  %v1229_v48 = vmul.f32 %v1221_v16, %v1181_v24 }
 0x13f   : > { %v1252_v59 = vmul.f32 %v1585_v25, %v1228_v45 }
 0x140   : > { %1586 = vrcp.f32 %v1237_v47 }
 0x141   : > { %v1276_v20 = vadd.f32 %v1538_v46, %v1252_v59 }
 0x143   : > { %v1284_v2 = vpack.c.bf16 %v1276_v20, %v1276_v20 }
 0x145   : > { %1293 = vst.msk [vmem:[%s2084_s23 + $0x18] sm:$0xf] %vm1286_vm4, %v1284_v2 }
 0x146   : > { %v1587_v52 = vpop.eup %1586 }
 0x147   : > { %v1253_v8 = vmul.f32 %v1587_v52, %v1229_v48 }
 0x149   : > { %v1277_v41 = vadd.f32 %v1539_v49, %v1253_v8 }
 0x14b   : > { %v1285_v60 = vpack.c.bf16 %v1277_v41, %v1277_v41 }
 0x14d   : > { %1294 = vst.msk [vmem:[%s2084_s23 + $0x1c] sm:$0xf] %vm1286_vm4, %v1285_v60 }
 0x14e PF: > { %s14_s15 = sadd.s32 1, %s1594_s15  }
 0x14f   : > { %p11_p4 = scmp.ge.s32.totalorder %s14_s15, 4  }
 0x151   :  { %13 = sbr.rel (!%p11_p4) target bundleno = 1 (0x1), region = 79 }

</bundles_post_ra>
